<compile_context>
chip_gen: v5e
topology: v5e:2x2
jax: 0.10.0
libtpu: 0.0.40
codegen_flags: <defaults>
</compile_context>

<pallas_src>
import functools

import jax
import jax.numpy as jnp
from jax import lax
from jax.experimental import pallas as pl
from jax.experimental.pallas import tpu as pltpu

H = 64          # GRU hidden size (fixed by the module definition)
BN_EPS = 1e-5


def _sigmoid(v):
    # Exact identity sigma(v) = 0.5*(tanh(v/2)+1): keeps the gate nonlinearity on the
    # EUP slot and avoids a VPU divide on the serial recurrence path.
    return 0.5 * (jnp.tanh(0.5 * v) + 1.0)


def rnn1d_kernel(x_ref, w_ih_ref, w_hh_t_ref, b_ih_ref, b_hh_ref,
                 gamma_ref, beta_ref, fc_w_ref, fc_b_ref,
                 out_ref, hs_scr, *, valid_rows):
    # x_ref      : (B_pad, C)      squeezed, batch-padded input
    # w_ih_ref   : (1, 3H)         GRU W_ih (input size 1), PyTorch gate order [r | z | n]
    # w_hh_t_ref : (H, 3H)         GRU W_hh transposed
    # b_ih_ref   : (1, 3H), b_hh_ref: (1, 3H)
    # gamma_ref  : (1, C*H), beta_ref: (1, C*H)   (column index = c*H + h)
    # fc_w_ref   : (C*H, K_pad), fc_b_ref: (1, K_pad)
    # out_ref    : (B_pad, K_pad)
    # hs_scr     : (B_pad, C*H)    VMEM scratch holding all hidden states, lane-dense
    B_pad, C = x_ref.shape

    # ---- hoist loop-invariant reads into vregs -------------------------------------
    x = x_ref[...]                 # (B_pad, C)
    w_ih = w_ih_ref[...]           # (1, 3H)
    w_hh_t = w_hh_t_ref[...]       # (H, 3H)
    b_ih = b_ih_ref[...]           # (1, 3H)
    b_hh = b_hh_ref[...]           # (1, 3H)

    # ---- precompute the h-independent input-gate term for every timestep -----------
    gi_all = [x[:, t:t + 1] * w_ih + b_ih for t in range(C)]      # C x (B_pad, 3H)

    # ---- GRU recurrence, fully unrolled, h carried in vregs ------------------------
    h = jnp.zeros((B_pad, H), jnp.float32)
    for t in range(C):
        gi = gi_all[t]
        gh = jnp.dot(h, w_hh_t, preferred_element_type=jnp.float32) + b_hh   # (B_pad, 3H)
        r = _sigmoid(gi[:, 0:H] + gh[:, 0:H])
        z = _sigmoid(gi[:, H:2 * H] + gh[:, H:2 * H])
        n = jnp.tanh(gi[:, 2 * H:3 * H] + r * gh[:, 2 * H:3 * H])
        h = (1.0 - z) * n + z * h
        # Static lane-offset store into the flat feature buffer (column = t*H + h).
        # (Off the serial h-dependence chain; pairs of steps could be packed into one
        #  128-lane-aligned store, but at this size the masked store is negligible.)
        hs_scr[:, t * H:(t + 1) * H] = h

    feat = hs_scr[...]                                            # (B_pad, C*H)

    # ---- BatchNorm1d (training mode): batch statistics, biased variance ------------
    if B_pad == valid_rows:
        mean = jnp.mean(feat, axis=0, keepdims=True)              # (1, C*H)
        var = jnp.mean((feat - mean) ** 2, axis=0, keepdims=True)
    else:
        # Mask out the zero-padded batch rows so statistics use the real batch only.
        row = lax.broadcasted_iota(jnp.int32, (B_pad, 1), 0)
        mask = (row < valid_rows).astype(jnp.float32)             # (B_pad, 1)
        inv_n = 1.0 / float(valid_rows)
        mean = jnp.sum(feat * mask, axis=0, keepdims=True) * inv_n
        diff = (feat - mean) * mask
        var = jnp.sum(diff * diff, axis=0, keepdims=True) * inv_n

    normed = (feat - mean) * lax.rsqrt(var + BN_EPS)
    act = jnp.tanh(normed * gamma_ref[...] + beta_ref[...])       # (B_pad, C*H)

    # ---- Linear: single MXU contraction over all C*H features, lane-dense output ---
    out_ref[...] = jnp.dot(act, fc_w_ref[...],
                           preferred_element_type=jnp.float32) + fc_b_ref[...]


def rnn_1d_forward(x, params):
    """Pallas forward matching RNN_1D.forward(x) for the canonical (B, 1, C) input."""
    w_ih, w_hh, b_ih, b_hh, gamma, beta, fc_w, fc_b = params
    # The module does x.squeeze(); for the intended (B, 1, C) input that is x[:, 0, :]
    # (explicit axis avoids collapsing the batch/seq dims when B == 1 or C == 1).
    x2 = x[:, 0, :].astype(jnp.float32)                           # (B, C)
    B, C = x2.shape
    K = fc_w.shape[0]
    CH = C * H

    B_pad = ((B + 7) // 8) * 8            # pad batch to full sublanes
    K_pad = ((K + 127) // 128) * 128      # pad classes to full lanes

    # Host-side relayouts so the kernel needs no transpose/flatten:
    #   gamma/beta/fc_w feature index h*C + c  ->  kernel column index c*H + h.
    x_k = jnp.pad(x2, ((0, B_pad - B), (0, 0)))
    w_ih_k = w_ih.reshape(1, 3 * H).astype(jnp.float32)
    w_hh_t = jnp.transpose(w_hh).astype(jnp.float32)              # (H, 3H)
    b_ih_k = b_ih.reshape(1, 3 * H).astype(jnp.float32)
    b_hh_k = b_hh.reshape(1, 3 * H).astype(jnp.float32)
    gamma_k = gamma.astype(jnp.float32).reshape(H, C).T.reshape(1, CH)
    beta_k = beta.astype(jnp.float32).reshape(H, C).T.reshape(1, CH)
    fc_w_k = (fc_w.astype(jnp.float32).T                          # (H*C, K), idx h*C + c
              .reshape(H, C, K).transpose(1, 0, 2).reshape(CH, K))  # idx c*H + h
    fc_w_k = jnp.pad(fc_w_k, ((0, 0), (0, K_pad - K)))
    fc_b_k = jnp.pad(fc_b.astype(jnp.float32).reshape(1, K), ((0, 0), (0, K_pad - K)))

    kernel = functools.partial(rnn1d_kernel, valid_rows=B)
    vmem = pl.BlockSpec(memory_space=pltpu.MemorySpace.VMEM)

    out = pl.pallas_call(
        kernel,
        out_shape=jax.ShapeDtypeStruct((B_pad, K_pad), jnp.float32),
        in_specs=[vmem] * 9,
        out_specs=vmem,
        scratch_shapes=[
            pltpu.VMEM((B_pad, CH), jnp.float32),   # all hidden states, lane-dense
        ],
    )(x_k, w_ih_k, w_hh_t, b_ih_k, b_hh_k, gamma_k, beta_k, fc_w_k, fc_b_k)

    return out[:B, :K]


def rnn_1d_reference(x, params):
    """Pure-JAX reference mirroring the PyTorch forward exactly."""
    w_ih, w_hh, b_ih, b_hh, gamma, beta, fc_w, fc_b = params
    x2 = x[:, 0, :].astype(jnp.float32)
    B, C = x2.shape
    h = jnp.zeros((B, H), jnp.float32)
    hs = []
    for c in range(C):
        xt = x2[:, c:c + 1]
        gi = xt * w_ih.reshape(1, 3 * H) + b_ih
        gh = h @ w_hh.T + b_hh
        r = jax.nn.sigmoid(gi[:, :H] + gh[:, :H])
        z = jax.nn.sigmoid(gi[:, H:2 * H] + gh[:, H:2 * H])
        n = jnp.tanh(gi[:, 2 * H:] + r * gh[:, 2 * H:])
        h = (1.0 - z) * n + z * h
        hs.append(h)
    hs = jnp.stack(hs, axis=0)                                    # (C, B, H)
    feat = jnp.transpose(hs, (1, 2, 0)).reshape(B, H * C)         # (B, 64*C), idx = h*C + c
    mean = feat.mean(axis=0, keepdims=True)
    var = ((feat - mean) ** 2).mean(axis=0, keepdims=True)
    bn = (feat - mean) / jnp.sqrt(var + BN_EPS) * gamma + beta
    act = jnp.tanh(bn)
    return act @ fc_w.T + fc_b


if __name__ == "__main__":
    input_channels = 16
    num_classes = 10
    batch = 4

    key = jax.random.PRNGKey(0)
    k = jax.random.split(key, 7)
    # Deterministic synthetic parameters (shapes from RNN_1D.__init__).
    w_ih = jax.random.uniform(k[0], (3 * H, 1), minval=-0.1, maxval=0.1)
    w_hh = jax.random.uniform(k[1], (3 * H, H), minval=-0.1, maxval=0.1)
    b_ih = jax.random.uniform(k[2], (3 * H,), minval=-0.1, maxval=0.1)
    b_hh = jax.random.uniform(k[3], (3 * H,), minval=-0.1, maxval=0.1)
    gamma = jnp.ones((H * input_channels,), jnp.float32)          # BatchNorm1d default affine
    beta = jnp.zeros((H * input_channels,), jnp.float32)
    fc_w = jax.random.uniform(k[4], (num_classes, H * input_channels), minval=-0.1, maxval=0.1)
    fc_b = jax.random.uniform(k[5], (num_classes,), minval=-0.1, maxval=0.1)
    params = (w_ih, w_hh, b_ih, b_hh, gamma, beta, fc_w, fc_b)

    # Input: (B, 1, C) -> squeeze -> (B, C), matching the module's squeeze/unsqueeze/permute path.
    x = jax.random.normal(k[6], (batch, 1, input_channels), dtype=jnp.float32)

    out = rnn_1d_forward(x, params)
    out = jax.block_until_ready(out)

    ref = jax.block_until_ready(rnn_1d_reference(x, params))
    assert out.shape == (batch, num_classes)
    assert jnp.allclose(out, ref, rtol=1e-2, atol=1e-2), (
        f"max abs diff {jnp.max(jnp.abs(out - ref))}")

    print("KERNEL_OK")
</pallas_src>

<mosaic_0001>
module attributes {stable_mosaic.version = 11 : i64} {
  func.func @rnn1d_kernel(%arg0: memref<8x16xf32, #tpu.memory_space<vmem>>, %arg1: memref<1x192xf32, #tpu.memory_space<vmem>>, %arg2: memref<64x192xf32, #tpu.memory_space<vmem>>, %arg3: memref<1x192xf32, #tpu.memory_space<vmem>>, %arg4: memref<1x192xf32, #tpu.memory_space<vmem>>, %arg5: memref<1x1024xf32, #tpu.memory_space<vmem>>, %arg6: memref<1x1024xf32, #tpu.memory_space<vmem>>, %arg7: memref<1024x128xf32, #tpu.memory_space<vmem>>, %arg8: memref<1x128xf32, #tpu.memory_space<vmem>>, %arg9: memref<8x128xf32, #tpu.memory_space<vmem>>, %arg10: memref<8x1024xf32, #tpu.memory_space<vmem>>) attributes {dimension_semantics = [], scalar_prefetch = 0 : i64, scratch_operands = 1 : i64, tpu.core_type = #tpu.core_type<tc>} {
    %c0 = arith.constant 0 : index
    %c0_0 = arith.constant 0 : index
    %0 = vector.load %arg0[%c0, %c0_0] : memref<8x16xf32, #tpu.memory_space<vmem>>, vector<8x16xf32>
    %c0_1 = arith.constant 0 : index
    %c0_2 = arith.constant 0 : index
    %1 = vector.load %arg1[%c0_1, %c0_2] : memref<1x192xf32, #tpu.memory_space<vmem>>, vector<1x192xf32>
    %c0_3 = arith.constant 0 : index
    %c0_4 = arith.constant 0 : index
    %2 = vector.load %arg2[%c0_3, %c0_4] : memref<64x192xf32, #tpu.memory_space<vmem>>, vector<64x192xf32>
    %c0_5 = arith.constant 0 : index
    %c0_6 = arith.constant 0 : index
    %3 = vector.load %arg3[%c0_5, %c0_6] : memref<1x192xf32, #tpu.memory_space<vmem>>, vector<1x192xf32>
    %c0_7 = arith.constant 0 : index
    %c0_8 = arith.constant 0 : index
    %4 = vector.load %arg4[%c0_7, %c0_8] : memref<1x192xf32, #tpu.memory_space<vmem>>, vector<1x192xf32>
    %5 = vector.extract_strided_slice %0 {offsets = [0, 0], sizes = [8, 1], strides = [1, 1]} : vector<8x16xf32> to vector<8x1xf32>
    %6 = vector.broadcast %5 : vector<8x1xf32> to vector<8x192xf32>
    %7 = vector.broadcast %1 : vector<1x192xf32> to vector<8x192xf32>
    %8 = arith.mulf %6, %7 : vector<8x192xf32>
    %9 = vector.broadcast %3 : vector<1x192xf32> to vector<8x192xf32>
    %10 = arith.addf %8, %9 : vector<8x192xf32>
    %11 = vector.extract_strided_slice %0 {offsets = [0, 1], sizes = [8, 1], strides = [1, 1]} : vector<8x16xf32> to vector<8x1xf32>
    %12 = vector.broadcast %11 : vector<8x1xf32> to vector<8x192xf32>
    %13 = vector.broadcast %1 : vector<1x192xf32> to vector<8x192xf32>
    %14 = arith.mulf %12, %13 : vector<8x192xf32>
    %15 = vector.broadcast %3 : vector<1x192xf32> to vector<8x192xf32>
    %16 = arith.addf %14, %15 : vector<8x192xf32>
    %17 = vector.extract_strided_slice %0 {offsets = [0, 2], sizes = [8, 1], strides = [1, 1]} : vector<8x16xf32> to vector<8x1xf32>
    %18 = vector.broadcast %17 : vector<8x1xf32> to vector<8x192xf32>
    %19 = vector.broadcast %1 : vector<1x192xf32> to vector<8x192xf32>
    %20 = arith.mulf %18, %19 : vector<8x192xf32>
    %21 = vector.broadcast %3 : vector<1x192xf32> to vector<8x192xf32>
    %22 = arith.addf %20, %21 : vector<8x192xf32>
    %23 = vector.extract_strided_slice %0 {offsets = [0, 3], sizes = [8, 1], strides = [1, 1]} : vector<8x16xf32> to vector<8x1xf32>
    %24 = vector.broadcast %23 : vector<8x1xf32> to vector<8x192xf32>
    %25 = vector.broadcast %1 : vector<1x192xf32> to vector<8x192xf32>
    %26 = arith.mulf %24, %25 : vector<8x192xf32>
    %27 = vector.broadcast %3 : vector<1x192xf32> to vector<8x192xf32>
    %28 = arith.addf %26, %27 : vector<8x192xf32>
    %29 = vector.extract_strided_slice %0 {offsets = [0, 4], sizes = [8, 1], strides = [1, 1]} : vector<8x16xf32> to vector<8x1xf32>
    %30 = vector.broadcast %29 : vector<8x1xf32> to vector<8x192xf32>
    %31 = vector.broadcast %1 : vector<1x192xf32> to vector<8x192xf32>
    %32 = arith.mulf %30, %31 : vector<8x192xf32>
    %33 = vector.broadcast %3 : vector<1x192xf32> to vector<8x192xf32>
    %34 = arith.addf %32, %33 : vector<8x192xf32>
    %35 = vector.extract_strided_slice %0 {offsets = [0, 5], sizes = [8, 1], strides = [1, 1]} : vector<8x16xf32> to vector<8x1xf32>
    %36 = vector.broadcast %35 : vector<8x1xf32> to vector<8x192xf32>
    %37 = vector.broadcast %1 : vector<1x192xf32> to vector<8x192xf32>
    %38 = arith.mulf %36, %37 : vector<8x192xf32>
    %39 = vector.broadcast %3 : vector<1x192xf32> to vector<8x192xf32>
    %40 = arith.addf %38, %39 : vector<8x192xf32>
    %41 = vector.extract_strided_slice %0 {offsets = [0, 6], sizes = [8, 1], strides = [1, 1]} : vector<8x16xf32> to vector<8x1xf32>
    %42 = vector.broadcast %41 : vector<8x1xf32> to vector<8x192xf32>
    %43 = vector.broadcast %1 : vector<1x192xf32> to vector<8x192xf32>
    %44 = arith.mulf %42, %43 : vector<8x192xf32>
    %45 = vector.broadcast %3 : vector<1x192xf32> to vector<8x192xf32>
    %46 = arith.addf %44, %45 : vector<8x192xf32>
    %47 = vector.extract_strided_slice %0 {offsets = [0, 7], sizes = [8, 1], strides = [1, 1]} : vector<8x16xf32> to vector<8x1xf32>
    %48 = vector.broadcast %47 : vector<8x1xf32> to vector<8x192xf32>
    %49 = vector.broadcast %1 : vector<1x192xf32> to vector<8x192xf32>
    %50 = arith.mulf %48, %49 : vector<8x192xf32>
    %51 = vector.broadcast %3 : vector<1x192xf32> to vector<8x192xf32>
    %52 = arith.addf %50, %51 : vector<8x192xf32>
    %53 = vector.extract_strided_slice %0 {offsets = [0, 8], sizes = [8, 1], strides = [1, 1]} : vector<8x16xf32> to vector<8x1xf32>
    %54 = vector.broadcast %53 : vector<8x1xf32> to vector<8x192xf32>
    %55 = vector.broadcast %1 : vector<1x192xf32> to vector<8x192xf32>
    %56 = arith.mulf %54, %55 : vector<8x192xf32>
    %57 = vector.broadcast %3 : vector<1x192xf32> to vector<8x192xf32>
    %58 = arith.addf %56, %57 : vector<8x192xf32>
    %59 = vector.extract_strided_slice %0 {offsets = [0, 9], sizes = [8, 1], strides = [1, 1]} : vector<8x16xf32> to vector<8x1xf32>
    %60 = vector.broadcast %59 : vector<8x1xf32> to vector<8x192xf32>
    %61 = vector.broadcast %1 : vector<1x192xf32> to vector<8x192xf32>
    %62 = arith.mulf %60, %61 : vector<8x192xf32>
    %63 = vector.broadcast %3 : vector<1x192xf32> to vector<8x192xf32>
    %64 = arith.addf %62, %63 : vector<8x192xf32>
    %65 = vector.extract_strided_slice %0 {offsets = [0, 10], sizes = [8, 1], strides = [1, 1]} : vector<8x16xf32> to vector<8x1xf32>
    %66 = vector.broadcast %65 : vector<8x1xf32> to vector<8x192xf32>
    %67 = vector.broadcast %1 : vector<1x192xf32> to vector<8x192xf32>
    %68 = arith.mulf %66, %67 : vector<8x192xf32>
    %69 = vector.broadcast %3 : vector<1x192xf32> to vector<8x192xf32>
    %70 = arith.addf %68, %69 : vector<8x192xf32>
    %71 = vector.extract_strided_slice %0 {offsets = [0, 11], sizes = [8, 1], strides = [1, 1]} : vector<8x16xf32> to vector<8x1xf32>
    %72 = vector.broadcast %71 : vector<8x1xf32> to vector<8x192xf32>
    %73 = vector.broadcast %1 : vector<1x192xf32> to vector<8x192xf32>
    %74 = arith.mulf %72, %73 : vector<8x192xf32>
    %75 = vector.broadcast %3 : vector<1x192xf32> to vector<8x192xf32>
    %76 = arith.addf %74, %75 : vector<8x192xf32>
    %77 = vector.extract_strided_slice %0 {offsets = [0, 12], sizes = [8, 1], strides = [1, 1]} : vector<8x16xf32> to vector<8x1xf32>
    %78 = vector.broadcast %77 : vector<8x1xf32> to vector<8x192xf32>
    %79 = vector.broadcast %1 : vector<1x192xf32> to vector<8x192xf32>
    %80 = arith.mulf %78, %79 : vector<8x192xf32>
    %81 = vector.broadcast %3 : vector<1x192xf32> to vector<8x192xf32>
    %82 = arith.addf %80, %81 : vector<8x192xf32>
    %83 = vector.extract_strided_slice %0 {offsets = [0, 13], sizes = [8, 1], strides = [1, 1]} : vector<8x16xf32> to vector<8x1xf32>
    %84 = vector.broadcast %83 : vector<8x1xf32> to vector<8x192xf32>
    %85 = vector.broadcast %1 : vector<1x192xf32> to vector<8x192xf32>
    %86 = arith.mulf %84, %85 : vector<8x192xf32>
    %87 = vector.broadcast %3 : vector<1x192xf32> to vector<8x192xf32>
    %88 = arith.addf %86, %87 : vector<8x192xf32>
    %89 = vector.extract_strided_slice %0 {offsets = [0, 14], sizes = [8, 1], strides = [1, 1]} : vector<8x16xf32> to vector<8x1xf32>
    %90 = vector.broadcast %89 : vector<8x1xf32> to vector<8x192xf32>
    %91 = vector.broadcast %1 : vector<1x192xf32> to vector<8x192xf32>
    %92 = arith.mulf %90, %91 : vector<8x192xf32>
    %93 = vector.broadcast %3 : vector<1x192xf32> to vector<8x192xf32>
    %94 = arith.addf %92, %93 : vector<8x192xf32>
    %95 = vector.extract_strided_slice %0 {offsets = [0, 15], sizes = [8, 1], strides = [1, 1]} : vector<8x16xf32> to vector<8x1xf32>
    %96 = vector.broadcast %95 : vector<8x1xf32> to vector<8x192xf32>
    %97 = vector.broadcast %1 : vector<1x192xf32> to vector<8x192xf32>
    %98 = arith.mulf %96, %97 : vector<8x192xf32>
    %99 = vector.broadcast %3 : vector<1x192xf32> to vector<8x192xf32>
    %100 = arith.addf %98, %99 : vector<8x192xf32>
    %cst = arith.constant 0.000000e+00 : f32
    %101 = vector.broadcast %cst : f32 to vector<8x64xf32>
    %cst_9 = arith.constant dense<0.000000e+00> : vector<8x192xf32>
    %102 = tpu.matmul %101, %2, %cst_9 {dimension_numbers = #tpu.dot_dimension_numbers<[1], [0], [0], [1], [0, 0, 1, 1], [], []>} : vector<8x64xf32>, vector<64x192xf32>, vector<8x192xf32> -> vector<8x192xf32>
    %103 = vector.broadcast %4 : vector<1x192xf32> to vector<8x192xf32>
    %104 = arith.addf %102, %103 : vector<8x192xf32>
    %105 = vector.extract_strided_slice %10 {offsets = [0, 0], sizes = [8, 64], strides = [1, 1]} : vector<8x192xf32> to vector<8x64xf32>
    %106 = vector.extract_strided_slice %104 {offsets = [0, 0], sizes = [8, 64], strides = [1, 1]} : vector<8x192xf32> to vector<8x64xf32>
    %107 = arith.addf %105, %106 : vector<8x64xf32>
    %cst_10 = arith.constant 5.000000e-01 : f32
    %108 = vector.broadcast %cst_10 : f32 to vector<8x64xf32>
    %109 = arith.mulf %108, %107 : vector<8x64xf32>
    %110 = math.tanh %109 : vector<8x64xf32>
    %cst_11 = arith.constant 1.000000e+00 : f32
    %111 = vector.broadcast %cst_11 : f32 to vector<8x64xf32>
    %112 = arith.addf %110, %111 : vector<8x64xf32>
    %cst_12 = arith.constant 5.000000e-01 : f32
    %113 = vector.broadcast %cst_12 : f32 to vector<8x64xf32>
    %114 = arith.mulf %113, %112 : vector<8x64xf32>
    %115 = vector.extract_strided_slice %10 {offsets = [0, 64], sizes = [8, 64], strides = [1, 1]} : vector<8x192xf32> to vector<8x64xf32>
    %116 = vector.extract_strided_slice %104 {offsets = [0, 64], sizes = [8, 64], strides = [1, 1]} : vector<8x192xf32> to vector<8x64xf32>
    %117 = arith.addf %115, %116 : vector<8x64xf32>
    %cst_13 = arith.constant 5.000000e-01 : f32
    %118 = vector.broadcast %cst_13 : f32 to vector<8x64xf32>
    %119 = arith.mulf %118, %117 : vector<8x64xf32>
    %120 = math.tanh %119 : vector<8x64xf32>
    %cst_14 = arith.constant 1.000000e+00 : f32
    %121 = vector.broadcast %cst_14 : f32 to vector<8x64xf32>
    %122 = arith.addf %120, %121 : vector<8x64xf32>
    %cst_15 = arith.constant 5.000000e-01 : f32
    %123 = vector.broadcast %cst_15 : f32 to vector<8x64xf32>
    %124 = arith.mulf %123, %122 : vector<8x64xf32>
    %125 = vector.extract_strided_slice %10 {offsets = [0, 128], sizes = [8, 64], strides = [1, 1]} : vector<8x192xf32> to vector<8x64xf32>
    %126 = vector.extract_strided_slice %104 {offsets = [0, 128], sizes = [8, 64], strides = [1, 1]} : vector<8x192xf32> to vector<8x64xf32>
    %127 = arith.mulf %114, %126 : vector<8x64xf32>
    %128 = arith.addf %125, %127 : vector<8x64xf32>
    %129 = math.tanh %128 : vector<8x64xf32>
    %cst_16 = arith.constant 1.000000e+00 : f32
    %130 = vector.broadcast %cst_16 : f32 to vector<8x64xf32>
    %131 = arith.subf %130, %124 : vector<8x64xf32>
    %132 = arith.mulf %131, %129 : vector<8x64xf32>
    %133 = arith.mulf %124, %101 : vector<8x64xf32>
    %134 = arith.addf %132, %133 : vector<8x64xf32>
    %c0_17 = arith.constant 0 : index
    %c0_18 = arith.constant 0 : index
    %135 = vector.load %arg10[%c0_17, %c0_18] : memref<8x1024xf32, #tpu.memory_space<vmem>>, vector<8x64xf32>
    tpu.vector_store %arg10[%c0_17, %c0_18], %134 {strides = array<i32>} : memref<8x1024xf32, #tpu.memory_space<vmem>>, vector<8x64xf32>,
    %cst_19 = arith.constant dense<0.000000e+00> : vector<8x192xf32>
    %136 = tpu.matmul %134, %2, %cst_19 {dimension_numbers = #tpu.dot_dimension_numbers<[1], [0], [0], [1], [0, 0, 1, 1], [], []>} : vector<8x64xf32>, vector<64x192xf32>, vector<8x192xf32> -> vector<8x192xf32>
    %137 = vector.broadcast %4 : vector<1x192xf32> to vector<8x192xf32>
    %138 = arith.addf %136, %137 : vector<8x192xf32>
    %139 = vector.extract_strided_slice %16 {offsets = [0, 0], sizes = [8, 64], strides = [1, 1]} : vector<8x192xf32> to vector<8x64xf32>
    %140 = vector.extract_strided_slice %138 {offsets = [0, 0], sizes = [8, 64], strides = [1, 1]} : vector<8x192xf32> to vector<8x64xf32>
    %141 = arith.addf %139, %140 : vector<8x64xf32>
    %cst_20 = arith.constant 5.000000e-01 : f32
    %142 = vector.broadcast %cst_20 : f32 to vector<8x64xf32>
    %143 = arith.mulf %142, %141 : vector<8x64xf32>
    %144 = math.tanh %143 : vector<8x64xf32>
    %cst_21 = arith.constant 1.000000e+00 : f32
    %145 = vector.broadcast %cst_21 : f32 to vector<8x64xf32>
    %146 = arith.addf %144, %145 : vector<8x64xf32>
    %cst_22 = arith.constant 5.000000e-01 : f32
    %147 = vector.broadcast %cst_22 : f32 to vector<8x64xf32>
    %148 = arith.mulf %147, %146 : vector<8x64xf32>
    %149 = vector.extract_strided_slice %16 {offsets = [0, 64], sizes = [8, 64], strides = [1, 1]} : vector<8x192xf32> to vector<8x64xf32>
    %150 = vector.extract_strided_slice %138 {offsets = [0, 64], sizes = [8, 64], strides = [1, 1]} : vector<8x192xf32> to vector<8x64xf32>
    %151 = arith.addf %149, %150 : vector<8x64xf32>
    %cst_23 = arith.constant 5.000000e-01 : f32
    %152 = vector.broadcast %cst_23 : f32 to vector<8x64xf32>
    %153 = arith.mulf %152, %151 : vector<8x64xf32>
    %154 = math.tanh %153 : vector<8x64xf32>
    %cst_24 = arith.constant 1.000000e+00 : f32
    %155 = vector.broadcast %cst_24 : f32 to vector<8x64xf32>
    %156 = arith.addf %154, %155 : vector<8x64xf32>
    %cst_25 = arith.constant 5.000000e-01 : f32
    %157 = vector.broadcast %cst_25 : f32 to vector<8x64xf32>
    %158 = arith.mulf %157, %156 : vector<8x64xf32>
    %159 = vector.extract_strided_slice %16 {offsets = [0, 128], sizes = [8, 64], strides = [1, 1]} : vector<8x192xf32> to vector<8x64xf32>
    %160 = vector.extract_strided_slice %138 {offsets = [0, 128], sizes = [8, 64], strides = [1, 1]} : vector<8x192xf32> to vector<8x64xf32>
    %161 = arith.mulf %148, %160 : vector<8x64xf32>
    %162 = arith.addf %159, %161 : vector<8x64xf32>
    %163 = math.tanh %162 : vector<8x64xf32>
    %cst_26 = arith.constant 1.000000e+00 : f32
    %164 = vector.broadcast %cst_26 : f32 to vector<8x64xf32>
    %165 = arith.subf %164, %158 : vector<8x64xf32>
    %166 = arith.mulf %165, %163 : vector<8x64xf32>
    %167 = arith.mulf %158, %134 : vector<8x64xf32>
    %168 = arith.addf %166, %167 : vector<8x64xf32>
    %c0_27 = arith.constant 0 : index
    %c64 = arith.constant 64 : index
    %169 = vector.load %arg10[%c0_27, %c64] : memref<8x1024xf32, #tpu.memory_space<vmem>>, vector<8x64xf32>
    tpu.vector_store %arg10[%c0_27, %c64], %168 {strides = array<i32>} : memref<8x1024xf32, #tpu.memory_space<vmem>>, vector<8x64xf32>,
    %cst_28 = arith.constant dense<0.000000e+00> : vector<8x192xf32>
    %170 = tpu.matmul %168, %2, %cst_28 {dimension_numbers = #tpu.dot_dimension_numbers<[1], [0], [0], [1], [0, 0, 1, 1], [], []>} : vector<8x64xf32>, vector<64x192xf32>, vector<8x192xf32> -> vector<8x192xf32>
    %171 = vector.broadcast %4 : vector<1x192xf32> to vector<8x192xf32>
    %172 = arith.addf %170, %171 : vector<8x192xf32>
    %173 = vector.extract_strided_slice %22 {offsets = [0, 0], sizes = [8, 64], strides = [1, 1]} : vector<8x192xf32> to vector<8x64xf32>
    %174 = vector.extract_strided_slice %172 {offsets = [0, 0], sizes = [8, 64], strides = [1, 1]} : vector<8x192xf32> to vector<8x64xf32>
    %175 = arith.addf %173, %174 : vector<8x64xf32>
    %cst_29 = arith.constant 5.000000e-01 : f32
    %176 = vector.broadcast %cst_29 : f32 to vector<8x64xf32>
    %177 = arith.mulf %176, %175 : vector<8x64xf32>
    %178 = math.tanh %177 : vector<8x64xf32>
    %cst_30 = arith.constant 1.000000e+00 : f32
    %179 = vector.broadcast %cst_30 : f32 to vector<8x64xf32>
    %180 = arith.addf %178, %179 : vector<8x64xf32>
    %cst_31 = arith.constant 5.000000e-01 : f32
    %181 = vector.broadcast %cst_31 : f32 to vector<8x64xf32>
    %182 = arith.mulf %181, %180 : vector<8x64xf32>
    %183 = vector.extract_strided_slice %22 {offsets = [0, 64], sizes = [8, 64], strides = [1, 1]} : vector<8x192xf32> to vector<8x64xf32>
    %184 = vector.extract_strided_slice %172 {offsets = [0, 64], sizes = [8, 64], strides = [1, 1]} : vector<8x192xf32> to vector<8x64xf32>
    %185 = arith.addf %183, %184 : vector<8x64xf32>
    %cst_32 = arith.constant 5.000000e-01 : f32
    %186 = vector.broadcast %cst_32 : f32 to vector<8x64xf32>
    %187 = arith.mulf %186, %185 : vector<8x64xf32>
    %188 = math.tanh %187 : vector<8x64xf32>
    %cst_33 = arith.constant 1.000000e+00 : f32
    %189 = vector.broadcast %cst_33 : f32 to vector<8x64xf32>
    %190 = arith.addf %188, %189 : vector<8x64xf32>
    %cst_34 = arith.constant 5.000000e-01 : f32
    %191 = vector.broadcast %cst_34 : f32 to vector<8x64xf32>
    %192 = arith.mulf %191, %190 : vector<8x64xf32>
    %193 = vector.extract_strided_slice %22 {offsets = [0, 128], sizes = [8, 64], strides = [1, 1]} : vector<8x192xf32> to vector<8x64xf32>
    %194 = vector.extract_strided_slice %172 {offsets = [0, 128], sizes = [8, 64], strides = [1, 1]} : vector<8x192xf32> to vector<8x64xf32>
    %195 = arith.mulf %182, %194 : vector<8x64xf32>
    %196 = arith.addf %193, %195 : vector<8x64xf32>
    %197 = math.tanh %196 : vector<8x64xf32>
    %cst_35 = arith.constant 1.000000e+00 : f32
    %198 = vector.broadcast %cst_35 : f32 to vector<8x64xf32>
    %199 = arith.subf %198, %192 : vector<8x64xf32>
    %200 = arith.mulf %199, %197 : vector<8x64xf32>
    %201 = arith.mulf %192, %168 : vector<8x64xf32>
    %202 = arith.addf %200, %201 : vector<8x64xf32>
    %c0_36 = arith.constant 0 : index
    %c128 = arith.constant 128 : index
    %203 = vector.load %arg10[%c0_36, %c128] : memref<8x1024xf32, #tpu.memory_space<vmem>>, vector<8x64xf32>
    tpu.vector_store %arg10[%c0_36, %c128], %202 {strides = array<i32>} : memref<8x1024xf32, #tpu.memory_space<vmem>>, vector<8x64xf32>,
    %cst_37 = arith.constant dense<0.000000e+00> : vector<8x192xf32>
    %204 = tpu.matmul %202, %2, %cst_37 {dimension_numbers = #tpu.dot_dimension_numbers<[1], [0], [0], [1], [0, 0, 1, 1], [], []>} : vector<8x64xf32>, vector<64x192xf32>, vector<8x192xf32> -> vector<8x192xf32>
    %205 = vector.broadcast %4 : vector<1x192xf32> to vector<8x192xf32>
    %206 = arith.addf %204, %205 : vector<8x192xf32>
    %207 = vector.extract_strided_slice %28 {offsets = [0, 0], sizes = [8, 64], strides = [1, 1]} : vector<8x192xf32> to vector<8x64xf32>
    %208 = vector.extract_strided_slice %206 {offsets = [0, 0], sizes = [8, 64], strides = [1, 1]} : vector<8x192xf32> to vector<8x64xf32>
    %209 = arith.addf %207, %208 : vector<8x64xf32>
    %cst_38 = arith.constant 5.000000e-01 : f32
    %210 = vector.broadcast %cst_38 : f32 to vector<8x64xf32>
    %211 = arith.mulf %210, %209 : vector<8x64xf32>
    %212 = math.tanh %211 : vector<8x64xf32>
    %cst_39 = arith.constant 1.000000e+00 : f32
    %213 = vector.broadcast %cst_39 : f32 to vector<8x64xf32>
    %214 = arith.addf %212, %213 : vector<8x64xf32>
    %cst_40 = arith.constant 5.000000e-01 : f32
    %215 = vector.broadcast %cst_40 : f32 to vector<8x64xf32>
    %216 = arith.mulf %215, %214 : vector<8x64xf32>
    %217 = vector.extract_strided_slice %28 {offsets = [0, 64], sizes = [8, 64], strides = [1, 1]} : vector<8x192xf32> to vector<8x64xf32>
    %218 = vector.extract_strided_slice %206 {offsets = [0, 64], sizes = [8, 64], strides = [1, 1]} : vector<8x192xf32> to vector<8x64xf32>
    %219 = arith.addf %217, %218 : vector<8x64xf32>
    %cst_41 = arith.constant 5.000000e-01 : f32
    %220 = vector.broadcast %cst_41 : f32 to vector<8x64xf32>
    %221 = arith.mulf %220, %219 : vector<8x64xf32>
    %222 = math.tanh %221 : vector<8x64xf32>
    %cst_42 = arith.constant 1.000000e+00 : f32
    %223 = vector.broadcast %cst_42 : f32 to vector<8x64xf32>
    %224 = arith.addf %222, %223 : vector<8x64xf32>
    %cst_43 = arith.constant 5.000000e-01 : f32
    %225 = vector.broadcast %cst_43 : f32 to vector<8x64xf32>
    %226 = arith.mulf %225, %224 : vector<8x64xf32>
    %227 = vector.extract_strided_slice %28 {offsets = [0, 128], sizes = [8, 64], strides = [1, 1]} : vector<8x192xf32> to vector<8x64xf32>
    %228 = vector.extract_strided_slice %206 {offsets = [0, 128], sizes = [8, 64], strides = [1, 1]} : vector<8x192xf32> to vector<8x64xf32>
    %229 = arith.mulf %216, %228 : vector<8x64xf32>
    %230 = arith.addf %227, %229 : vector<8x64xf32>
    %231 = math.tanh %230 : vector<8x64xf32>
    %cst_44 = arith.constant 1.000000e+00 : f32
    %232 = vector.broadcast %cst_44 : f32 to vector<8x64xf32>
    %233 = arith.subf %232, %226 : vector<8x64xf32>
    %234 = arith.mulf %233, %231 : vector<8x64xf32>
    %235 = arith.mulf %226, %202 : vector<8x64xf32>
    %236 = arith.addf %234, %235 : vector<8x64xf32>
    %c0_45 = arith.constant 0 : index
    %c192 = arith.constant 192 : index
    %237 = vector.load %arg10[%c0_45, %c192] : memref<8x1024xf32, #tpu.memory_space<vmem>>, vector<8x64xf32>
    tpu.vector_store %arg10[%c0_45, %c192], %236 {strides = array<i32>} : memref<8x1024xf32, #tpu.memory_space<vmem>>, vector<8x64xf32>,
    %cst_46 = arith.constant dense<0.000000e+00> : vector<8x192xf32>
    %238 = tpu.matmul %236, %2, %cst_46 {dimension_numbers = #tpu.dot_dimension_numbers<[1], [0], [0], [1], [0, 0, 1, 1], [], []>} : vector<8x64xf32>, vector<64x192xf32>, vector<8x192xf32> -> vector<8x192xf32>
    %239 = vector.broadcast %4 : vector<1x192xf32> to vector<8x192xf32>
    %240 = arith.addf %238, %239 : vector<8x192xf32>
    %241 = vector.extract_strided_slice %34 {offsets = [0, 0], sizes = [8, 64], strides = [1, 1]} : vector<8x192xf32> to vector<8x64xf32>
    %242 = vector.extract_strided_slice %240 {offsets = [0, 0], sizes = [8, 64], strides = [1, 1]} : vector<8x192xf32> to vector<8x64xf32>
    %243 = arith.addf %241, %242 : vector<8x64xf32>
    %cst_47 = arith.constant 5.000000e-01 : f32
    %244 = vector.broadcast %cst_47 : f32 to vector<8x64xf32>
    %245 = arith.mulf %244, %243 : vector<8x64xf32>
    %246 = math.tanh %245 : vector<8x64xf32>
    %cst_48 = arith.constant 1.000000e+00 : f32
    %247 = vector.broadcast %cst_48 : f32 to vector<8x64xf32>
    %248 = arith.addf %246, %247 : vector<8x64xf32>
    %cst_49 = arith.constant 5.000000e-01 : f32
    %249 = vector.broadcast %cst_49 : f32 to vector<8x64xf32>
    %250 = arith.mulf %249, %248 : vector<8x64xf32>
    %251 = vector.extract_strided_slice %34 {offsets = [0, 64], sizes = [8, 64], strides = [1, 1]} : vector<8x192xf32> to vector<8x64xf32>
    %252 = vector.extract_strided_slice %240 {offsets = [0, 64], sizes = [8, 64], strides = [1, 1]} : vector<8x192xf32> to vector<8x64xf32>
    %253 = arith.addf %251, %252 : vector<8x64xf32>
    %cst_50 = arith.constant 5.000000e-01 : f32
    %254 = vector.broadcast %cst_50 : f32 to vector<8x64xf32>
    %255 = arith.mulf %254, %253 : vector<8x64xf32>
    %256 = math.tanh %255 : vector<8x64xf32>
    %cst_51 = arith.constant 1.000000e+00 : f32
    %257 = vector.broadcast %cst_51 : f32 to vector<8x64xf32>
    %258 = arith.addf %256, %257 : vector<8x64xf32>
    %cst_52 = arith.constant 5.000000e-01 : f32
    %259 = vector.broadcast %cst_52 : f32 to vector<8x64xf32>
    %260 = arith.mulf %259, %258 : vector<8x64xf32>
    %261 = vector.extract_strided_slice %34 {offsets = [0, 128], sizes = [8, 64], strides = [1, 1]} : vector<8x192xf32> to vector<8x64xf32>
    %262 = vector.extract_strided_slice %240 {offsets = [0, 128], sizes = [8, 64], strides = [1, 1]} : vector<8x192xf32> to vector<8x64xf32>
    %263 = arith.mulf %250, %262 : vector<8x64xf32>
    %264 = arith.addf %261, %263 : vector<8x64xf32>
    %265 = math.tanh %264 : vector<8x64xf32>
    %cst_53 = arith.constant 1.000000e+00 : f32
    %266 = vector.broadcast %cst_53 : f32 to vector<8x64xf32>
    %267 = arith.subf %266, %260 : vector<8x64xf32>
    %268 = arith.mulf %267, %265 : vector<8x64xf32>
    %269 = arith.mulf %260, %236 : vector<8x64xf32>
    %270 = arith.addf %268, %269 : vector<8x64xf32>
    %c0_54 = arith.constant 0 : index
    %c256 = arith.constant 256 : index
    %271 = vector.load %arg10[%c0_54, %c256] : memref<8x1024xf32, #tpu.memory_space<vmem>>, vector<8x64xf32>
    tpu.vector_store %arg10[%c0_54, %c256], %270 {strides = array<i32>} : memref<8x1024xf32, #tpu.memory_space<vmem>>, vector<8x64xf32>,
    %cst_55 = arith.constant dense<0.000000e+00> : vector<8x192xf32>
    %272 = tpu.matmul %270, %2, %cst_55 {dimension_numbers = #tpu.dot_dimension_numbers<[1], [0], [0], [1], [0, 0, 1, 1], [], []>} : vector<8x64xf32>, vector<64x192xf32>, vector<8x192xf32> -> vector<8x192xf32>
    %273 = vector.broadcast %4 : vector<1x192xf32> to vector<8x192xf32>
    %274 = arith.addf %272, %273 : vector<8x192xf32>
    %275 = vector.extract_strided_slice %40 {offsets = [0, 0], sizes = [8, 64], strides = [1, 1]} : vector<8x192xf32> to vector<8x64xf32>
    %276 = vector.extract_strided_slice %274 {offsets = [0, 0], sizes = [8, 64], strides = [1, 1]} : vector<8x192xf32> to vector<8x64xf32>
    %277 = arith.addf %275, %276 : vector<8x64xf32>
    %cst_56 = arith.constant 5.000000e-01 : f32
    %278 = vector.broadcast %cst_56 : f32 to vector<8x64xf32>
    %279 = arith.mulf %278, %277 : vector<8x64xf32>
    %280 = math.tanh %279 : vector<8x64xf32>
    %cst_57 = arith.constant 1.000000e+00 : f32
    %281 = vector.broadcast %cst_57 : f32 to vector<8x64xf32>
    %282 = arith.addf %280, %281 : vector<8x64xf32>
    %cst_58 = arith.constant 5.000000e-01 : f32
    %283 = vector.broadcast %cst_58 : f32 to vector<8x64xf32>
    %284 = arith.mulf %283, %282 : vector<8x64xf32>
    %285 = vector.extract_strided_slice %40 {offsets = [0, 64], sizes = [8, 64], strides = [1, 1]} : vector<8x192xf32> to vector<8x64xf32>
    %286 = vector.extract_strided_slice %274 {offsets = [0, 64], sizes = [8, 64], strides = [1, 1]} : vector<8x192xf32> to vector<8x64xf32>
    %287 = arith.addf %285, %286 : vector<8x64xf32>
    %cst_59 = arith.constant 5.000000e-01 : f32
    %288 = vector.broadcast %cst_59 : f32 to vector<8x64xf32>
    %289 = arith.mulf %288, %287 : vector<8x64xf32>
    %290 = math.tanh %289 : vector<8x64xf32>
    %cst_60 = arith.constant 1.000000e+00 : f32
    %291 = vector.broadcast %cst_60 : f32 to vector<8x64xf32>
    %292 = arith.addf %290, %291 : vector<8x64xf32>
    %cst_61 = arith.constant 5.000000e-01 : f32
    %293 = vector.broadcast %cst_61 : f32 to vector<8x64xf32>
    %294 = arith.mulf %293, %292 : vector<8x64xf32>
    %295 = vector.extract_strided_slice %40 {offsets = [0, 128], sizes = [8, 64], strides = [1, 1]} : vector<8x192xf32> to vector<8x64xf32>
    %296 = vector.extract_strided_slice %274 {offsets = [0, 128], sizes = [8, 64], strides = [1, 1]} : vector<8x192xf32> to vector<8x64xf32>
    %297 = arith.mulf %284, %296 : vector<8x64xf32>
    %298 = arith.addf %295, %297 : vector<8x64xf32>
    %299 = math.tanh %298 : vector<8x64xf32>
    %cst_62 = arith.constant 1.000000e+00 : f32
    %300 = vector.broadcast %cst_62 : f32 to vector<8x64xf32>
    %301 = arith.subf %300, %294 : vector<8x64xf32>
    %302 = arith.mulf %301, %299 : vector<8x64xf32>
    %303 = arith.mulf %294, %270 : vector<8x64xf32>
    %304 = arith.addf %302, %303 : vector<8x64xf32>
    %c0_63 = arith.constant 0 : index
    %c320 = arith.constant 320 : index
    %305 = vector.load %arg10[%c0_63, %c320] : memref<8x1024xf32, #tpu.memory_space<vmem>>, vector<8x64xf32>
    tpu.vector_store %arg10[%c0_63, %c320], %304 {strides = array<i32>} : memref<8x1024xf32, #tpu.memory_space<vmem>>, vector<8x64xf32>,
    %cst_64 = arith.constant dense<0.000000e+00> : vector<8x192xf32>
    %306 = tpu.matmul %304, %2, %cst_64 {dimension_numbers = #tpu.dot_dimension_numbers<[1], [0], [0], [1], [0, 0, 1, 1], [], []>} : vector<8x64xf32>, vector<64x192xf32>, vector<8x192xf32> -> vector<8x192xf32>
    %307 = vector.broadcast %4 : vector<1x192xf32> to vector<8x192xf32>
    %308 = arith.addf %306, %307 : vector<8x192xf32>
    %309 = vector.extract_strided_slice %46 {offsets = [0, 0], sizes = [8, 64], strides = [1, 1]} : vector<8x192xf32> to vector<8x64xf32>
    %310 = vector.extract_strided_slice %308 {offsets = [0, 0], sizes = [8, 64], strides = [1, 1]} : vector<8x192xf32> to vector<8x64xf32>
    %311 = arith.addf %309, %310 : vector<8x64xf32>
    %cst_65 = arith.constant 5.000000e-01 : f32
    %312 = vector.broadcast %cst_65 : f32 to vector<8x64xf32>
    %313 = arith.mulf %312, %311 : vector<8x64xf32>
    %314 = math.tanh %313 : vector<8x64xf32>
    %cst_66 = arith.constant 1.000000e+00 : f32
    %315 = vector.broadcast %cst_66 : f32 to vector<8x64xf32>
    %316 = arith.addf %314, %315 : vector<8x64xf32>
    %cst_67 = arith.constant 5.000000e-01 : f32
    %317 = vector.broadcast %cst_67 : f32 to vector<8x64xf32>
    %318 = arith.mulf %317, %316 : vector<8x64xf32>
    %319 = vector.extract_strided_slice %46 {offsets = [0, 64], sizes = [8, 64], strides = [1, 1]} : vector<8x192xf32> to vector<8x64xf32>
    %320 = vector.extract_strided_slice %308 {offsets = [0, 64], sizes = [8, 64], strides = [1, 1]} : vector<8x192xf32> to vector<8x64xf32>
    %321 = arith.addf %319, %320 : vector<8x64xf32>
    %cst_68 = arith.constant 5.000000e-01 : f32
    %322 = vector.broadcast %cst_68 : f32 to vector<8x64xf32>
    %323 = arith.mulf %322, %321 : vector<8x64xf32>
    %324 = math.tanh %323 : vector<8x64xf32>
    %cst_69 = arith.constant 1.000000e+00 : f32
    %325 = vector.broadcast %cst_69 : f32 to vector<8x64xf32>
    %326 = arith.addf %324, %325 : vector<8x64xf32>
    %cst_70 = arith.constant 5.000000e-01 : f32
    %327 = vector.broadcast %cst_70 : f32 to vector<8x64xf32>
    %328 = arith.mulf %327, %326 : vector<8x64xf32>
    %329 = vector.extract_strided_slice %46 {offsets = [0, 128], sizes = [8, 64], strides = [1, 1]} : vector<8x192xf32> to vector<8x64xf32>
    %330 = vector.extract_strided_slice %308 {offsets = [0, 128], sizes = [8, 64], strides = [1, 1]} : vector<8x192xf32> to vector<8x64xf32>
    %331 = arith.mulf %318, %330 : vector<8x64xf32>
    %332 = arith.addf %329, %331 : vector<8x64xf32>
    %333 = math.tanh %332 : vector<8x64xf32>
    %cst_71 = arith.constant 1.000000e+00 : f32
    %334 = vector.broadcast %cst_71 : f32 to vector<8x64xf32>
    %335 = arith.subf %334, %328 : vector<8x64xf32>
    %336 = arith.mulf %335, %333 : vector<8x64xf32>
    %337 = arith.mulf %328, %304 : vector<8x64xf32>
    %338 = arith.addf %336, %337 : vector<8x64xf32>
    %c0_72 = arith.constant 0 : index
    %c384 = arith.constant 384 : index
    %339 = vector.load %arg10[%c0_72, %c384] : memref<8x1024xf32, #tpu.memory_space<vmem>>, vector<8x64xf32>
    tpu.vector_store %arg10[%c0_72, %c384], %338 {strides = array<i32>} : memref<8x1024xf32, #tpu.memory_space<vmem>>, vector<8x64xf32>,
    %cst_73 = arith.constant dense<0.000000e+00> : vector<8x192xf32>
    %340 = tpu.matmul %338, %2, %cst_73 {dimension_numbers = #tpu.dot_dimension_numbers<[1], [0], [0], [1], [0, 0, 1, 1], [], []>} : vector<8x64xf32>, vector<64x192xf32>, vector<8x192xf32> -> vector<8x192xf32>
    %341 = vector.broadcast %4 : vector<1x192xf32> to vector<8x192xf32>
    %342 = arith.addf %340, %341 : vector<8x192xf32>
    %343 = vector.extract_strided_slice %52 {offsets = [0, 0], sizes = [8, 64], strides = [1, 1]} : vector<8x192xf32> to vector<8x64xf32>
    %344 = vector.extract_strided_slice %342 {offsets = [0, 0], sizes = [8, 64], strides = [1, 1]} : vector<8x192xf32> to vector<8x64xf32>
    %345 = arith.addf %343, %344 : vector<8x64xf32>
    %cst_74 = arith.constant 5.000000e-01 : f32
    %346 = vector.broadcast %cst_74 : f32 to vector<8x64xf32>
    %347 = arith.mulf %346, %345 : vector<8x64xf32>
    %348 = math.tanh %347 : vector<8x64xf32>
    %cst_75 = arith.constant 1.000000e+00 : f32
    %349 = vector.broadcast %cst_75 : f32 to vector<8x64xf32>
    %350 = arith.addf %348, %349 : vector<8x64xf32>
    %cst_76 = arith.constant 5.000000e-01 : f32
    %351 = vector.broadcast %cst_76 : f32 to vector<8x64xf32>
    %352 = arith.mulf %351, %350 : vector<8x64xf32>
    %353 = vector.extract_strided_slice %52 {offsets = [0, 64], sizes = [8, 64], strides = [1, 1]} : vector<8x192xf32> to vector<8x64xf32>
    %354 = vector.extract_strided_slice %342 {offsets = [0, 64], sizes = [8, 64], strides = [1, 1]} : vector<8x192xf32> to vector<8x64xf32>
    %355 = arith.addf %353, %354 : vector<8x64xf32>
    %cst_77 = arith.constant 5.000000e-01 : f32
    %356 = vector.broadcast %cst_77 : f32 to vector<8x64xf32>
    %357 = arith.mulf %356, %355 : vector<8x64xf32>
    %358 = math.tanh %357 : vector<8x64xf32>
    %cst_78 = arith.constant 1.000000e+00 : f32
    %359 = vector.broadcast %cst_78 : f32 to vector<8x64xf32>
    %360 = arith.addf %358, %359 : vector<8x64xf32>
    %cst_79 = arith.constant 5.000000e-01 : f32
    %361 = vector.broadcast %cst_79 : f32 to vector<8x64xf32>
    %362 = arith.mulf %361, %360 : vector<8x64xf32>
    %363 = vector.extract_strided_slice %52 {offsets = [0, 128], sizes = [8, 64], strides = [1, 1]} : vector<8x192xf32> to vector<8x64xf32>
    %364 = vector.extract_strided_slice %342 {offsets = [0, 128], sizes = [8, 64], strides = [1, 1]} : vector<8x192xf32> to vector<8x64xf32>
    %365 = arith.mulf %352, %364 : vector<8x64xf32>
    %366 = arith.addf %363, %365 : vector<8x64xf32>
    %367 = math.tanh %366 : vector<8x64xf32>
    %cst_80 = arith.constant 1.000000e+00 : f32
    %368 = vector.broadcast %cst_80 : f32 to vector<8x64xf32>
    %369 = arith.subf %368, %362 : vector<8x64xf32>
    %370 = arith.mulf %369, %367 : vector<8x64xf32>
    %371 = arith.mulf %362, %338 : vector<8x64xf32>
    %372 = arith.addf %370, %371 : vector<8x64xf32>
    %c0_81 = arith.constant 0 : index
    %c448 = arith.constant 448 : index
    %373 = vector.load %arg10[%c0_81, %c448] : memref<8x1024xf32, #tpu.memory_space<vmem>>, vector<8x64xf32>
    tpu.vector_store %arg10[%c0_81, %c448], %372 {strides = array<i32>} : memref<8x1024xf32, #tpu.memory_space<vmem>>, vector<8x64xf32>,
    %cst_82 = arith.constant dense<0.000000e+00> : vector<8x192xf32>
    %374 = tpu.matmul %372, %2, %cst_82 {dimension_numbers = #tpu.dot_dimension_numbers<[1], [0], [0], [1], [0, 0, 1, 1], [], []>} : vector<8x64xf32>, vector<64x192xf32>, vector<8x192xf32> -> vector<8x192xf32>
    %375 = vector.broadcast %4 : vector<1x192xf32> to vector<8x192xf32>
    %376 = arith.addf %374, %375 : vector<8x192xf32>
    %377 = vector.extract_strided_slice %58 {offsets = [0, 0], sizes = [8, 64], strides = [1, 1]} : vector<8x192xf32> to vector<8x64xf32>
    %378 = vector.extract_strided_slice %376 {offsets = [0, 0], sizes = [8, 64], strides = [1, 1]} : vector<8x192xf32> to vector<8x64xf32>
    %379 = arith.addf %377, %378 : vector<8x64xf32>
    %cst_83 = arith.constant 5.000000e-01 : f32
    %380 = vector.broadcast %cst_83 : f32 to vector<8x64xf32>
    %381 = arith.mulf %380, %379 : vector<8x64xf32>
    %382 = math.tanh %381 : vector<8x64xf32>
    %cst_84 = arith.constant 1.000000e+00 : f32
    %383 = vector.broadcast %cst_84 : f32 to vector<8x64xf32>
    %384 = arith.addf %382, %383 : vector<8x64xf32>
    %cst_85 = arith.constant 5.000000e-01 : f32
    %385 = vector.broadcast %cst_85 : f32 to vector<8x64xf32>
    %386 = arith.mulf %385, %384 : vector<8x64xf32>
    %387 = vector.extract_strided_slice %58 {offsets = [0, 64], sizes = [8, 64], strides = [1, 1]} : vector<8x192xf32> to vector<8x64xf32>
    %388 = vector.extract_strided_slice %376 {offsets = [0, 64], sizes = [8, 64], strides = [1, 1]} : vector<8x192xf32> to vector<8x64xf32>
    %389 = arith.addf %387, %388 : vector<8x64xf32>
    %cst_86 = arith.constant 5.000000e-01 : f32
    %390 = vector.broadcast %cst_86 : f32 to vector<8x64xf32>
    %391 = arith.mulf %390, %389 : vector<8x64xf32>
    %392 = math.tanh %391 : vector<8x64xf32>
    %cst_87 = arith.constant 1.000000e+00 : f32
    %393 = vector.broadcast %cst_87 : f32 to vector<8x64xf32>
    %394 = arith.addf %392, %393 : vector<8x64xf32>
    %cst_88 = arith.constant 5.000000e-01 : f32
    %395 = vector.broadcast %cst_88 : f32 to vector<8x64xf32>
    %396 = arith.mulf %395, %394 : vector<8x64xf32>
    %397 = vector.extract_strided_slice %58 {offsets = [0, 128], sizes = [8, 64], strides = [1, 1]} : vector<8x192xf32> to vector<8x64xf32>
    %398 = vector.extract_strided_slice %376 {offsets = [0, 128], sizes = [8, 64], strides = [1, 1]} : vector<8x192xf32> to vector<8x64xf32>
    %399 = arith.mulf %386, %398 : vector<8x64xf32>
    %400 = arith.addf %397, %399 : vector<8x64xf32>
    %401 = math.tanh %400 : vector<8x64xf32>
    %cst_89 = arith.constant 1.000000e+00 : f32
    %402 = vector.broadcast %cst_89 : f32 to vector<8x64xf32>
    %403 = arith.subf %402, %396 : vector<8x64xf32>
    %404 = arith.mulf %403, %401 : vector<8x64xf32>
    %405 = arith.mulf %396, %372 : vector<8x64xf32>
    %406 = arith.addf %404, %405 : vector<8x64xf32>
    %c0_90 = arith.constant 0 : index
    %c512 = arith.constant 512 : index
    %407 = vector.load %arg10[%c0_90, %c512] : memref<8x1024xf32, #tpu.memory_space<vmem>>, vector<8x64xf32>
    tpu.vector_store %arg10[%c0_90, %c512], %406 {strides = array<i32>} : memref<8x1024xf32, #tpu.memory_space<vmem>>, vector<8x64xf32>,
    %cst_91 = arith.constant dense<0.000000e+00> : vector<8x192xf32>
    %408 = tpu.matmul %406, %2, %cst_91 {dimension_numbers = #tpu.dot_dimension_numbers<[1], [0], [0], [1], [0, 0, 1, 1], [], []>} : vector<8x64xf32>, vector<64x192xf32>, vector<8x192xf32> -> vector<8x192xf32>
    %409 = vector.broadcast %4 : vector<1x192xf32> to vector<8x192xf32>
    %410 = arith.addf %408, %409 : vector<8x192xf32>
    %411 = vector.extract_strided_slice %64 {offsets = [0, 0], sizes = [8, 64], strides = [1, 1]} : vector<8x192xf32> to vector<8x64xf32>
    %412 = vector.extract_strided_slice %410 {offsets = [0, 0], sizes = [8, 64], strides = [1, 1]} : vector<8x192xf32> to vector<8x64xf32>
    %413 = arith.addf %411, %412 : vector<8x64xf32>
    %cst_92 = arith.constant 5.000000e-01 : f32
    %414 = vector.broadcast %cst_92 : f32 to vector<8x64xf32>
    %415 = arith.mulf %414, %413 : vector<8x64xf32>
    %416 = math.tanh %415 : vector<8x64xf32>
    %cst_93 = arith.constant 1.000000e+00 : f32
    %417 = vector.broadcast %cst_93 : f32 to vector<8x64xf32>
    %418 = arith.addf %416, %417 : vector<8x64xf32>
    %cst_94 = arith.constant 5.000000e-01 : f32
    %419 = vector.broadcast %cst_94 : f32 to vector<8x64xf32>
    %420 = arith.mulf %419, %418 : vector<8x64xf32>
    %421 = vector.extract_strided_slice %64 {offsets = [0, 64], sizes = [8, 64], strides = [1, 1]} : vector<8x192xf32> to vector<8x64xf32>
    %422 = vector.extract_strided_slice %410 {offsets = [0, 64], sizes = [8, 64], strides = [1, 1]} : vector<8x192xf32> to vector<8x64xf32>
    %423 = arith.addf %421, %422 : vector<8x64xf32>
    %cst_95 = arith.constant 5.000000e-01 : f32
    %424 = vector.broadcast %cst_95 : f32 to vector<8x64xf32>
    %425 = arith.mulf %424, %423 : vector<8x64xf32>
    %426 = math.tanh %425 : vector<8x64xf32>
    %cst_96 = arith.constant 1.000000e+00 : f32
    %427 = vector.broadcast %cst_96 : f32 to vector<8x64xf32>
    %428 = arith.addf %426, %427 : vector<8x64xf32>
    %cst_97 = arith.constant 5.000000e-01 : f32
    %429 = vector.broadcast %cst_97 : f32 to vector<8x64xf32>
    %430 = arith.mulf %429, %428 : vector<8x64xf32>
    %431 = vector.extract_strided_slice %64 {offsets = [0, 128], sizes = [8, 64], strides = [1, 1]} : vector<8x192xf32> to vector<8x64xf32>
    %432 = vector.extract_strided_slice %410 {offsets = [0, 128], sizes = [8, 64], strides = [1, 1]} : vector<8x192xf32> to vector<8x64xf32>
    %433 = arith.mulf %420, %432 : vector<8x64xf32>
    %434 = arith.addf %431, %433 : vector<8x64xf32>
    %435 = math.tanh %434 : vector<8x64xf32>
    %cst_98 = arith.constant 1.000000e+00 : f32
    %436 = vector.broadcast %cst_98 : f32 to vector<8x64xf32>
    %437 = arith.subf %436, %430 : vector<8x64xf32>
    %438 = arith.mulf %437, %435 : vector<8x64xf32>
    %439 = arith.mulf %430, %406 : vector<8x64xf32>
    %440 = arith.addf %438, %439 : vector<8x64xf32>
    %c0_99 = arith.constant 0 : index
    %c576 = arith.constant 576 : index
    %441 = vector.load %arg10[%c0_99, %c576] : memref<8x1024xf32, #tpu.memory_space<vmem>>, vector<8x64xf32>
    tpu.vector_store %arg10[%c0_99, %c576], %440 {strides = array<i32>} : memref<8x1024xf32, #tpu.memory_space<vmem>>, vector<8x64xf32>,
    %cst_100 = arith.constant dense<0.000000e+00> : vector<8x192xf32>
    %442 = tpu.matmul %440, %2, %cst_100 {dimension_numbers = #tpu.dot_dimension_numbers<[1], [0], [0], [1], [0, 0, 1, 1], [], []>} : vector<8x64xf32>, vector<64x192xf32>, vector<8x192xf32> -> vector<8x192xf32>
    %443 = vector.broadcast %4 : vector<1x192xf32> to vector<8x192xf32>
    %444 = arith.addf %442, %443 : vector<8x192xf32>
    %445 = vector.extract_strided_slice %70 {offsets = [0, 0], sizes = [8, 64], strides = [1, 1]} : vector<8x192xf32> to vector<8x64xf32>
    %446 = vector.extract_strided_slice %444 {offsets = [0, 0], sizes = [8, 64], strides = [1, 1]} : vector<8x192xf32> to vector<8x64xf32>
    %447 = arith.addf %445, %446 : vector<8x64xf32>
    %cst_101 = arith.constant 5.000000e-01 : f32
    %448 = vector.broadcast %cst_101 : f32 to vector<8x64xf32>
    %449 = arith.mulf %448, %447 : vector<8x64xf32>
    %450 = math.tanh %449 : vector<8x64xf32>
    %cst_102 = arith.constant 1.000000e+00 : f32
    %451 = vector.broadcast %cst_102 : f32 to vector<8x64xf32>
    %452 = arith.addf %450, %451 : vector<8x64xf32>
    %cst_103 = arith.constant 5.000000e-01 : f32
    %453 = vector.broadcast %cst_103 : f32 to vector<8x64xf32>
    %454 = arith.mulf %453, %452 : vector<8x64xf32>
    %455 = vector.extract_strided_slice %70 {offsets = [0, 64], sizes = [8, 64], strides = [1, 1]} : vector<8x192xf32> to vector<8x64xf32>
    %456 = vector.extract_strided_slice %444 {offsets = [0, 64], sizes = [8, 64], strides = [1, 1]} : vector<8x192xf32> to vector<8x64xf32>
    %457 = arith.addf %455, %456 : vector<8x64xf32>
    %cst_104 = arith.constant 5.000000e-01 : f32
    %458 = vector.broadcast %cst_104 : f32 to vector<8x64xf32>
    %459 = arith.mulf %458, %457 : vector<8x64xf32>
    %460 = math.tanh %459 : vector<8x64xf32>
    %cst_105 = arith.constant 1.000000e+00 : f32
    %461 = vector.broadcast %cst_105 : f32 to vector<8x64xf32>
    %462 = arith.addf %460, %461 : vector<8x64xf32>
    %cst_106 = arith.constant 5.000000e-01 : f32
    %463 = vector.broadcast %cst_106 : f32 to vector<8x64xf32>
    %464 = arith.mulf %463, %462 : vector<8x64xf32>
    %465 = vector.extract_strided_slice %70 {offsets = [0, 128], sizes = [8, 64], strides = [1, 1]} : vector<8x192xf32> to vector<8x64xf32>
    %466 = vector.extract_strided_slice %444 {offsets = [0, 128], sizes = [8, 64], strides = [1, 1]} : vector<8x192xf32> to vector<8x64xf32>
    %467 = arith.mulf %454, %466 : vector<8x64xf32>
    %468 = arith.addf %465, %467 : vector<8x64xf32>
    %469 = math.tanh %468 : vector<8x64xf32>
    %cst_107 = arith.constant 1.000000e+00 : f32
    %470 = vector.broadcast %cst_107 : f32 to vector<8x64xf32>
    %471 = arith.subf %470, %464 : vector<8x64xf32>
    %472 = arith.mulf %471, %469 : vector<8x64xf32>
    %473 = arith.mulf %464, %440 : vector<8x64xf32>
    %474 = arith.addf %472, %473 : vector<8x64xf32>
    %c0_108 = arith.constant 0 : index
    %c640 = arith.constant 640 : index
    %475 = vector.load %arg10[%c0_108, %c640] : memref<8x1024xf32, #tpu.memory_space<vmem>>, vector<8x64xf32>
    tpu.vector_store %arg10[%c0_108, %c640], %474 {strides = array<i32>} : memref<8x1024xf32, #tpu.memory_space<vmem>>, vector<8x64xf32>,
    %cst_109 = arith.constant dense<0.000000e+00> : vector<8x192xf32>
    %476 = tpu.matmul %474, %2, %cst_109 {dimension_numbers = #tpu.dot_dimension_numbers<[1], [0], [0], [1], [0, 0, 1, 1], [], []>} : vector<8x64xf32>, vector<64x192xf32>, vector<8x192xf32> -> vector<8x192xf32>
    %477 = vector.broadcast %4 : vector<1x192xf32> to vector<8x192xf32>
    %478 = arith.addf %476, %477 : vector<8x192xf32>
    %479 = vector.extract_strided_slice %76 {offsets = [0, 0], sizes = [8, 64], strides = [1, 1]} : vector<8x192xf32> to vector<8x64xf32>
    %480 = vector.extract_strided_slice %478 {offsets = [0, 0], sizes = [8, 64], strides = [1, 1]} : vector<8x192xf32> to vector<8x64xf32>
    %481 = arith.addf %479, %480 : vector<8x64xf32>
    %cst_110 = arith.constant 5.000000e-01 : f32
    %482 = vector.broadcast %cst_110 : f32 to vector<8x64xf32>
    %483 = arith.mulf %482, %481 : vector<8x64xf32>
    %484 = math.tanh %483 : vector<8x64xf32>
    %cst_111 = arith.constant 1.000000e+00 : f32
    %485 = vector.broadcast %cst_111 : f32 to vector<8x64xf32>
    %486 = arith.addf %484, %485 : vector<8x64xf32>
    %cst_112 = arith.constant 5.000000e-01 : f32
    %487 = vector.broadcast %cst_112 : f32 to vector<8x64xf32>
    %488 = arith.mulf %487, %486 : vector<8x64xf32>
    %489 = vector.extract_strided_slice %76 {offsets = [0, 64], sizes = [8, 64], strides = [1, 1]} : vector<8x192xf32> to vector<8x64xf32>
    %490 = vector.extract_strided_slice %478 {offsets = [0, 64], sizes = [8, 64], strides = [1, 1]} : vector<8x192xf32> to vector<8x64xf32>
    %491 = arith.addf %489, %490 : vector<8x64xf32>
    %cst_113 = arith.constant 5.000000e-01 : f32
    %492 = vector.broadcast %cst_113 : f32 to vector<8x64xf32>
    %493 = arith.mulf %492, %491 : vector<8x64xf32>
    %494 = math.tanh %493 : vector<8x64xf32>
    %cst_114 = arith.constant 1.000000e+00 : f32
    %495 = vector.broadcast %cst_114 : f32 to vector<8x64xf32>
    %496 = arith.addf %494, %495 : vector<8x64xf32>
    %cst_115 = arith.constant 5.000000e-01 : f32
    %497 = vector.broadcast %cst_115 : f32 to vector<8x64xf32>
    %498 = arith.mulf %497, %496 : vector<8x64xf32>
    %499 = vector.extract_strided_slice %76 {offsets = [0, 128], sizes = [8, 64], strides = [1, 1]} : vector<8x192xf32> to vector<8x64xf32>
    %500 = vector.extract_strided_slice %478 {offsets = [0, 128], sizes = [8, 64], strides = [1, 1]} : vector<8x192xf32> to vector<8x64xf32>
    %501 = arith.mulf %488, %500 : vector<8x64xf32>
    %502 = arith.addf %499, %501 : vector<8x64xf32>
    %503 = math.tanh %502 : vector<8x64xf32>
    %cst_116 = arith.constant 1.000000e+00 : f32
    %504 = vector.broadcast %cst_116 : f32 to vector<8x64xf32>
    %505 = arith.subf %504, %498 : vector<8x64xf32>
    %506 = arith.mulf %505, %503 : vector<8x64xf32>
    %507 = arith.mulf %498, %474 : vector<8x64xf32>
    %508 = arith.addf %506, %507 : vector<8x64xf32>
    %c0_117 = arith.constant 0 : index
    %c704 = arith.constant 704 : index
    %509 = vector.load %arg10[%c0_117, %c704] : memref<8x1024xf32, #tpu.memory_space<vmem>>, vector<8x64xf32>
    tpu.vector_store %arg10[%c0_117, %c704], %508 {strides = array<i32>} : memref<8x1024xf32, #tpu.memory_space<vmem>>, vector<8x64xf32>,
    %cst_118 = arith.constant dense<0.000000e+00> : vector<8x192xf32>
    %510 = tpu.matmul %508, %2, %cst_118 {dimension_numbers = #tpu.dot_dimension_numbers<[1], [0], [0], [1], [0, 0, 1, 1], [], []>} : vector<8x64xf32>, vector<64x192xf32>, vector<8x192xf32> -> vector<8x192xf32>
    %511 = vector.broadcast %4 : vector<1x192xf32> to vector<8x192xf32>
    %512 = arith.addf %510, %511 : vector<8x192xf32>
    %513 = vector.extract_strided_slice %82 {offsets = [0, 0], sizes = [8, 64], strides = [1, 1]} : vector<8x192xf32> to vector<8x64xf32>
    %514 = vector.extract_strided_slice %512 {offsets = [0, 0], sizes = [8, 64], strides = [1, 1]} : vector<8x192xf32> to vector<8x64xf32>
    %515 = arith.addf %513, %514 : vector<8x64xf32>
    %cst_119 = arith.constant 5.000000e-01 : f32
    %516 = vector.broadcast %cst_119 : f32 to vector<8x64xf32>
    %517 = arith.mulf %516, %515 : vector<8x64xf32>
    %518 = math.tanh %517 : vector<8x64xf32>
    %cst_120 = arith.constant 1.000000e+00 : f32
    %519 = vector.broadcast %cst_120 : f32 to vector<8x64xf32>
    %520 = arith.addf %518, %519 : vector<8x64xf32>
    %cst_121 = arith.constant 5.000000e-01 : f32
    %521 = vector.broadcast %cst_121 : f32 to vector<8x64xf32>
    %522 = arith.mulf %521, %520 : vector<8x64xf32>
    %523 = vector.extract_strided_slice %82 {offsets = [0, 64], sizes = [8, 64], strides = [1, 1]} : vector<8x192xf32> to vector<8x64xf32>
    %524 = vector.extract_strided_slice %512 {offsets = [0, 64], sizes = [8, 64], strides = [1, 1]} : vector<8x192xf32> to vector<8x64xf32>
    %525 = arith.addf %523, %524 : vector<8x64xf32>
    %cst_122 = arith.constant 5.000000e-01 : f32
    %526 = vector.broadcast %cst_122 : f32 to vector<8x64xf32>
    %527 = arith.mulf %526, %525 : vector<8x64xf32>
    %528 = math.tanh %527 : vector<8x64xf32>
    %cst_123 = arith.constant 1.000000e+00 : f32
    %529 = vector.broadcast %cst_123 : f32 to vector<8x64xf32>
    %530 = arith.addf %528, %529 : vector<8x64xf32>
    %cst_124 = arith.constant 5.000000e-01 : f32
    %531 = vector.broadcast %cst_124 : f32 to vector<8x64xf32>
    %532 = arith.mulf %531, %530 : vector<8x64xf32>
    %533 = vector.extract_strided_slice %82 {offsets = [0, 128], sizes = [8, 64], strides = [1, 1]} : vector<8x192xf32> to vector<8x64xf32>
    %534 = vector.extract_strided_slice %512 {offsets = [0, 128], sizes = [8, 64], strides = [1, 1]} : vector<8x192xf32> to vector<8x64xf32>
    %535 = arith.mulf %522, %534 : vector<8x64xf32>
    %536 = arith.addf %533, %535 : vector<8x64xf32>
    %537 = math.tanh %536 : vector<8x64xf32>
    %cst_125 = arith.constant 1.000000e+00 : f32
    %538 = vector.broadcast %cst_125 : f32 to vector<8x64xf32>
    %539 = arith.subf %538, %532 : vector<8x64xf32>
    %540 = arith.mulf %539, %537 : vector<8x64xf32>
    %541 = arith.mulf %532, %508 : vector<8x64xf32>
    %542 = arith.addf %540, %541 : vector<8x64xf32>
    %c0_126 = arith.constant 0 : index
    %c768 = arith.constant 768 : index
    %543 = vector.load %arg10[%c0_126, %c768] : memref<8x1024xf32, #tpu.memory_space<vmem>>, vector<8x64xf32>
    tpu.vector_store %arg10[%c0_126, %c768], %542 {strides = array<i32>} : memref<8x1024xf32, #tpu.memory_space<vmem>>, vector<8x64xf32>,
    %cst_127 = arith.constant dense<0.000000e+00> : vector<8x192xf32>
    %544 = tpu.matmul %542, %2, %cst_127 {dimension_numbers = #tpu.dot_dimension_numbers<[1], [0], [0], [1], [0, 0, 1, 1], [], []>} : vector<8x64xf32>, vector<64x192xf32>, vector<8x192xf32> -> vector<8x192xf32>
    %545 = vector.broadcast %4 : vector<1x192xf32> to vector<8x192xf32>
    %546 = arith.addf %544, %545 : vector<8x192xf32>
    %547 = vector.extract_strided_slice %88 {offsets = [0, 0], sizes = [8, 64], strides = [1, 1]} : vector<8x192xf32> to vector<8x64xf32>
    %548 = vector.extract_strided_slice %546 {offsets = [0, 0], sizes = [8, 64], strides = [1, 1]} : vector<8x192xf32> to vector<8x64xf32>
    %549 = arith.addf %547, %548 : vector<8x64xf32>
    %cst_128 = arith.constant 5.000000e-01 : f32
    %550 = vector.broadcast %cst_128 : f32 to vector<8x64xf32>
    %551 = arith.mulf %550, %549 : vector<8x64xf32>
    %552 = math.tanh %551 : vector<8x64xf32>
    %cst_129 = arith.constant 1.000000e+00 : f32
    %553 = vector.broadcast %cst_129 : f32 to vector<8x64xf32>
    %554 = arith.addf %552, %553 : vector<8x64xf32>
    %cst_130 = arith.constant 5.000000e-01 : f32
    %555 = vector.broadcast %cst_130 : f32 to vector<8x64xf32>
    %556 = arith.mulf %555, %554 : vector<8x64xf32>
    %557 = vector.extract_strided_slice %88 {offsets = [0, 64], sizes = [8, 64], strides = [1, 1]} : vector<8x192xf32> to vector<8x64xf32>
    %558 = vector.extract_strided_slice %546 {offsets = [0, 64], sizes = [8, 64], strides = [1, 1]} : vector<8x192xf32> to vector<8x64xf32>
    %559 = arith.addf %557, %558 : vector<8x64xf32>
    %cst_131 = arith.constant 5.000000e-01 : f32
    %560 = vector.broadcast %cst_131 : f32 to vector<8x64xf32>
    %561 = arith.mulf %560, %559 : vector<8x64xf32>
    %562 = math.tanh %561 : vector<8x64xf32>
    %cst_132 = arith.constant 1.000000e+00 : f32
    %563 = vector.broadcast %cst_132 : f32 to vector<8x64xf32>
    %564 = arith.addf %562, %563 : vector<8x64xf32>
    %cst_133 = arith.constant 5.000000e-01 : f32
    %565 = vector.broadcast %cst_133 : f32 to vector<8x64xf32>
    %566 = arith.mulf %565, %564 : vector<8x64xf32>
    %567 = vector.extract_strided_slice %88 {offsets = [0, 128], sizes = [8, 64], strides = [1, 1]} : vector<8x192xf32> to vector<8x64xf32>
    %568 = vector.extract_strided_slice %546 {offsets = [0, 128], sizes = [8, 64], strides = [1, 1]} : vector<8x192xf32> to vector<8x64xf32>
    %569 = arith.mulf %556, %568 : vector<8x64xf32>
    %570 = arith.addf %567, %569 : vector<8x64xf32>
    %571 = math.tanh %570 : vector<8x64xf32>
    %cst_134 = arith.constant 1.000000e+00 : f32
    %572 = vector.broadcast %cst_134 : f32 to vector<8x64xf32>
    %573 = arith.subf %572, %566 : vector<8x64xf32>
    %574 = arith.mulf %573, %571 : vector<8x64xf32>
    %575 = arith.mulf %566, %542 : vector<8x64xf32>
    %576 = arith.addf %574, %575 : vector<8x64xf32>
    %c0_135 = arith.constant 0 : index
    %c832 = arith.constant 832 : index
    %577 = vector.load %arg10[%c0_135, %c832] : memref<8x1024xf32, #tpu.memory_space<vmem>>, vector<8x64xf32>
    tpu.vector_store %arg10[%c0_135, %c832], %576 {strides = array<i32>} : memref<8x1024xf32, #tpu.memory_space<vmem>>, vector<8x64xf32>,
    %cst_136 = arith.constant dense<0.000000e+00> : vector<8x192xf32>
    %578 = tpu.matmul %576, %2, %cst_136 {dimension_numbers = #tpu.dot_dimension_numbers<[1], [0], [0], [1], [0, 0, 1, 1], [], []>} : vector<8x64xf32>, vector<64x192xf32>, vector<8x192xf32> -> vector<8x192xf32>
    %579 = vector.broadcast %4 : vector<1x192xf32> to vector<8x192xf32>
    %580 = arith.addf %578, %579 : vector<8x192xf32>
    %581 = vector.extract_strided_slice %94 {offsets = [0, 0], sizes = [8, 64], strides = [1, 1]} : vector<8x192xf32> to vector<8x64xf32>
    %582 = vector.extract_strided_slice %580 {offsets = [0, 0], sizes = [8, 64], strides = [1, 1]} : vector<8x192xf32> to vector<8x64xf32>
    %583 = arith.addf %581, %582 : vector<8x64xf32>
    %cst_137 = arith.constant 5.000000e-01 : f32
    %584 = vector.broadcast %cst_137 : f32 to vector<8x64xf32>
    %585 = arith.mulf %584, %583 : vector<8x64xf32>
    %586 = math.tanh %585 : vector<8x64xf32>
    %cst_138 = arith.constant 1.000000e+00 : f32
    %587 = vector.broadcast %cst_138 : f32 to vector<8x64xf32>
    %588 = arith.addf %586, %587 : vector<8x64xf32>
    %cst_139 = arith.constant 5.000000e-01 : f32
    %589 = vector.broadcast %cst_139 : f32 to vector<8x64xf32>
    %590 = arith.mulf %589, %588 : vector<8x64xf32>
    %591 = vector.extract_strided_slice %94 {offsets = [0, 64], sizes = [8, 64], strides = [1, 1]} : vector<8x192xf32> to vector<8x64xf32>
    %592 = vector.extract_strided_slice %580 {offsets = [0, 64], sizes = [8, 64], strides = [1, 1]} : vector<8x192xf32> to vector<8x64xf32>
    %593 = arith.addf %591, %592 : vector<8x64xf32>
    %cst_140 = arith.constant 5.000000e-01 : f32
    %594 = vector.broadcast %cst_140 : f32 to vector<8x64xf32>
    %595 = arith.mulf %594, %593 : vector<8x64xf32>
    %596 = math.tanh %595 : vector<8x64xf32>
    %cst_141 = arith.constant 1.000000e+00 : f32
    %597 = vector.broadcast %cst_141 : f32 to vector<8x64xf32>
    %598 = arith.addf %596, %597 : vector<8x64xf32>
    %cst_142 = arith.constant 5.000000e-01 : f32
    %599 = vector.broadcast %cst_142 : f32 to vector<8x64xf32>
    %600 = arith.mulf %599, %598 : vector<8x64xf32>
    %601 = vector.extract_strided_slice %94 {offsets = [0, 128], sizes = [8, 64], strides = [1, 1]} : vector<8x192xf32> to vector<8x64xf32>
    %602 = vector.extract_strided_slice %580 {offsets = [0, 128], sizes = [8, 64], strides = [1, 1]} : vector<8x192xf32> to vector<8x64xf32>
    %603 = arith.mulf %590, %602 : vector<8x64xf32>
    %604 = arith.addf %601, %603 : vector<8x64xf32>
    %605 = math.tanh %604 : vector<8x64xf32>
    %cst_143 = arith.constant 1.000000e+00 : f32
    %606 = vector.broadcast %cst_143 : f32 to vector<8x64xf32>
    %607 = arith.subf %606, %600 : vector<8x64xf32>
    %608 = arith.mulf %607, %605 : vector<8x64xf32>
    %609 = arith.mulf %600, %576 : vector<8x64xf32>
    %610 = arith.addf %608, %609 : vector<8x64xf32>
    %c0_144 = arith.constant 0 : index
    %c896 = arith.constant 896 : index
    %611 = vector.load %arg10[%c0_144, %c896] : memref<8x1024xf32, #tpu.memory_space<vmem>>, vector<8x64xf32>
    tpu.vector_store %arg10[%c0_144, %c896], %610 {strides = array<i32>} : memref<8x1024xf32, #tpu.memory_space<vmem>>, vector<8x64xf32>,
    %cst_145 = arith.constant dense<0.000000e+00> : vector<8x192xf32>
    %612 = tpu.matmul %610, %2, %cst_145 {dimension_numbers = #tpu.dot_dimension_numbers<[1], [0], [0], [1], [0, 0, 1, 1], [], []>} : vector<8x64xf32>, vector<64x192xf32>, vector<8x192xf32> -> vector<8x192xf32>
    %613 = vector.broadcast %4 : vector<1x192xf32> to vector<8x192xf32>
    %614 = arith.addf %612, %613 : vector<8x192xf32>
    %615 = vector.extract_strided_slice %100 {offsets = [0, 0], sizes = [8, 64], strides = [1, 1]} : vector<8x192xf32> to vector<8x64xf32>
    %616 = vector.extract_strided_slice %614 {offsets = [0, 0], sizes = [8, 64], strides = [1, 1]} : vector<8x192xf32> to vector<8x64xf32>
    %617 = arith.addf %615, %616 : vector<8x64xf32>
    %cst_146 = arith.constant 5.000000e-01 : f32
    %618 = vector.broadcast %cst_146 : f32 to vector<8x64xf32>
    %619 = arith.mulf %618, %617 : vector<8x64xf32>
    %620 = math.tanh %619 : vector<8x64xf32>
    %cst_147 = arith.constant 1.000000e+00 : f32
    %621 = vector.broadcast %cst_147 : f32 to vector<8x64xf32>
    %622 = arith.addf %620, %621 : vector<8x64xf32>
    %cst_148 = arith.constant 5.000000e-01 : f32
    %623 = vector.broadcast %cst_148 : f32 to vector<8x64xf32>
    %624 = arith.mulf %623, %622 : vector<8x64xf32>
    %625 = vector.extract_strided_slice %100 {offsets = [0, 64], sizes = [8, 64], strides = [1, 1]} : vector<8x192xf32> to vector<8x64xf32>
    %626 = vector.extract_strided_slice %614 {offsets = [0, 64], sizes = [8, 64], strides = [1, 1]} : vector<8x192xf32> to vector<8x64xf32>
    %627 = arith.addf %625, %626 : vector<8x64xf32>
    %cst_149 = arith.constant 5.000000e-01 : f32
    %628 = vector.broadcast %cst_149 : f32 to vector<8x64xf32>
    %629 = arith.mulf %628, %627 : vector<8x64xf32>
    %630 = math.tanh %629 : vector<8x64xf32>
    %cst_150 = arith.constant 1.000000e+00 : f32
    %631 = vector.broadcast %cst_150 : f32 to vector<8x64xf32>
    %632 = arith.addf %630, %631 : vector<8x64xf32>
    %cst_151 = arith.constant 5.000000e-01 : f32
    %633 = vector.broadcast %cst_151 : f32 to vector<8x64xf32>
    %634 = arith.mulf %633, %632 : vector<8x64xf32>
    %635 = vector.extract_strided_slice %100 {offsets = [0, 128], sizes = [8, 64], strides = [1, 1]} : vector<8x192xf32> to vector<8x64xf32>
    %636 = vector.extract_strided_slice %614 {offsets = [0, 128], sizes = [8, 64], strides = [1, 1]} : vector<8x192xf32> to vector<8x64xf32>
    %637 = arith.mulf %624, %636 : vector<8x64xf32>
    %638 = arith.addf %635, %637 : vector<8x64xf32>
    %639 = math.tanh %638 : vector<8x64xf32>
    %cst_152 = arith.constant 1.000000e+00 : f32
    %640 = vector.broadcast %cst_152 : f32 to vector<8x64xf32>
    %641 = arith.subf %640, %634 : vector<8x64xf32>
    %642 = arith.mulf %641, %639 : vector<8x64xf32>
    %643 = arith.mulf %634, %610 : vector<8x64xf32>
    %644 = arith.addf %642, %643 : vector<8x64xf32>
    %c0_153 = arith.constant 0 : index
    %c960 = arith.constant 960 : index
    %645 = vector.load %arg10[%c0_153, %c960] : memref<8x1024xf32, #tpu.memory_space<vmem>>, vector<8x64xf32>
    tpu.vector_store %arg10[%c0_153, %c960], %644 {strides = array<i32>} : memref<8x1024xf32, #tpu.memory_space<vmem>>, vector<8x64xf32>,
    %c0_154 = arith.constant 0 : index
    %c0_155 = arith.constant 0 : index
    %646 = vector.load %arg10[%c0_154, %c0_155] : memref<8x1024xf32, #tpu.memory_space<vmem>>, vector<8x1024xf32>
    %647 = tpu.iota {dimensions = array<i32: 0>} : vector<8x1xi32>
    %c4_i32 = arith.constant 4 : i32
    %648 = vector.broadcast %c4_i32 : i32 to vector<8x1xi32>
    %649 = arith.cmpi slt, %647, %648 : vector<8x1xi32>
    %650 = arith.extui %649 : vector<8x1xi1> to vector<8x1xi32>
    %651 = arith.sitofp %650 : vector<8x1xi32> to vector<8x1xf32>
    %652 = vector.broadcast %651 : vector<8x1xf32> to vector<8x1024xf32>
    %653 = arith.mulf %646, %652 : vector<8x1024xf32>
    %cst_156 = arith.constant dense<0.000000e+00> : vector<1024xf32>
    %654 = vector.multi_reduction <add>, %653, %cst_156 [0] : vector<8x1024xf32> to vector<1024xf32>
    %655 = vector.shape_cast %654 : vector<1024xf32> to vector<1x1024xf32>
    %cst_157 = arith.constant 2.500000e-01 : f32
    %656 = vector.broadcast %cst_157 : f32 to vector<1x1024xf32>
    %657 = arith.mulf %655, %656 : vector<1x1024xf32>
    %658 = vector.broadcast %657 : vector<1x1024xf32> to vector<8x1024xf32>
    %659 = arith.subf %646, %658 : vector<8x1024xf32>
    %660 = vector.broadcast %651 : vector<8x1xf32> to vector<8x1024xf32>
    %661 = arith.mulf %659, %660 : vector<8x1024xf32>
    %662 = arith.mulf %661, %661 : vector<8x1024xf32>
    %cst_158 = arith.constant dense<0.000000e+00> : vector<1024xf32>
    %663 = vector.multi_reduction <add>, %662, %cst_158 [0] : vector<8x1024xf32> to vector<1024xf32>
    %664 = vector.shape_cast %663 : vector<1024xf32> to vector<1x1024xf32>
    %cst_159 = arith.constant 2.500000e-01 : f32
    %665 = vector.broadcast %cst_159 : f32 to vector<1x1024xf32>
    %666 = arith.mulf %664, %665 : vector<1x1024xf32>
    %667 = vector.broadcast %657 : vector<1x1024xf32> to vector<8x1024xf32>
    %668 = arith.subf %646, %667 : vector<8x1024xf32>
    %cst_160 = arith.constant 9.99999974E-6 : f32
    %669 = vector.broadcast %cst_160 : f32 to vector<1x1024xf32>
    %670 = arith.addf %666, %669 : vector<1x1024xf32>
    %671 = math.rsqrt %670 : vector<1x1024xf32>
    %672 = vector.broadcast %671 : vector<1x1024xf32> to vector<8x1024xf32>
    %673 = arith.mulf %668, %672 : vector<8x1024xf32>
    %c0_161 = arith.constant 0 : index
    %c0_162 = arith.constant 0 : index
    %674 = vector.load %arg5[%c0_161, %c0_162] : memref<1x1024xf32, #tpu.memory_space<vmem>>, vector<1x1024xf32>
    %675 = vector.broadcast %674 : vector<1x1024xf32> to vector<8x1024xf32>
    %676 = arith.mulf %673, %675 : vector<8x1024xf32>
    %c0_163 = arith.constant 0 : index
    %c0_164 = arith.constant 0 : index
    %677 = vector.load %arg6[%c0_163, %c0_164] : memref<1x1024xf32, #tpu.memory_space<vmem>>, vector<1x1024xf32>
    %678 = vector.broadcast %677 : vector<1x1024xf32> to vector<8x1024xf32>
    %679 = arith.addf %676, %678 : vector<8x1024xf32>
    %680 = math.tanh %679 : vector<8x1024xf32>
    %c0_165 = arith.constant 0 : index
    %c0_166 = arith.constant 0 : index
    %681 = vector.load %arg7[%c0_165, %c0_166] : memref<1024x128xf32, #tpu.memory_space<vmem>>, vector<1024x128xf32>
    %cst_167 = arith.constant dense<0.000000e+00> : vector<8x128xf32>
    %682 = tpu.matmul %680, %681, %cst_167 {dimension_numbers = #tpu.dot_dimension_numbers<[1], [0], [0], [1], [0, 0, 1, 1], [], []>} : vector<8x1024xf32>, vector<1024x128xf32>, vector<8x128xf32> -> vector<8x128xf32>
    %c0_168 = arith.constant 0 : index
    %c0_169 = arith.constant 0 : index
    %683 = vector.load %arg8[%c0_168, %c0_169] : memref<1x128xf32, #tpu.memory_space<vmem>>, vector<1x128xf32>
    %684 = vector.broadcast %683 : vector<1x128xf32> to vector<8x128xf32>
    %685 = arith.addf %682, %684 : vector<8x128xf32>
    %c0_170 = arith.constant 0 : index
    %c0_171 = arith.constant 0 : index
    %686 = vector.load %arg9[%c0_170, %c0_171] : memref<8x128xf32, #tpu.memory_space<vmem>>, vector<8x128xf32>
    tpu.vector_store %arg9[%c0_170, %c0_171], %685 {strides = array<i32>} : memref<8x128xf32, #tpu.memory_space<vmem>>, vector<8x128xf32>,
    return
  }
}

</mosaic_0001>

<bundles_post_ra>
// kernel: tpu_custom_call.1
= control target key start
LH: loop header
LB: loop body
LE: loop exit
PB: predicated region body
PF: predicated region fallthrough
CT: control target
= control target key end

     0   :  { %14 = vsyncpa [#allocation4], 0  ;;  %s3071_s0 = inlined_call_operand.hbm [shape: f32[8,16], index: 0, kind: input, shape index: {}]   ;;  %s3072_s1 = inlined_call_operand.hbm [shape: f32[1,192], index: 1, kind: input, shape index: {}]   ;;  %s3073_s2 = inlined_call_operand.hbm [shape: f32[64,192], index: 2, kind: input, shape index: {}]   ;;  %s3074_s3 = inlined_call_operand.vmem [shape: f32[1,192], index: 3, kind: input, shape index: {}]   ;;  %s3075_s4 = inlined_call_operand.hbm [shape: f32[1,192], index: 4, kind: input, shape index: {}]   ;;  %s3076_s5 = inlined_call_operand.hbm [shape: f32[1,1024], index: 5, kind: input, shape index: {}]   ;;  %s3077_s6 = inlined_call_operand.hbm [shape: f32[1,1024], index: 6, kind: input, shape index: {}]   ;;  %s3078_s7 = inlined_call_operand.hbm [shape: f32[1024,128], index: 7, kind: input, shape index: {}]   ;;  %s3079_s8 = inlined_call_operand.vmem [shape: f32[1,128], index: 8, kind: input, shape index: {}]   ;;  %s3080_s9 = inlined_call_operand.hbm [shape: f32[8,128], index: 9, kind: output, shape index: {}]  }
   0x1   :  { %15 = vsyncpa [#allocation7], 0 }
   0x2   :  { %16 = vsyncpa [#allocation10], 0 }
   0x3   :  { %17 = vsyncpa [#allocation13], 0  ;;  %s35_s11 = sshll.u32 %s3072_s1, 4  ;;  %s36_s11 = int_to_ptr.hbm [resolvable:$true] %s35_s11 }
   0x4   :  { %18 = vsyncpa [#allocation5], 0  ;;  %s2317_s12 = smov [#allocation6]   ;;  %s61_s16 = sshll.u32 %s3075_s4, 4  ;;  %s62_s16 = int_to_ptr.hbm [resolvable:$true] %s61_s16 }
   0x5   :  { %s37_s13 = sshll.u32 %s2317_s12, 4  ;;  %s2318_s17 = smov [#allocation9]   ;;  %s38_s13 = int_to_ptr.vmem [resolvable:$true] %s37_s13 }
   0x6   :  { %40 = dma.hbm_to_vmem [thread:$0]  %s36_s11, 32, %s38_s13, [#allocation7]  }
   0x7   :  { %s63_s18 = sshll.u32 %s2318_s17, 4  ;;  %s83_s21 = sshll.u32 %s3077_s6, 4  ;;  %s64_s18 = int_to_ptr.vmem [resolvable:$true] %s63_s18  ;;  %s84_s21 = int_to_ptr.hbm [resolvable:$true] %s83_s21 }
   0x8   :  { %66 = dma.hbm_to_vmem [thread:$0]  %s62_s16, 32, %s64_s18, [#allocation10]  }
   0x9   :  { %s24_s23 = sshll.u32 %s3071_s0, 4  ;;  %s2319_s24 = smov [#allocation12]   ;;  %s25_s23 = int_to_ptr.hbm [resolvable:$true] %s24_s23 }
   0xa   :  { %s85_s25 = sshll.u32 %s2319_s24, 4  ;;  %s2320_s4 = smov [#allocation3]   ;;  %s86_s25 = int_to_ptr.vmem [resolvable:$true] %s85_s25 }
   0xb   :  { %88 = dma.hbm_to_vmem [thread:$0]  %s84_s21, 128, %s86_s25, [#allocation13]  }
   0xc   :  { %s26_s26 = sshll.u32 %s2320_s4, 4  ;;  %s45_s29 = sshll.u32 %s3073_s2, 4  ;;  %s27_s26 = int_to_ptr.vmem [resolvable:$true] %s26_s26  ;;  %s46_s29 = int_to_ptr.hbm [resolvable:$true] %s45_s29 }
   0xd   :  { %29 = dma.hbm_to_vmem [thread:$0]  %s25_s23, 128, %s27_s26, [#allocation4]  }
   0xe   :  { %s2321_s6 = smov [#allocation8]   ;;  %s72_s0 = sshll.u32 %s3076_s5, 4  ;;  %s73_s0 = int_to_ptr.hbm [resolvable:$true] %s72_s0 }
   0xf   :  { %s47_s30 = sshll.u32 %s2321_s6, 4  ;;  %s2322_s12 = smov 256   ;;  %s48_s30 = int_to_ptr.vmem [resolvable:$true] %s47_s30 }
  0x10   :  { %s2323_s13 = smov 16   ;;  %s2324_s14 = smov [#allocation11]  }
  0x11   :  { %53 = dma.hbm_to_vmem [thread:$0]  %s46_s29, 2048, %s48_s30, [#allocation7], %s2322_s12, %s2322_s12, %s2323_s13  }
  0x12   :  { %s74_s15 = sshll.u32 %s2324_s14, 4  ;;  %s93_s2 = sshll.u32 %s3078_s7, 4  ;;  %s75_s15 = int_to_ptr.vmem [resolvable:$true] %s74_s15  ;;  %s94_s2 = int_to_ptr.hbm [resolvable:$true] %s93_s2 }
  0x13   :  { %77 = dma.hbm_to_vmem [thread:$0]  %s73_s0, 128, %s75_s15, [#allocation10]  }
  0x14   :  { %s2325_s18 = smov [#allocation14]   ;;  %s2326_s20 = smov 128  }
  0x15   :  { %s95_s19 = sshll.u32 %s2325_s18, 4  ;;  %s2327_s21 = smov 8   ;;  %s96_s19 = int_to_ptr.vmem [resolvable:$true] %s95_s19 }
  0x16   :  { %101 = dma.hbm_to_vmem [thread:$0]  %s94_s2, 16384, %s96_s19, [#allocation13], %s2326_s20, %s2326_s20, %s2327_s21  }
  0x17   :  { %2307 = dma.done.wait [#allocation4], 128  }
  0x18   :  { %2308 = vsyncadd [#allocation4], 4294967168 }
  0x19   :  { %2309 = dma.done.wait [#allocation7], 2080  }
  0x1a   :  { %2310 = vsyncadd [#allocation7], 4294965216 }
  0x1b   :  { %2311 = dma.done.wait [#allocation10], 160  }
  0x1c   :  { %2312 = vsyncadd [#allocation10], 4294967136 }
  0x1d   :  { %2313 = dma.done.wait [#allocation13], 16512  }
  0x1e   :  { %2314 = vsyncadd [#allocation13], 4294950784  ;;  %v2328_v0 = vmov 0   ;;  %v2418_v1 = vld [vmem:[#allocation8 + $0x70] sm:$0xff]  ;;  %v2420_v2 = vld [vmem:[#allocation8 + $0x60] sm:$0xff]  ;;  %v2329_v18 = vmov 0.0  }
  0x1f   :  { %1983 = vset.pattern.permute.xlu0 %v2328_v0  ;;  %308 = vmatpush.msra.mxu0 %v2418_v1  ;;  %v2424_v3 = vld [vmem:[#allocation8 + $0x50] sm:$0xff]  ;;  %v2426_v4 = vld [vmem:[#allocation8 + $0x78] sm:$0xff]  ;;  %v2430_v5 = vld [vmem:[#allocation8 + $0x68] sm:$0xff]  ;;  %v2331_v50 = vmov 1   ;;  %vm296_vm0 = vcmask 523264   ;;  %vm419_vm1 = vcmask 1048064  }
  0x20   :  { %371 = vmatpush.msra.mxu2 %v2418_v1  ;;  %328 = vmatpush.msra.mxu1 %v2426_v4  ;;  %v2432_v6 = vld [vmem:[#allocation8 + $0x40] sm:$0xff]  ;;  %v2434_v7 = vld [vmem:[#allocation8 + $0x58] sm:$0xff]  ;;  %v2442_v9 = vld [vmem:[#allocation8 + $0x30] sm:$0xff]  ;;  %s2346_s23 = smov [#allocation15]   ;;  %s1909_s26 = sshll.u32 %s3080_s9, 4  ;;  %s1910_s26 = int_to_ptr.hbm [resolvable:$true] %s1909_s26 }
  0x21   :  { %309 = vmatpush.msra.mxu0 %v2420_v2  ;;  %v2436_v8 = vld [vmem:[#allocation3] sm:$0xff]  ;;  %391 = vmatpush.msra.mxu3 %v2426_v4  ;;  %v2444_v10 = vld [vmem:[#allocation8 + $0x48] sm:$0xff]  ;;  %v2450_v11 = vld [vmem:[#allocation8 + $0x20] sm:$0xff]  ;;  %s1907_s24 = sshll.u32 %s2346_s23, 4  ;;  %s1908_s24 = int_to_ptr.vmem [resolvable:$true] %s1907_s24 }
  0x22   :  { %372 = vmatpush.msra.mxu2 %v2420_v2  ;;  %329 = vmatpush.msra.mxu1 %v2430_v5  ;;  %v2452_v12 = vld [vmem:[#allocation8 + $0x38] sm:$0xff]  ;;  %v2458_v13 = vld [vmem:[#allocation8 + $0x10] sm:$0xff]  ;;  %v2460_v14 = vld [vmem:[#allocation8 + $0x28] sm:$0xff] }
  0x23   :  { %310 = vmatpush.msra.mxu0 %v2424_v3  ;;  %154 = vperm.xlu0 %1983, %v2436_v8   ;;  %v2466_v15 = vld [vmem:[#allocation8] sm:$0xff]  ;;  %v2468_v16 = vld [vmem:[#allocation8 + $0x18] sm:$0xff]  ;;  %v2474_v17 = vld [vmem:[#allocation8 + $0x8] sm:$0xff] }
  0x24   :  { %392 = vmatpush.msra.mxu3 %v2430_v5  ;;  %330 = vmatpush.msra.mxu1 %v2434_v7  ;;  %v133_v19 = vld [vmem:[#allocation6] sm:$0x3]  ;;  %v150_v21 = vld [vmem:[%s3074_s3] sm:$0x3]  ;;  %v151_v23 = vld [vmem:[#allocation9] sm:$0x3] }
  0x25   :  { %311 = vmatpush.msra.mxu0 %v2432_v6  ;;  %373 = vmatpush.msra.mxu2 %v2424_v3  ;;  %v2535_v20 = vperm.slane %v133_v19, 0  ;;  %v2540_v24 = vperm.slane %v150_v21, 0  ;;  %v2543_v26 = vperm.slane %v151_v23, 0  ;;  %v2547_v32 = vperm.slane %v133_v19, 1  ;;  %s2330_s3 = smov 64  }
  0x26   :  { %393 = vmatpush.msra.mxu3 %v2434_v7  ;;  %331 = vmatpush.msra.mxu1 %v2444_v10  ;;  %v2549_v33 = vperm.slane %v151_v23, 1  ;;  %v2551_v36 = vperm.slane %v150_v21, 1 }
  0x27   :  { %312 = vmatpush.msra.mxu0 %v2442_v9  ;;  %374 = vmatpush.msra.mxu2 %v2432_v6 }
  0x28   :  { %394 = vmatpush.msra.mxu3 %v2444_v10  ;;  %332 = vmatpush.msra.mxu1 %v2452_v12 }
  0x29   :  { %313 = vmatpush.msra.mxu0 %v2450_v11  ;;  %375 = vmatpush.msra.mxu2 %v2442_v9 }
  0x2a   :  { %395 = vmatpush.msra.mxu3 %v2452_v12  ;;  %333 = vmatpush.msra.mxu1 %v2460_v14 }
  0x2b   :  { %314 = vmatpush.msra.mxu0 %v2458_v13  ;;  %376 = vmatpush.msra.mxu2 %v2450_v11 }
  0x2c   :  { %396 = vmatpush.msra.mxu3 %v2460_v14  ;;  %334 = vmatpush.msra.mxu1 %v2468_v16 }
  0x2d   :  { %315 = vmatpush.msra.mxu0 %v2466_v15  ;;  %377 = vmatpush.msra.mxu2 %v2458_v13 }
  0x2e   :  { %316 = vmatmul.f32.vlgmr.msra.gmra.mxu0 %v2329_v18  ;;  %335 = vmatpush.msra.mxu1 %v2474_v17 }
  0x2f   :  { %397 = vmatpush.msra.mxu3 %v2468_v16  ;;  %336 = vmatmul.f32.vlgmr.msra.gmra.mxu1 %v2329_v18 }
  0x30   :  { %378 = vmatpush.msra.mxu2 %v2466_v15  ;;  %434 = vmatpush.msrb.mxu0 %v2418_v1 }
  0x31   :  { %398 = vmatpush.msra.mxu3 %v2474_v17  ;;  %454 = vmatpush.msrb.mxu1 %v2426_v4 }
  0x32   :  { %497 = vmatpush.msrb.mxu2 %v2418_v1  ;;  %435 = vmatpush.msrb.mxu0 %v2420_v2 }
  0x33   :  { %517 = vmatpush.msrb.mxu3 %v2426_v4  ;;  %455 = vmatpush.msrb.mxu1 %v2430_v5 }
  0x34   :  { %498 = vmatpush.msrb.mxu2 %v2420_v2  ;;  %436 = vmatpush.msrb.mxu0 %v2424_v3 }
  0x35   :  { %518 = vmatpush.msrb.mxu3 %v2430_v5  ;;  %456 = vmatpush.msrb.mxu1 %v2434_v7 }
  0x36   :  { %499 = vmatpush.msrb.mxu2 %v2424_v3  ;;  %437 = vmatpush.msrb.mxu0 %v2432_v6 }
  0x37   :  { %519 = vmatpush.msrb.mxu3 %v2434_v7  ;;  %457 = vmatpush.msrb.mxu1 %v2444_v10 }
  0x38   :  { %500 = vmatpush.msrb.mxu2 %v2432_v6  ;;  %438 = vmatpush.msrb.mxu0 %v2442_v9 }
  0x39   :  { %520 = vmatpush.msrb.mxu3 %v2444_v10  ;;  %458 = vmatpush.msrb.mxu1 %v2452_v12 }
  0x3a   :  { %501 = vmatpush.msrb.mxu2 %v2442_v9  ;;  %439 = vmatpush.msrb.mxu0 %v2450_v11 }
  0x3b   :  { %521 = vmatpush.msrb.mxu3 %v2452_v12  ;;  %459 = vmatpush.msrb.mxu1 %v2460_v14 }
  0x3c   :  { %502 = vmatpush.msrb.mxu2 %v2450_v11  ;;  %440 = vmatpush.msrb.mxu0 %v2458_v13 }
  0x3d   :  { %522 = vmatpush.msrb.mxu3 %v2460_v14  ;;  %460 = vmatpush.msrb.mxu1 %v2468_v16 }
  0x3e   :  { %503 = vmatpush.msrb.mxu2 %v2458_v13  ;;  %441 = vmatpush.msrb.mxu0 %v2466_v15 }
  0x3f   :  { %523 = vmatpush.msrb.mxu3 %v2468_v16  ;;  %461 = vmatpush.msrb.mxu1 %v2474_v17 }
  0x40   :  { %504 = vmatpush.msrb.mxu2 %v2466_v15  ;;  %559 = vmatpush.msra.mxu0 %v2418_v1 }
  0x41   :  { %524 = vmatpush.msrb.mxu3 %v2474_v17  ;;  %579 = vmatpush.msra.mxu1 %v2426_v4 }
  0x42   :  { %560 = vmatpush.msra.mxu0 %v2420_v2  ;;  %1984 = vset.pattern.permute.xlu1 %v2331_v50 }
  0x43   :  { %580 = vmatpush.msra.mxu1 %v2430_v5 }
  0x44   :  { %561 = vmatpush.msra.mxu0 %v2424_v3 }
  0x45   :  { %581 = vmatpush.msra.mxu1 %v2434_v7 }
  0x46   :  { %562 = vmatpush.msra.mxu0 %v2432_v6 }
  0x47   :  { %582 = vmatpush.msra.mxu1 %v2444_v10 }
  0x48   :  { %563 = vmatpush.msra.mxu0 %v2442_v9 }
  0x49   :  { %583 = vmatpush.msra.mxu1 %v2452_v12 }
  0x4a   :  { %564 = vmatpush.msra.mxu0 %v2450_v11 }
  0x4b   :  { %584 = vmatpush.msra.mxu1 %v2460_v14 }
  0x4c   :  { %565 = vmatpush.msra.mxu0 %v2458_v13 }
  0x4d   :  { %585 = vmatpush.msra.mxu1 %v2468_v16 }
  0x4e   :  { %566 = vmatpush.msra.mxu0 %v2466_v15 }
  0x4f   :  { %586 = vmatpush.msra.mxu1 %v2474_v17 }
  0x95   :  { %v155_v22 = vpop.permute.xlu0 %154 }
  0x96   :  { %v162_v25 = vmul.f32 %v2535_v20, %v155_v22  ;;  %v163_v37 = vmul.f32 %v2547_v32, %v155_v22 }
  0x98   :  { %v169_v27 = vadd.f32 %v2540_v24, %v162_v25  ;;  %v170_v41 = vadd.f32 %v2551_v36, %v163_v37 }
  0xab   :  { %v317_v28 = vpop.f32.mrf.mxu0 }
  0xac   :  { %v318_v29 = vadd.f32 %v317_v28, %v2543_v26  ;;  %v337_v34 = vpop.f32.mrf.mxu1 }
  0xad   :  { %v338_v39 = vadd.f32 %v337_v34, %v2549_v33 }
  0xae   :  { %v340_v30 = vadd.f32 %v318_v29, %v169_v27 }
  0xb0   :  { %v341_v31 = vmul.f32 0.5, %v340_v30 }
  0xb2   :  { %2001 = vtanh.f32 %v341_v31  ;;  %v2332_v31 = vmov 2  }
  0xb3   :  { %1985 = vset.pattern.permute.xlu0 %v2332_v31 }
  0xb8   :  { %v2002_v35 = vpop.eup %2001 }
  0xb9   :  { %v343_v38 = vadd.f32 1.0, %v2002_v35 }
  0xbb   :  { %v344_v40 = vmul.f32 0.5, %v343_v38 }
  0xbd   :  { %v345_v42 = vmul.f32 %v344_v40, %v338_v39  ;;  %v348_v45 = vsub.f32 1.0, %v344_v40  ;;  %v354_v48 = vmul.f32 0.0, %v344_v40 }
  0xbf   :  { %v346_v43 = vadd.f32 %v345_v42, %v170_v41 }
  0xc1   :  { %2003 = vtanh.f32 %v346_v43 }
  0xc7   :  { %v2004_v44 = vpop.eup %2003 }
  0xc8   :  { %350 = vrot.lane.b32.xlu0 %v2004_v44, %s2330_s3 }
  0xd0   :  { %180 = vperm.xlu0 %1985, %v2436_v8  }
 0x13a   :  { %v351_v46 = vpop.permute.xlu0 %350 }
 0x13b   :  { %v353_v47 = vmul.f32 %v351_v46, %v348_v45 }
 0x13d   :  { %v355_v49 = vadd.f32 %v354_v48, %v353_v47 }
 0x13f   :  { %357 = vrot.lane.b32.xlu1 %v355_v49, %s2330_s3 }
 0x142   :  { %v181_v35 = vpop.permute.xlu0 %180 }
 0x143   :  { %v183_v37 = vmul.f32 %v181_v35, %v2535_v20  ;;  %v184_v45 = vmul.f32 %v181_v35, %v2547_v32 }
 0x145   :  { %v185_v38 = vadd.f32 %v183_v37, %v2540_v24 }
 0x147   :  { %172 = vperm.xlu1 %1984, %v2436_v8  }
 0x1b1   :  { %v358_v51 = vpop.permute.xlu1 %357 }
 0x1b2   :  { %360 = vst.msk [vmem:[#allocation2] sm:$0xff] %vm296_vm0, %v358_v51  ;;  %1922 = vmatmul.msk.f32.vlgmr.msra.gmra.mxu2 %vm296_vm0, %v358_v51  ;;  %1923 = vmatmul.msk.f32.vlgmr.msra.gmra.mxu3 %vm296_vm0, %v358_v51 }
 0x1b3   :  { %622 = vmatpush.msra.mxu2 %v2418_v1  ;;  %642 = vmatpush.msra.mxu3 %v2426_v4 }
 0x1b5   :  { %623 = vmatpush.msra.mxu2 %v2420_v2  ;;  %643 = vmatpush.msra.mxu3 %v2430_v5 }
 0x1b7   :  { %624 = vmatpush.msra.mxu2 %v2424_v3  ;;  %644 = vmatpush.msra.mxu3 %v2434_v7 }
 0x1b9   :  { %625 = vmatpush.msra.mxu2 %v2432_v6  ;;  %645 = vmatpush.msra.mxu3 %v2444_v10  ;;  %v173_v52 = vpop.permute.xlu1 %172 }
 0x1ba   :  { %v175_v53 = vmul.f32 %v173_v52, %v2535_v20  ;;  %v176_v61 = vmul.f32 %v173_v52, %v2547_v32 }
 0x1bb   :  { %626 = vmatpush.msra.mxu2 %v2442_v9  ;;  %646 = vmatpush.msra.mxu3 %v2452_v12 }
 0x1bc   :  { %v177_v54 = vadd.f32 %v175_v53, %v2540_v24  ;;  %v178_v19 = vadd.f32 %v176_v61, %v2551_v36 }
 0x1bd   :  { %627 = vmatpush.msra.mxu2 %v2450_v11  ;;  %647 = vmatpush.msra.mxu3 %v2460_v14 }
 0x1bf   :  { %628 = vmatpush.msra.mxu2 %v2458_v13  ;;  %648 = vmatpush.msra.mxu3 %v2468_v16 }
 0x1c1   :  { %629 = vmatpush.msra.mxu2 %v2466_v15  ;;  %649 = vmatpush.msra.mxu3 %v2474_v17 }
 0x235   :  { %v380_v55 = vpop.f32.mrf.mxu2  ;;  %v400_v60 = vpop.f32.mrf.mxu3 }
 0x236   :  { %v381_v56 = vadd.f32 %v380_v55, %v2543_v26  ;;  %v401_v0 = vadd.f32 %v400_v60, %v2549_v33 }
 0x238   :  { %v403_v57 = vadd.f32 %v381_v56, %v177_v54 }
 0x23a   :  { %v404_v58 = vmul.f32 0.5, %v403_v57 }
 0x23c   :  { %2005 = vtanh.f32 %v404_v58  ;;  %v2333_v58 = vmov 3  }
 0x23d   :  { %1986 = vset.pattern.permute.xlu1 %v2333_v58 }
 0x242   :  { %v2006_v59 = vpop.eup %2005 }
 0x243   :  { %v406_v62 = vadd.f32 1.0, %v2006_v59 }
 0x245   :  { %v407_v63 = vmul.f32 0.5, %v406_v62 }
 0x247   :  { %v408_v21 = vmul.f32 %v407_v63, %v401_v0  ;;  %v411_v25 = vsub.f32 1.0, %v407_v63  ;;  %v417_v28 = vmul.f32 %v407_v63, %v355_v49  ;;  %v186_v49 = vadd.f32 %v184_v45, %v2551_v36 }
 0x249   :  { %v409_v22 = vadd.f32 %v408_v21, %v178_v19 }
 0x24b   :  { %2007 = vtanh.f32 %v409_v22 }
 0x251   :  { %v2008_v23 = vpop.eup %2007 }
 0x252   :  { %413 = vrot.lane.b32.xlu2 %v2008_v23, %s2330_s3 }
 0x2ac   :  { %v414_v27 = vpop.permute.xlu2 %413 }
 0x2ad   :  { %v416_v29 = vmul.f32 %v414_v27, %v411_v25 }
 0x2af   :  { %v418_v30 = vadd.f32 %v417_v28, %v416_v29 }
 0x2b1   :  { %420 = vst.msk [vmem:[#allocation2] sm:$0xff] %vm419_vm1, %v418_v30  ;;  %422 = vrot.lane.b32.xlu2 %v418_v30, %s2330_s3 }
 0x30b   :  { %v423_v34 = vpop.permute.xlu2 %422 }
 0x30c   :  { %1924 = vmatmul.msk.f32.vlgmr.msrb.gmra.mxu0 %vm296_vm0, %v423_v34  ;;  %1925 = vmatmul.msk.f32.vlgmr.msrb.gmra.mxu1 %vm296_vm0, %v423_v34 }
 0x30d   :  { %684 = vmatpush.msrb.mxu0 %v2418_v1  ;;  %704 = vmatpush.msrb.mxu1 %v2426_v4 }
 0x30f   :  { %685 = vmatpush.msrb.mxu0 %v2420_v2  ;;  %705 = vmatpush.msrb.mxu1 %v2430_v5 }
 0x311   :  { %686 = vmatpush.msrb.mxu0 %v2424_v3  ;;  %706 = vmatpush.msrb.mxu1 %v2434_v7 }
 0x313   :  { %687 = vmatpush.msrb.mxu0 %v2432_v6  ;;  %707 = vmatpush.msrb.mxu1 %v2444_v10 }
 0x315   :  { %688 = vmatpush.msrb.mxu0 %v2442_v9  ;;  %708 = vmatpush.msrb.mxu1 %v2452_v12 }
 0x317   :  { %689 = vmatpush.msrb.mxu0 %v2450_v11  ;;  %709 = vmatpush.msrb.mxu1 %v2460_v14 }
 0x319   :  { %690 = vmatpush.msrb.mxu0 %v2458_v13  ;;  %710 = vmatpush.msrb.mxu1 %v2468_v16 }
 0x31b   :  { %691 = vmatpush.msrb.mxu0 %v2466_v15  ;;  %711 = vmatpush.msrb.mxu1 %v2474_v17 }
 0x389   :  { %v443_v39 = vpop.f32.mrf.mxu0  ;;  %v463_v44 = vpop.f32.mrf.mxu1 }
 0x38a   :  { %v444_v40 = vadd.f32 %v443_v39, %v2543_v26  ;;  %v464_v48 = vadd.f32 %v463_v44, %v2549_v33 }
 0x38c   :  { %v466_v41 = vadd.f32 %v444_v40, %v185_v38 }
 0x38e   :  { %v467_v42 = vmul.f32 0.5, %v466_v41 }
 0x390   :  { %2009 = vtanh.f32 %v467_v42  ;;  %v2334_v42 = vmov 4  }
 0x396   :  { %v2010_v43 = vpop.eup %2009 }
 0x397   :  { %v469_v46 = vadd.f32 1.0, %v2010_v43 }
 0x399   :  { %v470_v47 = vmul.f32 0.5, %v469_v46 }
 0x39b   :  { %v471_v50 = vmul.f32 %v470_v47, %v464_v48  ;;  %v474_v53 = vsub.f32 1.0, %v470_v47  ;;  %v480_v55 = vmul.f32 %v470_v47, %v418_v30 }
 0x39d   :  { %v472_v51 = vadd.f32 %v471_v50, %v186_v49 }
 0x39f   :  { %2011 = vtanh.f32 %v472_v51 }
 0x3a5   :  { %v2012_v52 = vpop.eup %2011 }
 0x3a6   :  { %476 = vrot.lane.b32.xlu1 %v2012_v52, %s2330_s3 }
 0x3ae   :  { %188 = vperm.xlu1 %1986, %v2436_v8  }
 0x3b6   :  { %1987 = vset.pattern.permute.xlu1 %v2334_v42 }
 0x3b7   :  { %196 = vperm.xlu1 %1987, %v2436_v8  }
 0x418   :  { %v477_v54 = vpop.permute.xlu1 %476 }
 0x419   :  { %v479_v56 = vmul.f32 %v477_v54, %v474_v53 }
 0x41b   :  { %v481_v57 = vadd.f32 %v480_v55, %v479_v56 }
 0x41d   :  { %483 = vrot.lane.b32.xlu2 %v481_v57, %s2330_s3 }
 0x420   :  { %v189_v60 = vpop.permute.xlu1 %188 }
 0x421   :  { %v191_v61 = vmul.f32 %v189_v60, %v2535_v20  ;;  %v192_v25 = vmul.f32 %v189_v60, %v2547_v32 }
 0x423   :  { %v193_v62 = vadd.f32 %v191_v61, %v2540_v24  ;;  %v194_v30 = vadd.f32 %v192_v25, %v2551_v36 }
 0x429   :  { %v197_v44 = vpop.permute.xlu1 %196 }
 0x42a   :  { %v199_v45 = vmul.f32 %v197_v44, %v2535_v20  ;;  %v200_v53 = vmul.f32 %v197_v44, %v2547_v32 }
 0x42c   :  { %v201_v46 = vadd.f32 %v199_v45, %v2540_v24 }
 0x477   :  { %v484_v59 = vpop.permute.xlu2 %483 }
 0x478   :  { %486 = vst.msk [vmem:[#allocation2 + $0x8] sm:$0xff] %vm296_vm0, %v484_v59  ;;  %1926 = vmatmul.msk.f32.vlgmr.msrb.gmra.mxu2 %vm296_vm0, %v484_v59  ;;  %1927 = vmatmul.msk.f32.vlgmr.msrb.gmra.mxu3 %vm296_vm0, %v484_v59 }
 0x479   :  { %747 = vmatpush.msrb.mxu2 %v2418_v1  ;;  %767 = vmatpush.msrb.mxu3 %v2426_v4 }
 0x47b   :  { %748 = vmatpush.msrb.mxu2 %v2420_v2  ;;  %768 = vmatpush.msrb.mxu3 %v2430_v5 }
 0x47d   :  { %749 = vmatpush.msrb.mxu2 %v2424_v3  ;;  %769 = vmatpush.msrb.mxu3 %v2434_v7 }
 0x47f   :  { %750 = vmatpush.msrb.mxu2 %v2432_v6  ;;  %770 = vmatpush.msrb.mxu3 %v2444_v10 }
 0x481   :  { %751 = vmatpush.msrb.mxu2 %v2442_v9  ;;  %771 = vmatpush.msrb.mxu3 %v2452_v12 }
 0x483   :  { %752 = vmatpush.msrb.mxu2 %v2450_v11  ;;  %772 = vmatpush.msrb.mxu3 %v2460_v14 }
 0x485   :  { %753 = vmatpush.msrb.mxu2 %v2458_v13  ;;  %773 = vmatpush.msrb.mxu3 %v2468_v16 }
 0x487   :  { %754 = vmatpush.msrb.mxu2 %v2466_v15  ;;  %774 = vmatpush.msrb.mxu3 %v2474_v17 }
 0x4fb   :  { %v506_v63 = vpop.f32.mrf.mxu2  ;;  %v526_v23 = vpop.f32.mrf.mxu3 }
 0x4fc   :  { %v507_v0 = vadd.f32 %v506_v63, %v2543_v26  ;;  %v527_v29 = vadd.f32 %v526_v23, %v2549_v33 }
 0x4fe   :  { %v529_v19 = vadd.f32 %v507_v0, %v193_v62 }
 0x500   :  { %v530_v21 = vmul.f32 0.5, %v529_v19 }
 0x502   :  { %2013 = vtanh.f32 %v530_v21  ;;  %v2335_v21 = vmov 5  }
 0x503   :  { %1988 = vset.pattern.permute.xlu1 %v2335_v21 }
 0x504   :  { %204 = vperm.xlu1 %1988, %v2436_v8  }
 0x508   :  { %v2014_v22 = vpop.eup %2013 }
 0x509   :  { %v532_v27 = vadd.f32 1.0, %v2014_v22 }
 0x50b   :  { %v533_v28 = vmul.f32 0.5, %v532_v27 }
 0x50d   :  { %v534_v31 = vmul.f32 %v533_v28, %v527_v29  ;;  %v537_v37 = vsub.f32 1.0, %v533_v28  ;;  %v543_v39 = vmul.f32 %v533_v28, %v481_v57  ;;  %v202_v57 = vadd.f32 %v200_v53, %v2551_v36 }
 0x50f   :  { %v535_v34 = vadd.f32 %v534_v31, %v194_v30 }
 0x511   :  { %2015 = vtanh.f32 %v535_v34 }
 0x517   :  { %v2016_v35 = vpop.eup %2015 }
 0x518   :  { %539 = vrot.lane.b32.xlu2 %v2016_v35, %s2330_s3 }
 0x572   :  { %v540_v38 = vpop.permute.xlu2 %539 }
 0x573   :  { %v542_v40 = vmul.f32 %v540_v38, %v537_v37 }
 0x575   :  { %v544_v41 = vadd.f32 %v543_v39, %v542_v40 }
 0x576   :  { %v205_v23 = vpop.permute.xlu1 %204 }
 0x577   :  { %545 = vst.msk [vmem:[#allocation2 + $0x8] sm:$0xff] %vm419_vm1, %v544_v41  ;;  %547 = vrot.lane.b32.xlu0 %v544_v41, %s2330_s3  ;;  %v207_v25 = vmul.f32 %v205_v23, %v2535_v20  ;;  %v208_v37 = vmul.f32 %v205_v23, %v2547_v32 }
 0x579   :  { %v209_v27 = vadd.f32 %v207_v25, %v2540_v24 }
 0x5e9   :  { %v548_v43 = vpop.permute.xlu0 %547 }
 0x5ea   :  { %1928 = vmatmul.msk.f32.vlgmr.msra.gmra.mxu0 %vm296_vm0, %v548_v43  ;;  %1929 = vmatmul.msk.f32.vlgmr.msra.gmra.mxu1 %vm296_vm0, %v548_v43 }
 0x5eb   :  { %809 = vmatpush.msra.mxu0 %v2418_v1  ;;  %829 = vmatpush.msra.mxu1 %v2426_v4 }
 0x5ed   :  { %810 = vmatpush.msra.mxu0 %v2420_v2  ;;  %830 = vmatpush.msra.mxu1 %v2430_v5 }
 0x5ef   :  { %811 = vmatpush.msra.mxu0 %v2424_v3  ;;  %831 = vmatpush.msra.mxu1 %v2434_v7 }
 0x5f1   :  { %812 = vmatpush.msra.mxu0 %v2432_v6  ;;  %832 = vmatpush.msra.mxu1 %v2444_v10 }
 0x5f3   :  { %813 = vmatpush.msra.mxu0 %v2442_v9  ;;  %833 = vmatpush.msra.mxu1 %v2452_v12 }
 0x5f5   :  { %814 = vmatpush.msra.mxu0 %v2450_v11  ;;  %834 = vmatpush.msra.mxu1 %v2460_v14 }
 0x5f7   :  { %815 = vmatpush.msra.mxu0 %v2458_v13  ;;  %835 = vmatpush.msra.mxu1 %v2468_v16 }
 0x5f9   :  { %816 = vmatpush.msra.mxu0 %v2466_v15  ;;  %836 = vmatpush.msra.mxu1 %v2474_v17 }
 0x667   :  { %v568_v47 = vpop.f32.mrf.mxu0  ;;  %v588_v52 = vpop.f32.mrf.mxu1 }
 0x668   :  { %v569_v48 = vadd.f32 %v568_v47, %v2543_v26  ;;  %v589_v56 = vadd.f32 %v588_v52, %v2549_v33 }
 0x66a   :  { %v591_v49 = vadd.f32 %v569_v48, %v201_v46 }
 0x66c   :  { %v592_v50 = vmul.f32 0.5, %v591_v49 }
 0x66e   :  { %2017 = vtanh.f32 %v592_v50  ;;  %v2336_v50 = vmov 6  }
 0x66f   :  { %1989 = vset.pattern.permute.xlu1 %v2336_v50 }
 0x670   :  { %212 = vperm.xlu1 %1989, %v2436_v8  }
 0x674   :  { %v2018_v51 = vpop.eup %2017 }
 0x675   :  { %v594_v54 = vadd.f32 1.0, %v2018_v51 }
 0x677   :  { %v595_v55 = vmul.f32 0.5, %v594_v54 }
 0x679   :  { %v596_v58 = vmul.f32 %v595_v55, %v589_v56  ;;  %v599_v61 = vsub.f32 1.0, %v595_v55  ;;  %v605_v63 = vmul.f32 %v595_v55, %v544_v41  ;;  %v210_v41 = vadd.f32 %v208_v37, %v2551_v36 }
 0x67b   :  { %v597_v59 = vadd.f32 %v596_v58, %v202_v57 }
 0x67d   :  { %2019 = vtanh.f32 %v597_v59 }
 0x683   :  { %v2020_v60 = vpop.eup %2019 }
 0x684   :  { %601 = vrot.lane.b32.xlu2 %v2020_v60, %s2330_s3 }
 0x6de   :  { %v602_v62 = vpop.permute.xlu2 %601 }
 0x6df   :  { %v604_v0 = vmul.f32 %v602_v62, %v599_v61 }
 0x6e1   :  { %v606_v19 = vadd.f32 %v605_v63, %v604_v0 }
 0x6e2   :  { %v213_v52 = vpop.permute.xlu1 %212 }
 0x6e3   :  { %608 = vrot.lane.b32.xlu0 %v606_v19, %s2330_s3  ;;  %v215_v53 = vmul.f32 %v213_v52, %v2535_v20  ;;  %v216_v61 = vmul.f32 %v213_v52, %v2547_v32 }
 0x6e5   :  { %v217_v54 = vadd.f32 %v215_v53, %v2540_v24 }
 0x755   :  { %v609_v22 = vpop.permute.xlu0 %608 }
 0x756   :  { %611 = vst.msk [vmem:[#allocation2 + $0x10] sm:$0xff] %vm296_vm0, %v609_v22  ;;  %1930 = vmatmul.msk.f32.vlgmr.msra.gmra.mxu2 %vm296_vm0, %v609_v22  ;;  %1931 = vmatmul.msk.f32.vlgmr.msra.gmra.mxu3 %vm296_vm0, %v609_v22 }
 0x757   :  { %872 = vmatpush.msra.mxu2 %v2418_v1  ;;  %892 = vmatpush.msra.mxu3 %v2426_v4 }
 0x759   :  { %873 = vmatpush.msra.mxu2 %v2420_v2  ;;  %893 = vmatpush.msra.mxu3 %v2430_v5 }
 0x75b   :  { %874 = vmatpush.msra.mxu2 %v2424_v3  ;;  %894 = vmatpush.msra.mxu3 %v2434_v7 }
 0x75d   :  { %875 = vmatpush.msra.mxu2 %v2432_v6  ;;  %895 = vmatpush.msra.mxu3 %v2444_v10 }
 0x75f   :  { %876 = vmatpush.msra.mxu2 %v2442_v9  ;;  %896 = vmatpush.msra.mxu3 %v2452_v12 }
 0x761   :  { %877 = vmatpush.msra.mxu2 %v2450_v11  ;;  %897 = vmatpush.msra.mxu3 %v2460_v14 }
 0x763   :  { %878 = vmatpush.msra.mxu2 %v2458_v13  ;;  %898 = vmatpush.msra.mxu3 %v2468_v16 }
 0x765   :  { %879 = vmatpush.msra.mxu2 %v2466_v15  ;;  %899 = vmatpush.msra.mxu3 %v2474_v17 }
 0x7d9   :  { %v631_v28 = vpop.f32.mrf.mxu2  ;;  %v651_v35 = vpop.f32.mrf.mxu3 }
 0x7da   :  { %v632_v29 = vadd.f32 %v631_v28, %v2543_v26  ;;  %v652_v40 = vadd.f32 %v651_v35, %v2549_v33 }
 0x7dc   :  { %v654_v30 = vadd.f32 %v632_v29, %v209_v27 }
 0x7de   :  { %v655_v31 = vmul.f32 0.5, %v654_v30 }
 0x7e0   :  { %2021 = vtanh.f32 %v655_v31  ;;  %v2337_v31 = vmov 7  }
 0x7e1   :  { %1990 = vset.pattern.permute.xlu1 %v2337_v31  ;;  %v2809_v31 = vld [vmem:[#allocation8 + $0x40] sm:$0xff] }
 0x7e2   :  { %220 = vperm.xlu1 %1990, %v2436_v8  }
 0x7e6   :  { %v2022_v34 = vpop.eup %2021 }
 0x7e7   :  { %v657_v38 = vadd.f32 1.0, %v2022_v34 }
 0x7e9   :  { %v658_v39 = vmul.f32 0.5, %v657_v38 }
 0x7eb   :  { %v659_v42 = vmul.f32 %v658_v39, %v652_v40  ;;  %v662_v45 = vsub.f32 1.0, %v658_v39  ;;  %v668_v47 = vmul.f32 %v658_v39, %v606_v19  ;;  %v218_v19 = vadd.f32 %v216_v61, %v2551_v36 }
 0x7ed   :  { %v660_v43 = vadd.f32 %v659_v42, %v210_v41 }
 0x7ef   :  { %2023 = vtanh.f32 %v660_v43 }
 0x7f5   :  { %v2024_v44 = vpop.eup %2023 }
 0x7f6   :  { %664 = vrot.lane.b32.xlu2 %v2024_v44, %s2330_s3 }
 0x850   :  { %v665_v46 = vpop.permute.xlu2 %664 }
 0x851   :  { %v667_v48 = vmul.f32 %v665_v46, %v662_v45 }
 0x853   :  { %v669_v49 = vadd.f32 %v668_v47, %v667_v48 }
 0x854   :  { %v221_v35 = vpop.permute.xlu1 %220 }
 0x855   :  { %670 = vst.msk [vmem:[#allocation2 + $0x10] sm:$0xff] %vm419_vm1, %v669_v49  ;;  %672 = vrot.lane.b32.xlu0 %v669_v49, %s2330_s3  ;;  %v223_v37 = vmul.f32 %v221_v35, %v2535_v20  ;;  %v224_v45 = vmul.f32 %v221_v35, %v2547_v32  ;;  %v2815_v35 = vld [vmem:[#allocation8 + $0x30] sm:$0xff] }
 0x857   :  { %v225_v38 = vadd.f32 %v223_v37, %v2540_v24  ;;  %v2818_v37 = vld [vmem:[#allocation8 + $0x38] sm:$0xff] }
 0x8c7   :  { %v673_v51 = vpop.permute.xlu0 %672 }
 0x8c8   :  { %1932 = vmatmul.msk.f32.vlgmr.msrb.gmra.mxu0 %vm296_vm0, %v673_v51  ;;  %1933 = vmatmul.msk.f32.vlgmr.msrb.gmra.mxu1 %vm296_vm0, %v673_v51 }
 0x8c9   :  { %934 = vmatpush.msrb.mxu0 %v2418_v1  ;;  %954 = vmatpush.msrb.mxu1 %v2426_v4 }
 0x8cb   :  { %935 = vmatpush.msrb.mxu0 %v2420_v2  ;;  %955 = vmatpush.msrb.mxu1 %v2430_v5 }
 0x8cd   :  { %936 = vmatpush.msrb.mxu0 %v2424_v3  ;;  %956 = vmatpush.msrb.mxu1 %v2434_v7 }
 0x8cf   :  { %937 = vmatpush.msrb.mxu0 %v2432_v6  ;;  %957 = vmatpush.msrb.mxu1 %v2444_v10 }
 0x8d1   :  { %938 = vmatpush.msrb.mxu0 %v2442_v9  ;;  %958 = vmatpush.msrb.mxu1 %v2452_v12 }
 0x8d3   :  { %939 = vmatpush.msrb.mxu0 %v2450_v11  ;;  %959 = vmatpush.msrb.mxu1 %v2460_v14 }
 0x8d5   :  { %940 = vmatpush.msrb.mxu0 %v2458_v13  ;;  %960 = vmatpush.msrb.mxu1 %v2468_v16 }
 0x8d7   :  { %941 = vmatpush.msrb.mxu0 %v2466_v15  ;;  %961 = vmatpush.msrb.mxu1 %v2474_v17 }
 0x945   :  { %v693_v55 = vpop.f32.mrf.mxu0  ;;  %v713_v60 = vpop.f32.mrf.mxu1 }
 0x946   :  { %v694_v56 = vadd.f32 %v693_v55, %v2543_v26  ;;  %v714_v0 = vadd.f32 %v713_v60, %v2549_v33 }
 0x948   :  { %v716_v57 = vadd.f32 %v694_v56, %v217_v54 }
 0x94a   :  { %v717_v58 = vmul.f32 0.5, %v716_v57 }
 0x94c   :  { %2025 = vtanh.f32 %v717_v58  ;;  %v2338_v58 = vmov 8  }
 0x94d   :  { %1991 = vset.pattern.permute.xlu1 %v2338_v58 }
 0x94e   :  { %228 = vperm.xlu1 %1991, %v2436_v8  }
 0x952   :  { %v2026_v59 = vpop.eup %2025 }
 0x953   :  { %v719_v62 = vadd.f32 1.0, %v2026_v59 }
 0x955   :  { %v720_v63 = vmul.f32 0.5, %v719_v62 }
 0x957   :  { %v721_v21 = vmul.f32 %v720_v63, %v714_v0  ;;  %v724_v25 = vsub.f32 1.0, %v720_v63  ;;  %v730_v28 = vmul.f32 %v720_v63, %v669_v49  ;;  %v226_v49 = vadd.f32 %v224_v45, %v2551_v36 }
 0x959   :  { %v722_v22 = vadd.f32 %v721_v21, %v218_v19  ;;  %v2339_v19 = vmov 9   ;;  %v2785_v21 = vld [vmem:[#allocation3] sm:$0xff] }
 0x95a   :  { %1992 = vset.pattern.permute.xlu1 %v2339_v19 }
 0x95b   :  { %2027 = vtanh.f32 %v722_v22  ;;  %236 = vperm.xlu1 %1992, %v2785_v21  }
 0x961   :  { %v2028_v23 = vpop.eup %2027 }
 0x962   :  { %726 = vrot.lane.b32.xlu2 %v2028_v23, %s2330_s3  ;;  %v2791_v23 = vld [vmem:[#allocation8 + $0x70] sm:$0xff] }
 0x9bc   :  { %v727_v27 = vpop.permute.xlu2 %726 }
 0x9bd   :  { %v729_v29 = vmul.f32 %v727_v27, %v724_v25  ;;  %v2794_v25 = vld [vmem:[#allocation8 + $0x78] sm:$0xff]  ;;  %v2797_v27 = vld [vmem:[#allocation8 + $0x60] sm:$0xff] }
 0x9bf   :  { %v731_v30 = vadd.f32 %v730_v28, %v729_v29  ;;  %v2800_v28 = vld [vmem:[#allocation8 + $0x68] sm:$0xff]  ;;  %v2803_v29 = vld [vmem:[#allocation8 + $0x50] sm:$0xff] }
 0x9c1   :  { %733 = vrot.lane.b32.xlu0 %v731_v30, %s2330_s3 }
 0xa33   :  { %v734_v34 = vpop.permute.xlu0 %733 }
 0xa34   :  { %736 = vst.msk [vmem:[#allocation2 + $0x18] sm:$0xff] %vm296_vm0, %v734_v34  ;;  %1934 = vmatmul.msk.f32.vlgmr.msrb.gmra.mxu2 %vm296_vm0, %v734_v34  ;;  %1935 = vmatmul.msk.f32.vlgmr.msrb.gmra.mxu3 %vm296_vm0, %v734_v34  ;;  %v2812_v34 = vld [vmem:[#allocation8 + $0x48] sm:$0xff] }
 0xa35   :  { %997 = vmatpush.msrb.mxu2 %v2418_v1  ;;  %1017 = vmatpush.msrb.mxu3 %v2426_v4 }
 0xa37   :  { %998 = vmatpush.msrb.mxu2 %v2420_v2  ;;  %1018 = vmatpush.msrb.mxu3 %v2430_v5 }
 0xa39   :  { %999 = vmatpush.msrb.mxu2 %v2424_v3  ;;  %1019 = vmatpush.msrb.mxu3 %v2434_v7 }
 0xa3b   :  { %1000 = vmatpush.msrb.mxu2 %v2432_v6  ;;  %1020 = vmatpush.msrb.mxu3 %v2444_v10 }
 0xa3d   :  { %1001 = vmatpush.msrb.mxu2 %v2442_v9  ;;  %1021 = vmatpush.msrb.mxu3 %v2452_v12 }
 0xa3f   :  { %1002 = vmatpush.msrb.mxu2 %v2450_v11  ;;  %1022 = vmatpush.msrb.mxu3 %v2460_v14 }
 0xa41   :  { %1003 = vmatpush.msrb.mxu2 %v2458_v13  ;;  %1023 = vmatpush.msrb.mxu3 %v2468_v16 }
 0xa43   :  { %1004 = vmatpush.msrb.mxu2 %v2466_v15  ;;  %1024 = vmatpush.msrb.mxu3 %v2474_v17 }
 0xab7   :  { %v756_v39 = vpop.f32.mrf.mxu2  ;;  %v776_v44 = vpop.f32.mrf.mxu3 }
 0xab8   :  { %v757_v40 = vadd.f32 %v756_v39, %v2543_v26  ;;  %v777_v48 = vadd.f32 %v776_v44, %v2549_v33  ;;  %v2824_v39 = vld [vmem:[#allocation8 + $0x28] sm:$0xff] }
 0xaba   :  { %v779_v41 = vadd.f32 %v757_v40, %v225_v38  ;;  %v2821_v38 = vld [vmem:[#allocation8 + $0x20] sm:$0xff]  ;;  %v2827_v40 = vld [vmem:[#allocation8 + $0x10] sm:$0xff] }
 0xabc   :  { %v780_v42 = vmul.f32 0.5, %v779_v41  ;;  %v2830_v41 = vld [vmem:[#allocation8 + $0x18] sm:$0xff] }
 0xabe   :  { %2029 = vtanh.f32 %v780_v42  ;;  %v2833_v42 = vld [vmem:[#allocation8] sm:$0xff] }
 0xac4   :  { %v2030_v43 = vpop.eup %2029 }
 0xac5   :  { %v782_v46 = vadd.f32 1.0, %v2030_v43  ;;  %v2836_v43 = vld [vmem:[#allocation8 + $0x8] sm:$0xff] }
 0xac7   :  { %v783_v47 = vmul.f32 0.5, %v782_v46 }
 0xac9   :  { %v784_v50 = vmul.f32 %v783_v47, %v777_v48  ;;  %v787_v53 = vsub.f32 1.0, %v783_v47  ;;  %v793_v55 = vmul.f32 %v783_v47, %v731_v30  ;;  %v2806_v30 = vld [vmem:[#allocation8 + $0x58] sm:$0xff] }
 0xacb   :  { %v785_v51 = vadd.f32 %v784_v50, %v226_v49 }
 0xacd   :  { %2031 = vtanh.f32 %v785_v51 }
 0xad3   :  { %v2032_v52 = vpop.eup %2031 }
 0xad4   :  { %789 = vrot.lane.b32.xlu2 %v2032_v52, %s2330_s3 }
 0xb2e   :  { %v790_v54 = vpop.permute.xlu2 %789 }
 0xb2f   :  { %v792_v56 = vmul.f32 %v790_v54, %v787_v53 }
 0xb31   :  { %v794_v57 = vadd.f32 %v793_v55, %v792_v56 }
 0xb33   :  { %795 = vst.msk [vmem:[#allocation2 + $0x18] sm:$0xff] %vm419_vm1, %v794_v57  ;;  %797 = vrot.lane.b32.xlu0 %v794_v57, %s2330_s3 }
 0xba5   :  { %v798_v59 = vpop.permute.xlu0 %797 }
 0xba6   :  { %1936 = vmatmul.msk.f32.vlgmr.msra.gmra.mxu0 %vm296_vm0, %v798_v59  ;;  %1937 = vmatmul.msk.f32.vlgmr.msra.gmra.mxu1 %vm296_vm0, %v798_v59 }
 0xba7   :  { %1059 = vmatpush.msra.mxu0 %v2418_v1  ;;  %1079 = vmatpush.msra.mxu1 %v2426_v4  ;;  %v229_v1 = vpop.permute.xlu1 %228 }
 0xba9   :  { %1060 = vmatpush.msra.mxu0 %v2420_v2  ;;  %1080 = vmatpush.msra.mxu1 %v2430_v5  ;;  %v231_v2 = vmul.f32 %v229_v1, %v2535_v20 }
 0xbab   :  { %1061 = vmatpush.msra.mxu0 %v2424_v3  ;;  %1081 = vmatpush.msra.mxu1 %v2434_v7  ;;  %v233_v3 = vadd.f32 %v231_v2, %v2540_v24 }
 0xbad   :  { %1062 = vmatpush.msra.mxu0 %v2432_v6  ;;  %1082 = vmatpush.msra.mxu1 %v2444_v10  ;;  %v232_v10 = vmul.f32 %v229_v1, %v2547_v32 }
 0xbaf   :  { %1063 = vmatpush.msra.mxu0 %v2442_v9  ;;  %1083 = vmatpush.msra.mxu1 %v2452_v12  ;;  %v237_v44 = vpop.permute.xlu1 %236 }
 0xbb0   :  { %v239_v45 = vmul.f32 %v237_v44, %v2535_v20  ;;  %v240_v53 = vmul.f32 %v237_v44, %v2547_v32 }
 0xbb1   :  { %1064 = vmatpush.msra.mxu0 %v2450_v11  ;;  %1084 = vmatpush.msra.mxu1 %v2460_v14  ;;  %v234_v14 = vadd.f32 %v232_v10, %v2551_v36 }
 0xbb2   :  { %v241_v46 = vadd.f32 %v239_v45, %v2540_v24 }
 0xbb3   :  { %1065 = vmatpush.msra.mxu0 %v2458_v13  ;;  %1085 = vmatpush.msra.mxu1 %v2468_v16 }
 0xbb5   :  { %1066 = vmatpush.msra.mxu0 %v2466_v15  ;;  %1086 = vmatpush.msra.mxu1 %v2474_v17 }
 0xc23   :  { %v818_v4 = vpop.f32.mrf.mxu0  ;;  %v838_v9 = vpop.f32.mrf.mxu1 }
 0xc24   :  { %v819_v5 = vadd.f32 %v818_v4, %v2543_v26  ;;  %v839_v13 = vadd.f32 %v838_v9, %v2549_v33 }
 0xc26   :  { %v841_v6 = vadd.f32 %v819_v5, %v233_v3 }
 0xc28   :  { %v842_v7 = vmul.f32 0.5, %v841_v6 }
 0xc2a   :  { %2033 = vtanh.f32 %v842_v7  ;;  %v2340_v7 = vmov 10  }
 0xc2b   :  { %1993 = vset.pattern.permute.xlu1 %v2340_v7 }
 0xc2c   :  { %244 = vperm.xlu1 %1993, %v2785_v21  }
 0xc30   :  { %v2034_v8 = vpop.eup %2033 }
 0xc31   :  { %v844_v11 = vadd.f32 1.0, %v2034_v8 }
 0xc33   :  { %v845_v12 = vmul.f32 0.5, %v844_v11 }
 0xc35   :  { %v846_v15 = vmul.f32 %v845_v12, %v839_v13  ;;  %v849_v60 = vsub.f32 1.0, %v845_v12  ;;  %v855_v62 = vmul.f32 %v845_v12, %v794_v57  ;;  %v242_v57 = vadd.f32 %v240_v53, %v2551_v36 }
 0xc37   :  { %v847_v16 = vadd.f32 %v846_v15, %v234_v14 }
 0xc39   :  { %2035 = vtanh.f32 %v847_v16 }
 0xc3f   :  { %v2036_v17 = vpop.eup %2035 }
 0xc40   :  { %851 = vrot.lane.b32.xlu2 %v2036_v17, %s2330_s3 }
 0xc9a   :  { %v852_v61 = vpop.permute.xlu2 %851 }
 0xc9b   :  { %v854_v63 = vmul.f32 %v852_v61, %v849_v60 }
 0xc9d   :  { %v2781_v0 = vadd.f32 %v855_v62, %v854_v63 }
 0xc9e   :  { %v245_v9 = vpop.permute.xlu1 %244 }
 0xc9f   :  { %858 = vrot.lane.b32.xlu0 %v2781_v0, %s2330_s3  ;;  %v247_v10 = vmul.f32 %v245_v9, %v2535_v20  ;;  %v248_v60 = vmul.f32 %v245_v9, %v2547_v32 }
 0xca1   :  { %v249_v11 = vadd.f32 %v247_v10, %v2540_v24 }
 0xd11   :  { %v859_v22 = vpop.permute.xlu0 %858 }
 0xd12   :  { %861 = vst.msk [vmem:[#allocation2 + $0x20] sm:$0xff] %vm296_vm0, %v859_v22  ;;  %1938 = vmatmul.msk.f32.vlgmr.msra.gmra.mxu2 %vm296_vm0, %v859_v22  ;;  %1939 = vmatmul.msk.f32.vlgmr.msra.gmra.mxu3 %vm296_vm0, %v859_v22 }
 0xd13   :  { %1122 = vmatpush.msra.mxu2 %v2791_v23  ;;  %1142 = vmatpush.msra.mxu3 %v2794_v25 }
 0xd15   :  { %1123 = vmatpush.msra.mxu2 %v2797_v27  ;;  %1143 = vmatpush.msra.mxu3 %v2800_v28 }
 0xd17   :  { %1124 = vmatpush.msra.mxu2 %v2803_v29  ;;  %1144 = vmatpush.msra.mxu3 %v2806_v30 }
 0xd19   :  { %1125 = vmatpush.msra.mxu2 %v2809_v31  ;;  %1145 = vmatpush.msra.mxu3 %v2812_v34 }
 0xd1b   :  { %1126 = vmatpush.msra.mxu2 %v2815_v35  ;;  %1146 = vmatpush.msra.mxu3 %v2818_v37 }
 0xd1d   :  { %1127 = vmatpush.msra.mxu2 %v2821_v38  ;;  %1147 = vmatpush.msra.mxu3 %v2824_v39 }
 0xd1f   :  { %1128 = vmatpush.msra.mxu2 %v2827_v40  ;;  %1148 = vmatpush.msra.mxu3 %v2830_v41 }
 0xd21   :  { %1129 = vmatpush.msra.mxu2 %v2833_v42  ;;  %1149 = vmatpush.msra.mxu3 %v2836_v43 }
 0xd95   :  { %v881_v47 = vpop.f32.mrf.mxu2  ;;  %v901_v52 = vpop.f32.mrf.mxu3 }
 0xd96   :  { %v882_v48 = vadd.f32 %v881_v47, %v2543_v26  ;;  %v902_v56 = vadd.f32 %v901_v52, %v2549_v33 }
 0xd98   :  { %v904_v49 = vadd.f32 %v882_v48, %v241_v46 }
 0xd9a   :  { %v905_v50 = vmul.f32 0.5, %v904_v49 }
 0xd9c   :  { %2037 = vtanh.f32 %v905_v50  ;;  %v2341_v50 = vmov 11  }
 0xd9d   :  { %1994 = vset.pattern.permute.xlu1 %v2341_v50 }
 0xd9e   :  { %252 = vperm.xlu1 %1994, %v2785_v21  }
 0xda2   :  { %v2038_v51 = vpop.eup %2037 }
 0xda3   :  { %v907_v54 = vadd.f32 1.0, %v2038_v51 }
 0xda5   :  { %v908_v55 = vmul.f32 0.5, %v907_v54 }
 0xda7   :  { %v909_v58 = vmul.f32 %v908_v55, %v902_v56  ;;  %v912_v2 = vsub.f32 1.0, %v908_v55  ;;  %v918_v4 = vmul.f32 %v908_v55, %v2781_v0  ;;  %v250_v0 = vadd.f32 %v248_v60, %v2551_v36 }
 0xda9   :  { %v910_v59 = vadd.f32 %v909_v58, %v242_v57  ;;  %v2342_v58 = vmov 12  }
 0xdaa   :  { %1995 = vset.pattern.permute.xlu1 %v2342_v58  ;;  %v1634_v58 = vld [vmem:[#allocation14 + $0xc8] sm:$0xff] }
 0xdab   :  { %2039 = vtanh.f32 %v910_v59  ;;  %260 = vperm.xlu1 %1995, %v2785_v21  }
 0xdb1   :  { %v2040_v1 = vpop.eup %2039 }
 0xdb2   :  { %914 = vrot.lane.b32.xlu2 %v2040_v1, %s2330_s3 }
 0xe0c   :  { %v915_v3 = vpop.permute.xlu2 %914 }
 0xe0d   :  { %v917_v5 = vmul.f32 %v915_v3, %v912_v2 }
 0xe0f   :  { %v919_v6 = vadd.f32 %v918_v4, %v917_v5 }
 0xe11   :  { %920 = vst.msk [vmem:[#allocation2 + $0x20] sm:$0xff] %vm419_vm1, %v919_v6  ;;  %922 = vrot.lane.b32.xlu0 %v919_v6, %s2330_s3 }
 0xe83   :  { %v923_v8 = vpop.permute.xlu0 %922 }
 0xe84   :  { %1940 = vmatmul.msk.f32.vlgmr.msrb.gmra.mxu0 %vm296_vm0, %v923_v8  ;;  %1941 = vmatmul.msk.f32.vlgmr.msrb.gmra.mxu1 %vm296_vm0, %v923_v8 }
 0xe85   :  { %1184 = vmatpush.msrb.mxu0 %v2791_v23  ;;  %1204 = vmatpush.msrb.mxu1 %v2794_v25 }
 0xe87   :  { %1185 = vmatpush.msrb.mxu0 %v2797_v27  ;;  %1205 = vmatpush.msrb.mxu1 %v2800_v28 }
 0xe89   :  { %1186 = vmatpush.msrb.mxu0 %v2803_v29  ;;  %1206 = vmatpush.msrb.mxu1 %v2806_v30 }
 0xe8b   :  { %1187 = vmatpush.msrb.mxu0 %v2809_v31  ;;  %1207 = vmatpush.msrb.mxu1 %v2812_v34 }
 0xe8d   :  { %1188 = vmatpush.msrb.mxu0 %v2815_v35  ;;  %1208 = vmatpush.msrb.mxu1 %v2818_v37 }
 0xe8f   :  { %1189 = vmatpush.msrb.mxu0 %v2821_v38  ;;  %1209 = vmatpush.msrb.mxu1 %v2824_v39 }
 0xe91   :  { %1190 = vmatpush.msrb.mxu0 %v2827_v40  ;;  %1210 = vmatpush.msrb.mxu1 %v2830_v41 }
 0xe93   :  { %1191 = vmatpush.msrb.mxu0 %v2833_v42  ;;  %1211 = vmatpush.msrb.mxu1 %v2836_v43 }
 0xf01   :  { %v943_v12 = vpop.f32.mrf.mxu0  ;;  %v963_v17 = vpop.f32.mrf.mxu1 }
 0xf02   :  { %v944_v13 = vadd.f32 %v943_v12, %v2543_v26  ;;  %v964_v63 = vadd.f32 %v963_v17, %v2549_v33 }
 0xf04   :  { %v966_v14 = vadd.f32 %v944_v13, %v249_v11 }
 0xf06   :  { %v967_v15 = vmul.f32 0.5, %v966_v14 }
 0xf08   :  { %2041 = vtanh.f32 %v967_v15 }
 0xf0e   :  { %v2042_v16 = vpop.eup %2041 }
 0xf0f   :  { %v969_v61 = vadd.f32 1.0, %v2042_v16 }
 0xf11   :  { %v970_v62 = vmul.f32 0.5, %v969_v61 }
 0xf13   :  { %v971_v19 = vmul.f32 %v970_v62, %v964_v63  ;;  %v974_v45 = vsub.f32 1.0, %v970_v62  ;;  %v980_v47 = vmul.f32 %v970_v62, %v919_v6 }
 0xf15   :  { %v972_v22 = vadd.f32 %v971_v19, %v250_v0  ;;  %v2343_v19 = vmov 13  }
 0xf16   :  { %1996 = vset.pattern.permute.xlu1 %v2343_v19 }
 0xf17   :  { %2043 = vtanh.f32 %v972_v22  ;;  %268 = vperm.xlu1 %1996, %v2785_v21  }
 0xf1d   :  { %v2044_v44 = vpop.eup %2043 }
 0xf1e   :  { %976 = vrot.lane.b32.xlu2 %v2044_v44, %s2330_s3 }
 0xf78   :  { %v977_v46 = vpop.permute.xlu2 %976 }
 0xf79   :  { %v979_v48 = vmul.f32 %v977_v46, %v974_v45 }
 0xf7b   :  { %v981_v49 = vadd.f32 %v980_v47, %v979_v48 }
 0xf7d   :  { %983 = vrot.lane.b32.xlu0 %v981_v49, %s2330_s3 }
 0xfef   :  { %v984_v51 = vpop.permute.xlu0 %983 }
 0xff0   :  { %986 = vst.msk [vmem:[#allocation2 + $0x28] sm:$0xff] %vm296_vm0, %v984_v51  ;;  %1942 = vmatmul.msk.f32.vlgmr.msrb.gmra.mxu2 %vm296_vm0, %v984_v51  ;;  %1943 = vmatmul.msk.f32.vlgmr.msrb.gmra.mxu3 %vm296_vm0, %v984_v51 }
 0xff1   :  { %1247 = vmatpush.msrb.mxu2 %v2791_v23  ;;  %1267 = vmatpush.msrb.mxu3 %v2794_v25  ;;  %v253_v23 = vpop.permute.xlu1 %252 }
 0xff2   :  { %v255_v25 = vmul.f32 %v253_v23, %v2535_v20 }
 0xff3   :  { %1248 = vmatpush.msrb.mxu2 %v2797_v27  ;;  %1268 = vmatpush.msrb.mxu3 %v2800_v28 }
 0xff4   :  { %v257_v27 = vadd.f32 %v255_v25, %v2540_v24 }
 0xff5   :  { %1249 = vmatpush.msrb.mxu2 %v2803_v29  ;;  %1269 = vmatpush.msrb.mxu3 %v2806_v30 }
 0xff7   :  { %1250 = vmatpush.msrb.mxu2 %v2809_v31  ;;  %1270 = vmatpush.msrb.mxu3 %v2812_v34 }
 0xff9   :  { %1251 = vmatpush.msrb.mxu2 %v2815_v35  ;;  %1271 = vmatpush.msrb.mxu3 %v2818_v37  ;;  %v256_v37 = vmul.f32 %v253_v23, %v2547_v32  ;;  %v261_v1 = vpop.permute.xlu1 %260 }
 0xffa   :  { %v263_v2 = vmul.f32 %v261_v1, %v2535_v20  ;;  %v264_v10 = vmul.f32 %v261_v1, %v2547_v32  ;;  %v1633_v1 = vld [vmem:[#allocation14 + $0xc0] sm:$0xff] }
 0xffb   :  { %1252 = vmatpush.msrb.mxu2 %v2821_v38  ;;  %1272 = vmatpush.msrb.mxu3 %v2824_v39 }
 0xffc   :  { %v265_v3 = vadd.f32 %v263_v2, %v2540_v24  ;;  %v266_v14 = vadd.f32 %v264_v10, %v2551_v36  ;;  %v1304_v2 = vlaneseq  ;;  %v1613_v10 = vld [vmem:[#allocation14 + $0x20] sm:$0xff] }
 0xffd   :  { %1253 = vmatpush.msrb.mxu2 %v2827_v40  ;;  %1273 = vmatpush.msrb.mxu3 %v2830_v41  ;;  %v258_v41 = vadd.f32 %v256_v37, %v2551_v36  ;;  %v1624_v37 = vld [vmem:[#allocation14 + $0x78] sm:$0xff] }
 0xfff   :  { %1254 = vmatpush.msrb.mxu2 %v2833_v42  ;;  %1274 = vmatpush.msrb.mxu3 %v2836_v43 }
0x1001   :  { %v269_v44 = vpop.permute.xlu1 %268 }
0x1002   :  { %v271_v45 = vmul.f32 %v269_v44, %v2535_v20  ;;  %v272_v25 = vmul.f32 %v269_v44, %v2547_v32 }
0x1004   :  { %v273_v46 = vadd.f32 %v271_v45, %v2540_v24  ;;  %v1609_v45 = vld [vmem:[#allocation14] sm:$0xff] }
0x1073   :  { %v1006_v28 = vpop.f32.mrf.mxu2  ;;  %v1026_v35 = vpop.f32.mrf.mxu3 }
0x1074   :  { %v1007_v29 = vadd.f32 %v1006_v28, %v2543_v26  ;;  %v1027_v40 = vadd.f32 %v1026_v35, %v2549_v33 }
0x1076   :  { %v1029_v30 = vadd.f32 %v1007_v29, %v257_v27 }
0x1078   :  { %v1030_v31 = vmul.f32 0.5, %v1029_v30  ;;  %v274_v30 = vadd.f32 %v272_v25, %v2551_v36 }
0x107a   :  { %2045 = vtanh.f32 %v1030_v31 }
0x1080   :  { %v2046_v34 = vpop.eup %2045 }
0x1081   :  { %v1032_v38 = vadd.f32 1.0, %v2046_v34 }
0x1083   :  { %v1033_v39 = vmul.f32 0.5, %v1032_v38  ;;  %v1640_v38 = vld [vmem:[#allocation14 + $0xf8] sm:$0xff] }
0x1085   :  { %v1034_v42 = vmul.f32 %v1033_v39, %v1027_v40  ;;  %v1037_v53 = vsub.f32 1.0, %v1033_v39  ;;  %v1043_v55 = vmul.f32 %v1033_v39, %v981_v49  ;;  %v1623_v39 = vld [vmem:[#allocation14 + $0x70] sm:$0xff] }
0x1086   :  { %v1639_v40 = vld [vmem:[#allocation14 + $0xf0] sm:$0xff] }
0x1087   :  { %v1035_v43 = vadd.f32 %v1034_v42, %v258_v41  ;;  %v1622_v41 = vld [vmem:[#allocation14 + $0x68] sm:$0xff] }
0x1088   :  { %v1638_v42 = vld [vmem:[#allocation14 + $0xe8] sm:$0xff] }
0x1089   :  { %2047 = vtanh.f32 %v1035_v43  ;;  %v1621_v43 = vld [vmem:[#allocation14 + $0x60] sm:$0xff] }
0x108f   :  { %v2048_v52 = vpop.eup %2047 }
0x1090   :  { %1039 = vrot.lane.b32.xlu2 %v2048_v52, %s2330_s3  ;;  %v1637_v52 = vld [vmem:[#allocation14 + $0xe0] sm:$0xff] }
0x10ea   :  { %v1040_v54 = vpop.permute.xlu2 %1039 }
0x10eb   :  { %v1042_v56 = vmul.f32 %v1040_v54, %v1037_v53  ;;  %v1620_v53 = vld [vmem:[#allocation14 + $0x58] sm:$0xff] }
0x10ec   :  { %v1636_v54 = vld [vmem:[#allocation14 + $0xd8] sm:$0xff] }
0x10ed   :  { %v1044_v57 = vadd.f32 %v1043_v55, %v1042_v56  ;;  %v1619_v55 = vld [vmem:[#allocation14 + $0x50] sm:$0xff] }
0x10ee   :  { %v1635_v56 = vld [vmem:[#allocation14 + $0xd0] sm:$0xff] }
0x10ef   :  { %1045 = vst.msk [vmem:[#allocation2 + $0x28] sm:$0xff] %vm419_vm1, %v1044_v57  ;;  %1047 = vrot.lane.b32.xlu0 %v1044_v57, %s2330_s3 }
0x1161   :  { %v1048_v59 = vpop.permute.xlu0 %1047 }
0x1162   :  { %1944 = vmatmul.msk.f32.vlgmr.msra.gmra.mxu0 %vm296_vm0, %v1048_v59  ;;  %1945 = vmatmul.msk.f32.vlgmr.msra.gmra.mxu1 %vm296_vm0, %v1048_v59  ;;  %v1617_v59 = vld [vmem:[#allocation14 + $0x40] sm:$0xff] }
0x1163   :  { %1741 = vmatpush.msra.mxu0 %v1624_v37  ;;  %1761 = vmatpush.msra.mxu1 %v1640_v38 }
0x1165   :  { %1742 = vmatpush.msra.mxu0 %v1623_v39  ;;  %1762 = vmatpush.msra.mxu1 %v1639_v40 }
0x1167   :  { %1743 = vmatpush.msra.mxu0 %v1622_v41  ;;  %1763 = vmatpush.msra.mxu1 %v1638_v42 }
0x1169   :  { %1744 = vmatpush.msra.mxu0 %v1621_v43  ;;  %1764 = vmatpush.msra.mxu1 %v1637_v52 }
0x116b   :  { %1745 = vmatpush.msra.mxu0 %v1620_v53  ;;  %1765 = vmatpush.msra.mxu1 %v1636_v54 }
0x116d   :  { %1746 = vmatpush.msra.mxu0 %v1619_v55  ;;  %1766 = vmatpush.msra.mxu1 %v1635_v56 }
0x116f   :  { %1767 = vmatpush.msra.mxu1 %v1634_v58 }
0x1171   :  { %1768 = vmatpush.msra.mxu1 %v1633_v1 }
0x11df   :  { %v1068_v4 = vpop.f32.mrf.mxu0  ;;  %v1088_v9 = vpop.f32.mrf.mxu1 }
0x11e0   :  { %v1069_v5 = vadd.f32 %v1068_v4, %v2543_v26  ;;  %v1089_v13 = vadd.f32 %v1088_v9, %v2549_v33  ;;  %v1632_v4 = vld [vmem:[#allocation14 + $0xb8] sm:$0xff]  ;;  %v1630_v9 = vld [vmem:[#allocation14 + $0xa8] sm:$0xff] }
0x11e1   :  { %1769 = vmatpush.msra.mxu1 %v1632_v4 }
0x11e2   :  { %v1091_v6 = vadd.f32 %v1069_v5, %v265_v3  ;;  %v1616_v3 = vld [vmem:[#allocation14 + $0x38] sm:$0xff]  ;;  %v1615_v5 = vld [vmem:[#allocation14 + $0x30] sm:$0xff] }
0x11e4   :  { %v1092_v7 = vmul.f32 0.5, %v1091_v6  ;;  %v1631_v6 = vld [vmem:[#allocation14 + $0xb0] sm:$0xff] }
0x11e5   :  { %1770 = vmatpush.msra.mxu1 %v1631_v6 }
0x11e6   :  { %2049 = vtanh.f32 %v1092_v7  ;;  %v1305_v7 = vshrl.u32 %v1304_v2, 7 }
0x11e7   :  { %1771 = vmatpush.msra.mxu1 %v1630_v9 }
0x11e8   :  { %vm1306_vm2 = vcmp.lt.s32.totalorder %v1305_v7, 4 }
0x11ec   :  { %v2050_v8 = vpop.eup %2049 }
0x11ed   :  { %v1094_v11 = vadd.f32 1.0, %v2050_v8  ;;  %v1614_v8 = vld [vmem:[#allocation14 + $0x28] sm:$0xff] }
0x11ef   :  { %v1095_v12 = vmul.f32 0.5, %v1094_v11  ;;  %v1629_v11 = vld [vmem:[#allocation14 + $0xa0] sm:$0xff] }
0x11f0   :  { %1772 = vmatpush.msra.mxu1 %v1629_v11 }
0x11f1   :  { %v1096_v15 = vmul.f32 %v1095_v12, %v1089_v13  ;;  %v1099_v60 = vsub.f32 1.0, %v1095_v12  ;;  %v1105_v62 = vmul.f32 %v1095_v12, %v1044_v57  ;;  %v1618_v57 = vld [vmem:[#allocation14 + $0x48] sm:$0xff]  ;;  %v1612_v12 = vld [vmem:[#allocation14 + $0x18] sm:$0xff] }
0x11f2   :  { %1747 = vmatpush.msra.mxu0 %v1618_v57  ;;  %v1628_v13 = vld [vmem:[#allocation14 + $0x98] sm:$0xff] }
0x11f3   :  { %v1097_v16 = vadd.f32 %v1096_v15, %v266_v14  ;;  %v2934_v14 = vsel %vm1306_vm2, 1.0, %v2329_v18  ;;  %v1611_v15 = vld [vmem:[#allocation14 + $0x10] sm:$0xff]  ;;  %1773 = vmatpush.msra.mxu1 %v1628_v13 }
0x11f4   :  { %1748 = vmatpush.msra.mxu0 %v1617_v59 }
0x11f5   :  { %2051 = vtanh.f32 %v1097_v16  ;;  %v1627_v16 = vld [vmem:[#allocation14 + $0x90] sm:$0xff] }
0x11f6   :  { %1749 = vmatpush.msra.mxu0 %v1616_v3  ;;  %1774 = vmatpush.msra.mxu1 %v1627_v16 }
0x11f8   :  { %1750 = vmatpush.msra.mxu0 %v1615_v5 }
0x11fa   :  { %1751 = vmatpush.msra.mxu0 %v1614_v8 }
0x11fb   :  { %v2052_v17 = vpop.eup %2051 }
0x11fc   :  { %1101 = vrot.lane.b32.xlu2 %v2052_v17, %s2330_s3  ;;  %1752 = vmatpush.msra.mxu0 %v1613_v10  ;;  %v1296_v17 = vld [vmem:[#allocation2] sm:$0xff] }
0x11fe   :  { %1753 = vmatpush.msra.mxu0 %v1612_v12 }
0x1200   :  { %1754 = vmatpush.msra.mxu0 %v1611_v15 }
0x1256   :  { %v1102_v61 = vpop.permute.xlu2 %1101 }
0x1257   :  { %v1104_v63 = vmul.f32 %v1102_v61, %v1099_v60  ;;  %v1297_v60 = vld [vmem:[#allocation2 + $0x8] sm:$0xff] }
0x1259   :  { %v2915_v0 = vadd.f32 %v1105_v62, %v1104_v63  ;;  %v1610_v62 = vld [vmem:[#allocation14 + $0x8] sm:$0xff] }
0x125a   :  { %v1626_v63 = vld [vmem:[#allocation14 + $0x88] sm:$0xff]  ;;  %1755 = vmatpush.msra.mxu0 %v1610_v62 }
0x125b   :  { %1108 = vrot.lane.b32.xlu0 %v2915_v0, %s2330_s3  ;;  %1775 = vmatpush.msra.mxu1 %v1626_v63 }
0x125c   :  { %1756 = vmatpush.msra.mxu0 %v1609_v45 }
0x12cd   :  { %v1109_v22 = vpop.permute.xlu0 %1108 }
0x12ce   :  { %1111 = vst.msk [vmem:[#allocation2 + $0x30] sm:$0xff] %vm296_vm0, %v1109_v22  ;;  %1946 = vmatmul.msk.f32.vlgmr.msra.gmra.mxu2 %vm296_vm0, %v1109_v22  ;;  %1947 = vmatmul.msk.f32.vlgmr.msra.gmra.mxu3 %vm296_vm0, %v1109_v22  ;;  %v1309_v22 = vmul.f32 %v2934_v14, %v1296_v17 }
0x1351   :  { %v1131_v47 = vpop.f32.mrf.mxu2  ;;  %v1151_v23 = vpop.f32.mrf.mxu3 }
0x1352   :  { %v1132_v48 = vadd.f32 %v1131_v47, %v2543_v26  ;;  %v1152_v29 = vadd.f32 %v1151_v23, %v2549_v33  ;;  %v1310_v47 = vmul.f32 %v2934_v14, %v1297_v60 }
0x1354   :  { %v1154_v49 = vadd.f32 %v1132_v48, %v273_v46  ;;  %v1625_v46 = vld [vmem:[#allocation14 + $0x80] sm:$0xff] }
0x1355   :  { %1776 = vmatpush.msra.mxu1 %v1625_v46 }
0x1356   :  { %v1155_v50 = vmul.f32 0.5, %v1154_v49  ;;  %v1317_v49 = vrot.slane %v1309_v22, 4 }
0x1358   :  { %2053 = vtanh.f32 %v1155_v50  ;;  %v1323_v50 = vrot.slane %v1310_v47, 4 }
0x135e   :  { %v2054_v51 = vpop.eup %2053 }
0x135f   :  { %v1157_v27 = vadd.f32 1.0, %v2054_v51  ;;  %v1324_v51 = vadd.f32 %v1323_v50, %v1310_v47 }
0x1361   :  { %v2927_v28 = vmul.f32 0.5, %v1157_v27  ;;  %v1325_v25 = vrot.slane %v1324_v51, 2 }
0x1363   :  { %v1159_v31 = vmul.f32 %v2927_v28, %v1152_v29  ;;  %v1162_v61 = vsub.f32 1.0, %v2927_v28  ;;  %v1168_v44 = vmul.f32 %v2927_v28, %v2915_v0  ;;  %v1318_v0 = vadd.f32 %v1317_v49, %v1309_v22 }
0x1364   :  { %v1326_v28 = vadd.f32 %v1325_v25, %v1324_v51 }
0x1365   :  { %v1160_v34 = vadd.f32 %v1159_v31, %v274_v30  ;;  %v1319_v23 = vrot.slane %v1318_v0, 2  ;;  %v1300_v31 = vld [vmem:[#allocation2 + $0x20] sm:$0xff] }
0x1366   :  { %v1327_v30 = vrot.slane %v1326_v28, 1  ;;  %v1313_v37 = vmul.f32 %v2934_v14, %v1300_v31 }
0x1367   :  { %2055 = vtanh.f32 %v1160_v34  ;;  %v1320_v27 = vadd.f32 %v1319_v23, %v1318_v0  ;;  %v1301_v34 = vld [vmem:[#allocation2 + $0x28] sm:$0xff] }
0x1368   :  { %v1328_v38 = vadd.f32 %v1327_v30, %v1326_v28  ;;  %v1314_v39 = vmul.f32 %v2934_v14, %v1301_v34  ;;  %v1341_v41 = vrot.slane %v1313_v37, 4 }
0x1369   :  { %v1321_v29 = vrot.slane %v1320_v27, 1 }
0x136a   :  { %v1366_v42 = vmul.f32 0.25, %v1328_v38  ;;  %v1347_v43 = vrot.slane %v1314_v39, 4  ;;  %v1342_v53 = vadd.f32 %v1341_v41, %v1313_v37 }
0x136c   :  { %v2951_v54 = vsub.f32 %v1297_v60, %v1366_v42  ;;  %v1348_v55 = vadd.f32 %v1347_v43, %v1314_v39  ;;  %v1343_v57 = vrot.slane %v1342_v53, 2 }
0x136d   :  { %v2056_v35 = vpop.eup %2055 }
0x136e   :  { %1164 = vrot.lane.b32.xlu2 %v2056_v35, %s2330_s3  ;;  %v1322_v35 = vadd.f32 %v1321_v29, %v1320_v27  ;;  %v1382_v58 = vmul.f32 %v2934_v14, %v2951_v54  ;;  %v1349_v59 = vrot.slane %v1348_v55, 2  ;;  %v1344_v2 = vadd.f32 %v1343_v57, %v1342_v53 }
0x1370   :  { %v1365_v40 = vmul.f32 0.25, %v1322_v35  ;;  %v1390_v3 = vmul.f32 %v1382_v58, %v1382_v58  ;;  %v1350_v4 = vadd.f32 %v1349_v59, %v1348_v55  ;;  %v1345_v6 = vrot.slane %v1344_v2, 1 }
0x1372   :  { %v2949_v52 = vsub.f32 %v1296_v17, %v1365_v40  ;;  %v1403_v7 = vrot.slane %v1390_v3, 4  ;;  %v1351_v8 = vrot.slane %v1350_v4, 1  ;;  %v1346_v10 = vadd.f32 %v1345_v6, %v1344_v2 }
0x1373   :  { %v2344_v2 = vmov 14  }
0x1374   :  { %v1381_v56 = vmul.f32 %v2934_v14, %v2949_v52  ;;  %v1404_v11 = vadd.f32 %v1403_v7, %v1390_v3  ;;  %v1352_v12 = vadd.f32 %v1351_v8, %v1350_v4  ;;  %v1369_v15 = vmul.f32 0.25, %v1346_v10  ;;  %1997 = vset.pattern.permute.xlu1 %v2344_v2  ;;  %v2972_v10 = vld [vmem:[#allocation11] sm:$0xff] }
0x1375   :  { %276 = vperm.xlu1 %1997, %v2785_v21  }
0x1376   :  { %v1389_v1 = vmul.f32 %v1381_v56, %v1381_v56  ;;  %v1405_v16 = vrot.slane %v1404_v11, 2  ;;  %v1370_v17 = vmul.f32 0.25, %v1352_v12 }
0x1378   :  { %v1397_v5 = vrot.slane %v1389_v1, 4  ;;  %v1406_v62 = vadd.f32 %v1405_v16, %v1404_v11  ;;  %v2959_v63 = vsub.f32 %v1301_v34, %v1370_v17  ;;  %v2980_v16 = vld [vmem:[#allocation12] sm:$0xff] }
0x137a   :  { %v1398_v9 = vadd.f32 %v1397_v5, %v1389_v1 }
0x137c   :  { %v1399_v13 = vrot.slane %v1398_v9, 2 }
0x137e   :  { %v1400_v60 = vadd.f32 %v1399_v13, %v1398_v9 }
0x13c8   :  { %v1165_v19 = vpop.permute.xlu2 %1164 }
0x13c9   :  { %v1167_v18 = vmul.f32 %v1165_v19, %v1162_v61  ;;  %v2957_v61 = vsub.f32 %v1300_v31, %v1369_v15  ;;  %v1401_v19 = vrot.slane %v1400_v60, 1  ;;  %v1551_v15 = vperm.slane %v2972_v10, 0 }
0x13cb   :  { %v2941_v48 = vadd.f32 %v1168_v44, %v1167_v18  ;;  %v1385_v22 = vmul.f32 %v2934_v14, %v2957_v61  ;;  %v1407_v44 = vrot.slane %v1406_v62, 1  ;;  %v1386_v18 = vmul.f32 %v2934_v14, %v2959_v63 }
0x13cc   :  { %v1402_v45 = vadd.f32 %v1401_v19, %v1400_v60  ;;  %v1552_v60 = vperm.slane %v2972_v10, 1 }
0x13cd   :  { %1170 = vst.msk [vmem:[#allocation2 + $0x30] sm:$0xff] %vm419_vm1, %v2941_v48  ;;  %1172 = vrot.lane.b32.xlu0 %v2941_v48, %s2330_s3  ;;  %v1393_v46 = vmul.f32 %v1385_v22, %v1385_v22  ;;  %v1408_v47 = vadd.f32 %v1407_v44, %v1406_v62  ;;  %v1394_v49 = vmul.f32 %v1386_v18, %v1386_v18  ;;  %v1577_v44 = vperm.slane %v2980_v16, 0 }
0x13ce   :  { %v1445_v50 = vmul.f32 0.25, %v1402_v45 }
0x13cf   :  { %v1421_v0 = vrot.slane %v1393_v46, 4  ;;  %v1446_v51 = vmul.f32 0.25, %v1408_v47  ;;  %v1427_v23 = vrot.slane %v1394_v49, 4 }
0x13d0   :  { %v1453_v25 = vadd.f32 1e-05, %v1445_v50  ;;  %v1688_v50 = vld [vmem:[#allocation14 + $0x278] sm:$0xff] }
0x13d1   :  { %v1422_v27 = vadd.f32 %v1421_v0, %v1393_v46  ;;  %v1454_v28 = vadd.f32 1e-05, %v1446_v51  ;;  %v1428_v29 = vadd.f32 %v1427_v23, %v1394_v49  ;;  %v1704_v0 = vld [vmem:[#allocation14 + $0x2f8] sm:$0xff] }
0x13d2   :  { %2057 = vrsqrt.f32 %v1453_v25  ;;  %vm1467_vm5 = vweird.f32 %v1453_v25 }
0x13d3   :  { %v1423_v30 = vrot.slane %v1422_v27, 2  ;;  %2059 = vrsqrt.f32 %v1454_v28  ;;  %v1429_v31 = vrot.slane %v1428_v29, 2  ;;  %vm1477_vm7 = vweird.f32 %v1454_v28 }
0x13d5   :  { %v1424_v34 = vadd.f32 %v1423_v30, %v1422_v27  ;;  %v1430_v35 = vadd.f32 %v1429_v31, %v1428_v29  ;;  %v1703_v27 = vld [vmem:[#allocation14 + $0x2f0] sm:$0xff]  ;;  %v1686_v29 = vld [vmem:[#allocation14 + $0x268] sm:$0xff] }
0x13d6   :  { %v1702_v30 = vld [vmem:[#allocation14 + $0x2e8] sm:$0xff] }
0x13d7   :  { %v1425_v39 = vrot.slane %v1424_v34, 1  ;;  %v1431_v41 = vrot.slane %v1430_v35, 1 }
0x13d8   :  { %v2058_v37 = vpop.eup %2057 }
0x13d9   :  { %v2060_v38 = vpop.eup %2059  ;;  %v1462_v40 = vmul.f32 %v2058_v37, %v1453_v25  ;;  %v1426_v43 = vadd.f32 %v1425_v39, %v1424_v34  ;;  %v1432_v55 = vadd.f32 %v1431_v41, %v1430_v35  ;;  %vm1468_vm3 = vweird.f32 %v2058_v37  ;;  %v1687_v25 = vld [vmem:[#allocation14 + $0x270] sm:$0xff]  ;;  %v1685_v34 = vld [vmem:[#allocation14 + $0x260] sm:$0xff]  ;;  %v1684_v39 = vld [vmem:[#allocation14 + $0x258] sm:$0xff] }
0x13da   :  { %v1472_v42 = vmul.f32 %v2060_v38, %v1454_v28  ;;  %vm1478_vm4 = vweird.f32 %v2060_v38  ;;  %vm1469_vm6 = vmor %vm1467_vm5, %vm1468_vm3  ;;  %v1701_v35 = vld [vmem:[#allocation14 + $0x2e0] sm:$0xff] }
0x13db   :  { %v1463_v53 = vmul.f32 %v2058_v37, %v1462_v40  ;;  %v1449_v57 = vmul.f32 0.25, %v1426_v43  ;;  %v1450_v59 = vmul.f32 0.25, %v1432_v55  ;;  %vm1479_vm8 = vmor %vm1477_vm7, %vm1478_vm4  ;;  %v1700_v40 = vld [vmem:[#allocation14 + $0x2d8] sm:$0xff]  ;;  %v1683_v43 = vld [vmem:[#allocation14 + $0x250] sm:$0xff] }
0x13dc   :  { %v1473_v56 = vmul.f32 %v2060_v38, %v1472_v42 }
0x13dd   :  { %v1464_v58 = vmul.f32 0.5, %v1463_v53  ;;  %v2965_v3 = vadd.f32 1e-05, %v1449_v57  ;;  %v2968_v5 = vadd.f32 1e-05, %v1450_v59  ;;  %v1699_v53 = vld [vmem:[#allocation14 + $0x2d0] sm:$0xff] }
0x13de   :  { %v1474_v1 = vmul.f32 0.5, %v1473_v56  ;;  %v1682_v56 = vld [vmem:[#allocation14 + $0x248] sm:$0xff]  ;;  %v1681_v59 = vld [vmem:[#allocation14 + $0x240] sm:$0xff] }
0x13df   :  { %v1465_v4 = vsub.f32 1.5, %v1464_v58  ;;  %2061 = vrsqrt.f32 %v2965_v3  ;;  %vm1507_vm11 = vweird.f32 %v2965_v3  ;;  %vm1517_vm13 = vweird.f32 %v2968_v5  ;;  %v1698_v57 = vld [vmem:[#allocation14 + $0x2c8] sm:$0xff] }
0x13e0   :  { %v1475_v6 = vsub.f32 1.5, %v1474_v1  ;;  %2063 = vrsqrt.f32 %v2968_v5  ;;  %v1697_v1 = vld [vmem:[#allocation14 + $0x2c0] sm:$0xff] }
0x13e1   :  { %v1466_v7 = vmul.f32 %v2058_v37, %v1465_v4 }
0x13e2   :  { %v1476_v8 = vmul.f32 %v2060_v38, %v1475_v6  ;;  %v1680_v6 = vld [vmem:[#allocation14 + $0x238] sm:$0xff] }
0x13e3   :  { %v1470_v9 = vsel %vm1469_vm6, %v2058_v37, %v1466_v7  ;;  %v1696_v7 = vld [vmem:[#allocation14 + $0x2b8] sm:$0xff] }
0x13e4   :  { %v1480_v21 = vsel %vm1479_vm8, %v2060_v38, %v1476_v8  ;;  %v1541_v13 = vmul.f32 %v1470_v9, %v2949_v52  ;;  %v1578_v52 = vperm.slane %v2980_v16, 1  ;;  %v1679_v8 = vld [vmem:[#allocation14 + $0x230] sm:$0xff] }
0x13e5   :  { %v2974_v11 = vpop.eup %2061  ;;  %v1542_v17 = vmul.f32 %v1480_v21, %v2951_v54  ;;  %v1695_v9 = vld [vmem:[#allocation14 + $0x2b0] sm:$0xff]  ;;  %v1581_v21 = vperm.slane %v2980_v16, 4 }
0x13e6   :  { %v2976_v12 = vpop.eup %2063  ;;  %v1502_v62 = vmul.f32 %v2974_v11, %v2965_v3  ;;  %v1567_v22 = vmul.f32 %v1551_v15, %v1541_v13  ;;  %vm1508_vm9 = vweird.f32 %v2974_v11  ;;  %v1555_v3 = vperm.slane %v2972_v10, 4  ;;  %v1678_v13 = vld [vmem:[#allocation14 + $0x228] sm:$0xff] }
0x13e7   :  { %v1512_v19 = vmul.f32 %v2976_v12, %v2968_v5  ;;  %v1568_v18 = vmul.f32 %v1552_v60, %v1542_v17  ;;  %vm1518_vm10 = vweird.f32 %v2976_v12  ;;  %vm1509_vm12 = vmor %vm1507_vm11, %vm1508_vm9  ;;  %v1556_v5 = vperm.slane %v2972_v10, 5  ;;  %v1694_v15 = vld [vmem:[#allocation14 + $0x2a8] sm:$0xff]  ;;  %v1693_v17 = vld [vmem:[#allocation14 + $0x2a0] sm:$0xff] }
0x13e8   :  { %v1503_v45 = vmul.f32 %v2974_v11, %v1502_v62  ;;  %v1593_v47 = vadd.f32 %v1577_v44, %v1567_v22  ;;  %vm1519_vm14 = vmor %vm1517_vm13, %vm1518_vm10  ;;  %v1692_v22 = vld [vmem:[#allocation14 + $0x298] sm:$0xff]  ;;  %v1675_v44 = vld [vmem:[#allocation14 + $0x210] sm:$0xff] }
0x13e9   :  { %v1513_v46 = vmul.f32 %v2976_v12, %v1512_v19  ;;  %v1594_v54 = vadd.f32 %v1578_v52, %v1568_v18  ;;  %v1676_v19 = vld [vmem:[#allocation14 + $0x218] sm:$0xff]  ;;  %v1691_v18 = vld [vmem:[#allocation14 + $0x290] sm:$0xff]  ;;  %v1674_v52 = vld [vmem:[#allocation14 + $0x208] sm:$0xff] }
0x13ea   :  { %v1504_v49 = vmul.f32 0.5, %v1503_v45  ;;  %2065 = vtanh.f32 %v1593_v47  ;;  %v1690_v45 = vld [vmem:[#allocation14 + $0x288] sm:$0xff]  ;;  %v1689_v47 = vld [vmem:[#allocation14 + $0x280] sm:$0xff] }
0x13eb   :  { %v1514_v51 = vmul.f32 0.5, %v1513_v46  ;;  %2067 = vtanh.f32 %v1594_v54  ;;  %v1673_v46 = vld [vmem:[#allocation14 + $0x200] sm:$0xff] }
0x13ec   :  { %v1505_v28 = vsub.f32 1.5, %v1504_v49 }
0x13ed   :  { %v1515_v31 = vsub.f32 1.5, %v1514_v51 }
0x13ee   :  { %v1506_v37 = vmul.f32 %v2974_v11, %v1505_v28 }
0x13ef   :  { %v1516_v41 = vmul.f32 %v2976_v12, %v1515_v31 }
0x13f0   :  { %v2066_v38 = vpop.eup %2065  ;;  %v1510_v55 = vsel %vm1509_vm12, %v2974_v11, %v1506_v37 }
0x13f1   :  { %v2068_v42 = vpop.eup %2067  ;;  %v1520_v58 = vsel %vm1519_vm14, %v2976_v12, %v1516_v41  ;;  %v1545_v2 = vmul.f32 %v1510_v55, %v2957_v61  ;;  %v1582_v12 = vperm.slane %v2980_v16, 5  ;;  %v1654_v55 = vld [vmem:[#allocation14 + $0x168] sm:$0xff] }
0x13f2   :  { %v1546_v4 = vmul.f32 %v1520_v58, %v2959_v63  ;;  %v1677_v63 = vld [vmem:[#allocation14 + $0x220] sm:$0xff] }
0x13f3   :  { %v1571_v11 = vmul.f32 %v1555_v3, %v1545_v2  ;;  %v1653_v58 = vld [vmem:[#allocation14 + $0x160] sm:$0xff]  ;;  %v1668_v2 = vld [vmem:[#allocation14 + $0x1d8] sm:$0xff]  ;;  %v1651_v3 = vld [vmem:[#allocation14 + $0x150] sm:$0xff] }
0x13f4   :  { %v1572_v61 = vmul.f32 %v1556_v5, %v1546_v4  ;;  %v1667_v4 = vld [vmem:[#allocation14 + $0x1d0] sm:$0xff]  ;;  %v1650_v5 = vld [vmem:[#allocation14 + $0x148] sm:$0xff] }
0x13f5   :  { %v1597_v60 = vadd.f32 %v1581_v21, %v1571_v11  ;;  %v1664_v11 = vld [vmem:[#allocation14 + $0x1b8] sm:$0xff]  ;;  %v1647_v21 = vld [vmem:[#allocation14 + $0x130] sm:$0xff] }
0x13f6   :  { %v1598_v62 = vadd.f32 %v1582_v12, %v1572_v61  ;;  %v1663_v61 = vld [vmem:[#allocation14 + $0x1b0] sm:$0xff]  ;;  %v1646_v12 = vld [vmem:[#allocation14 + $0x128] sm:$0xff] }
0x13f7   :  { %2069 = vtanh.f32 %v1597_v60  ;;  %v1643_v60 = vld [vmem:[#allocation14 + $0x110] sm:$0xff] }
0x13f8   :  { %2071 = vtanh.f32 %v1598_v62  ;;  %v1298_v62 = vld [vmem:[#allocation2 + $0x10] sm:$0xff] }
0x13fd   :  { %v2070_v54 = vpop.eup %2069 }
0x13fe   :  { %v2072_v49 = vpop.eup %2071 }
0x143f   :  { %v1173_v23 = vpop.permute.xlu0 %1172 }
0x1440   :  { %1948 = vmatmul.msk.f32.vlgmr.msrb.gmra.mxu0 %vm296_vm0, %v1173_v23  ;;  %1949 = vmatmul.msk.f32.vlgmr.msrb.gmra.mxu1 %vm296_vm0, %v1173_v23 }
0x1441   :  { %1821 = vmatpush.msrb.mxu0 %v1688_v50  ;;  %1841 = vmatpush.msrb.mxu1 %v1704_v0  ;;  %v277_v50 = vpop.permute.xlu1 %276 }
0x1442   :  { %v279_v0 = vmul.f32 %v277_v50, %v2535_v20  ;;  %v280_v31 = vmul.f32 %v277_v50, %v2547_v32 }
0x1443   :  { %1822 = vmatpush.msrb.mxu0 %v1687_v25  ;;  %1842 = vmatpush.msrb.mxu1 %v1703_v27 }
0x1444   :  { %v281_v51 = vadd.f32 %v279_v0, %v2540_v24 }
0x1445   :  { %1823 = vmatpush.msrb.mxu0 %v1686_v29  ;;  %1843 = vmatpush.msrb.mxu1 %v1702_v30 }
0x1447   :  { %1824 = vmatpush.msrb.mxu0 %v1685_v34  ;;  %1844 = vmatpush.msrb.mxu1 %v1701_v35 }
0x1448   :  { %1757 = vmatmul.f32.vlgmr.msra.gmra.mxu0 %v2066_v38  ;;  %1777 = vmatmul.f32.vlgmr.msra.gmra.mxu1 %v2068_v42  ;;  %v282_v38 = vadd.f32 %v280_v31, %v2551_v36  ;;  %v1656_v42 = vld [vmem:[#allocation14 + $0x178] sm:$0xff] }
0x1449   :  { %1825 = vmatpush.msrb.mxu0 %v1684_v39  ;;  %1845 = vmatpush.msrb.mxu1 %v1700_v40  ;;  %v1302_v31 = vld [vmem:[#allocation2 + $0x30] sm:$0xff] }
0x144a   :  { %1781 = vmatpush.msra.mxu2 %v1656_v42 }
0x144b   :  { %1826 = vmatpush.msrb.mxu0 %v1683_v43  ;;  %1846 = vmatpush.msrb.mxu1 %v1699_v53  ;;  %v1655_v43 = vld [vmem:[#allocation14 + $0x170] sm:$0xff]  ;;  %v1672_v53 = vld [vmem:[#allocation14 + $0x1f8] sm:$0xff] }
0x144c   :  { %1801 = vmatpush.msra.mxu3 %v1672_v53  ;;  %1782 = vmatpush.msra.mxu2 %v1655_v43 }
0x144d   :  { %1827 = vmatpush.msrb.mxu0 %v1682_v56  ;;  %1847 = vmatpush.msrb.mxu1 %v1698_v57  ;;  %v1671_v56 = vld [vmem:[#allocation14 + $0x1f0] sm:$0xff]  ;;  %v1670_v57 = vld [vmem:[#allocation14 + $0x1e8] sm:$0xff] }
0x144e   :  { %1802 = vmatpush.msra.mxu3 %v1671_v56  ;;  %1783 = vmatpush.msra.mxu2 %v1654_v55 }
0x144f   :  { %1828 = vmatpush.msrb.mxu0 %v1681_v59  ;;  %1848 = vmatpush.msrb.mxu1 %v1697_v1  ;;  %v1669_v59 = vld [vmem:[#allocation14 + $0x1e0] sm:$0xff]  ;;  %v1652_v1 = vld [vmem:[#allocation14 + $0x158] sm:$0xff] }
0x1450   :  { %1803 = vmatpush.msra.mxu3 %v1670_v57  ;;  %1784 = vmatpush.msra.mxu2 %v1653_v58 }
0x1451   :  { %1829 = vmatpush.msrb.mxu0 %v1680_v6  ;;  %1849 = vmatpush.msrb.mxu1 %v1696_v7  ;;  %v1666_v6 = vld [vmem:[#allocation14 + $0x1c8] sm:$0xff]  ;;  %v1649_v7 = vld [vmem:[#allocation14 + $0x140] sm:$0xff] }
0x1452   :  { %1804 = vmatpush.msra.mxu3 %v1669_v59  ;;  %1785 = vmatpush.msra.mxu2 %v1652_v1 }
0x1453   :  { %1830 = vmatpush.msrb.mxu0 %v1679_v8  ;;  %1850 = vmatpush.msrb.mxu1 %v1695_v9  ;;  %v1665_v8 = vld [vmem:[#allocation14 + $0x1c0] sm:$0xff]  ;;  %v1648_v9 = vld [vmem:[#allocation14 + $0x138] sm:$0xff] }
0x1454   :  { %1805 = vmatpush.msra.mxu3 %v1668_v2  ;;  %1786 = vmatpush.msra.mxu2 %v1651_v3 }
0x1455   :  { %1831 = vmatpush.msrb.mxu0 %v1678_v13  ;;  %1851 = vmatpush.msrb.mxu1 %v1694_v15  ;;  %v1662_v13 = vld [vmem:[#allocation14 + $0x1a8] sm:$0xff]  ;;  %v1645_v15 = vld [vmem:[#allocation14 + $0x120] sm:$0xff] }
0x1456   :  { %1806 = vmatpush.msra.mxu3 %v1667_v4  ;;  %1787 = vmatpush.msra.mxu2 %v1650_v5 }
0x1457   :  { %1832 = vmatpush.msrb.mxu0 %v1677_v63  ;;  %1852 = vmatpush.msrb.mxu1 %v1693_v17  ;;  %v1661_v63 = vld [vmem:[#allocation14 + $0x1a0] sm:$0xff]  ;;  %v1644_v17 = vld [vmem:[#allocation14 + $0x118] sm:$0xff] }
0x1458   :  { %1807 = vmatpush.msra.mxu3 %v1666_v6  ;;  %1788 = vmatpush.msra.mxu2 %v1649_v7 }
0x1459   :  { %1833 = vmatpush.msrb.mxu0 %v1676_v19  ;;  %1853 = vmatpush.msrb.mxu1 %v1692_v22  ;;  %v1299_v19 = vld [vmem:[#allocation2 + $0x18] sm:$0xff] }
0x145a   :  { %1808 = vmatpush.msra.mxu3 %v1665_v8  ;;  %1789 = vmatpush.msra.mxu2 %v1648_v9 }
0x145b   :  { %1834 = vmatpush.msrb.mxu0 %v1675_v44  ;;  %1854 = vmatpush.msrb.mxu1 %v1691_v18  ;;  %v1642_v44 = vld [vmem:[#allocation14 + $0x108] sm:$0xff] }
0x145c   :  { %1809 = vmatpush.msra.mxu3 %v1664_v11  ;;  %1790 = vmatpush.msra.mxu2 %v1647_v21 }
0x145d   :  { %1835 = vmatpush.msrb.mxu0 %v1674_v52  ;;  %1855 = vmatpush.msrb.mxu1 %v1690_v45  ;;  %v1311_v52 = vmul.f32 %v2934_v14, %v1298_v62 }
0x145e   :  { %1810 = vmatpush.msra.mxu3 %v1663_v61  ;;  %1791 = vmatpush.msra.mxu2 %v1646_v12 }
0x145f   :  { %1836 = vmatpush.msrb.mxu0 %v1673_v46  ;;  %1856 = vmatpush.msrb.mxu1 %v1689_v47  ;;  %v1641_v47 = vld [vmem:[#allocation14 + $0x100] sm:$0xff]  ;;  %v1329_v50 = vrot.slane %v1311_v52, 4 }
0x1460   :  { %1837 = vmatmul.f32.vlgmr.msrb.gmra.mxu0 %v2070_v54  ;;  %1857 = vmatmul.f32.vlgmr.msrb.gmra.mxu1 %v2072_v49  ;;  %v1312_v54 = vmul.f32 %v2934_v14, %v1299_v19 }
0x1461   :  { %1811 = vmatpush.msra.mxu3 %v1662_v13  ;;  %1792 = vmatpush.msra.mxu2 %v1645_v15 }
0x1462   :  { %v1335_v0 = vrot.slane %v1312_v54, 4 }
0x1463   :  { %1812 = vmatpush.msra.mxu3 %v1661_v63  ;;  %1793 = vmatpush.msra.mxu2 %v1644_v17 }
0x1465   :  { %1794 = vmatpush.msra.mxu2 %v1643_v60 }
0x1467   :  { %1795 = vmatpush.msra.mxu2 %v1642_v44 }
0x1469   :  { %1796 = vmatpush.msra.mxu2 %v1641_v47 }
0x14bd   :  { %v1193_v23 = vpop.f32.mrf.mxu0  ;;  %v1213_v30 = vpop.f32.mrf.mxu1 }
0x14be   :  { %v1194_v25 = vadd.f32 %v1193_v23, %v2543_v26  ;;  %v1214_v37 = vadd.f32 %v1213_v30, %v2549_v33  ;;  %v1336_v23 = vadd.f32 %v1335_v0, %v1312_v54 }
0x14c0   :  { %v1216_v27 = vadd.f32 %v1194_v25, %v281_v51  ;;  %v1330_v51 = vadd.f32 %v1329_v50, %v1311_v52 }
0x14c2   :  { %v1217_v28 = vmul.f32 0.5, %v1216_v27  ;;  %v1331_v25 = vrot.slane %v1330_v51, 2  ;;  %v1337_v27 = vrot.slane %v1336_v23, 2 }
0x14c4   :  { %2073 = vtanh.f32 %v1217_v28  ;;  %v1332_v28 = vadd.f32 %v1331_v25, %v1330_v51 }
0x14ca   :  { %v2074_v29 = vpop.eup %2073 }
0x14cb   :  { %v1219_v34 = vadd.f32 1.0, %v2074_v29  ;;  %v1338_v29 = vadd.f32 %v1337_v27, %v1336_v23  ;;  %v1660_v23 = vld [vmem:[#allocation14 + $0x198] sm:$0xff] }
0x14cc   :  { %1813 = vmatpush.msra.mxu3 %v1660_v23  ;;  %v1710_v23 = vld [vmem:[#allocation14 + $0x328] sm:$0xff] }
0x14cd   :  { %v3012_v35 = vmul.f32 0.5, %v1219_v34  ;;  %v1339_v30 = vrot.slane %v1338_v29, 1 }
0x14cf   :  { %v1221_v39 = vmul.f32 %v3012_v35, %v1214_v37  ;;  %v1224_v22 = vsub.f32 1.0, %v3012_v35  ;;  %v1230_v45 = vmul.f32 %v3012_v35, %v2941_v48  ;;  %v1333_v48 = vrot.slane %v1332_v28, 1 }
0x14d0   :  { %v1340_v35 = vadd.f32 %v1339_v30, %v1338_v29  ;;  %v1315_v37 = vmul.f32 %v2934_v14, %v1302_v31  ;;  %v1659_v29 = vld [vmem:[#allocation14 + $0x190] sm:$0xff] }
0x14d1   :  { %v1222_v40 = vadd.f32 %v1221_v39, %v282_v38  ;;  %v1334_v34 = vadd.f32 %v1333_v48, %v1332_v28  ;;  %1814 = vmatpush.msra.mxu3 %v1659_v29  ;;  %v1658_v48 = vld [vmem:[#allocation14 + $0x188] sm:$0xff]  ;;  %v1707_v29 = vld [vmem:[#allocation14 + $0x310] sm:$0xff] }
0x14d2   :  { %v1368_v39 = vmul.f32 0.25, %v1340_v35  ;;  %v1657_v35 = vld [vmem:[#allocation14 + $0x180] sm:$0xff] }
0x14d3   :  { %2075 = vtanh.f32 %v1222_v40  ;;  %v1367_v38 = vmul.f32 0.25, %v1334_v34  ;;  %v1353_v40 = vrot.slane %v1315_v37, 4  ;;  %1815 = vmatpush.msra.mxu3 %v1658_v48  ;;  %v1705_v48 = vld [vmem:[#allocation14 + $0x300] sm:$0xff] }
0x14d4   :  { %v3030_v42 = vsub.f32 %v1299_v19, %v1368_v39 }
0x14d5   :  { %v1354_v43 = vadd.f32 %v1353_v40, %v1315_v37  ;;  %1816 = vmatpush.msra.mxu3 %v1657_v35 }
0x14d6   :  { %v1384_v55 = vmul.f32 %v2934_v14, %v3030_v42 }
0x14d7   :  { %v1355_v56 = vrot.slane %v1354_v43, 2 }
0x14d8   :  { %v1392_v58 = vmul.f32 %v1384_v55, %v1384_v55  ;;  %v2114_v55 = vld [vmem:[#allocation3] sm:$0xff] }
0x14d9   :  { %v2076_v41 = vpop.eup %2075  ;;  %v1356_v59 = vadd.f32 %v1355_v56, %v1354_v43 }
0x14da   :  { %1226 = vrot.lane.b32.xlu2 %v2076_v41, %s2330_s3  ;;  %v3028_v41 = vsub.f32 %v1298_v62, %v1367_v38  ;;  %v1415_v2 = vrot.slane %v1392_v58, 4 }
0x14db   :  { %v1357_v3 = vrot.slane %v1356_v59, 1 }
0x14dc   :  { %v1383_v53 = vmul.f32 %v2934_v14, %v3028_v41  ;;  %v1416_v5 = vadd.f32 %v1415_v2, %v1392_v58 }
0x14dd   :  { %v1358_v6 = vadd.f32 %v1357_v3, %v1356_v59  ;;  %v1554_v3 = vperm.slane %v2972_v10, 3 }
0x14de   :  { %v1391_v57 = vmul.f32 %v1383_v53, %v1383_v53  ;;  %v1417_v8 = vrot.slane %v1416_v5, 2  ;;  %v2345_v53 = vmov 15  }
0x14df   :  { %v1371_v9 = vmul.f32 0.25, %v1358_v6  ;;  %1998 = vset.pattern.permute.xlu1 %v2345_v53  ;;  %1999 = vset.pattern.permute.xlu0 %v2345_v53  ;;  %v1579_v6 = vperm.slane %v2980_v16, 2 }
0x14e0   :  { %v1409_v1 = vrot.slane %v1391_v57, 4  ;;  %v1418_v21 = vadd.f32 %v1417_v8, %v1416_v5  ;;  %284 = vperm.xlu1 %1998, %v2114_v55   ;;  %v1580_v8 = vperm.slane %v2980_v16, 3 }
0x14e1   :  { %v3036_v61 = vsub.f32 %v1302_v31, %v1371_v9 }
0x14e2   :  { %v1410_v4 = vadd.f32 %v1409_v1, %v1391_v57  ;;  %v1419_v13 = vrot.slane %v1418_v21, 1  ;;  %v1553_v1 = vperm.slane %v2972_v10, 2 }
0x14e3   :  { %v1387_v15 = vmul.f32 %v2934_v14, %v3036_v61 }
0x14e4   :  { %v1411_v7 = vrot.slane %v1410_v4, 2  ;;  %v1420_v17 = vadd.f32 %v1419_v13, %v1418_v21 }
0x14e5   :  { %v1395_v60 = vmul.f32 %v1387_v15, %v1387_v15 }
0x14e6   :  { %v1412_v11 = vadd.f32 %v1411_v7, %v1410_v4  ;;  %v1448_v19 = vmul.f32 0.25, %v1420_v17  ;;  %v1717_v17 = vld [vmem:[#allocation14 + $0x360] sm:$0xff] }
0x14e8   :  { %v1413_v12 = vrot.slane %v1412_v11, 1 }
0x14ea   :  { %v1414_v63 = vadd.f32 %v1413_v12, %v1412_v11  ;;  %v1720_v12 = vld [vmem:[#allocation14 + $0x378] sm:$0xff] }
0x14ec   :  { %v1447_v62 = vmul.f32 0.25, %v1414_v63 }
0x14ee   :  { %v1455_v44 = vadd.f32 1e-05, %v1447_v62  ;;  %v1716_v62 = vld [vmem:[#allocation14 + $0x358] sm:$0xff] }
0x14f0   :  { %2077 = vrsqrt.f32 %v1455_v44  ;;  %vm1487_vm3 = vweird.f32 %v1455_v44 }
0x14f6   :  { %v2078_v47 = vpop.eup %2077 }
0x14f7   :  { %v1482_v50 = vmul.f32 %v2078_v47, %v1455_v44  ;;  %vm1488_vm15 = vweird.f32 %v2078_v47  ;;  %v1715_v44 = vld [vmem:[#allocation14 + $0x350] sm:$0xff] }
0x14f8   :  { %vm1489_vm4 = vmor %vm1487_vm3, %vm1488_vm15 }
0x14f9   :  { %v1483_v25 = vmul.f32 %v2078_v47, %v1482_v50  ;;  %v1711_v50 = vld [vmem:[#allocation14 + $0x330] sm:$0xff] }
0x14fb   :  { %v1484_v30 = vmul.f32 0.5, %v1483_v25  ;;  %v1709_v25 = vld [vmem:[#allocation14 + $0x320] sm:$0xff] }
0x14fd   :  { %v1485_v37 = vsub.f32 1.5, %v1484_v30 }
0x14ff   :  { %v1486_v40 = vmul.f32 %v2078_v47, %v1485_v37 }
0x1501   :  { %v1490_v56 = vsel %vm1489_vm4, %v2078_v47, %v1486_v40  ;;  %v1557_v47 = vperm.slane %v2972_v10, 6 }
0x1502   :  { %v1543_v59 = vmul.f32 %v1490_v56, %v3028_v41  ;;  %v1719_v41 = vld [vmem:[#allocation14 + $0x370] sm:$0xff] }
0x1504   :  { %v1569_v5 = vmul.f32 %v1553_v1, %v1543_v59 }
0x1506   :  { %v1595_v11 = vadd.f32 %v1579_v6, %v1569_v5  ;;  %v1731_v5 = vld [vmem:[#allocation14 + $0x3d0] sm:$0xff]  ;;  %v1728_v6 = vld [vmem:[#allocation14 + $0x3b8] sm:$0xff] }
0x1534   :  { %v1227_v18 = vpop.permute.xlu2 %1226 }
0x1535   :  { %v1229_v46 = vmul.f32 %v1227_v18, %v1224_v22  ;;  %v1433_v22 = vrot.slane %v1395_v60, 4  ;;  %v1456_v18 = vadd.f32 1e-05, %v1448_v19 }
0x1537   :  { %v3023_v49 = vadd.f32 %v1230_v45, %v1229_v46  ;;  %v1434_v52 = vadd.f32 %v1433_v22, %v1395_v60  ;;  %2079 = vrsqrt.f32 %v1456_v18  ;;  %vm1497_vm5 = vweird.f32 %v1456_v18 }
0x1539   :  { %1233 = vrot.lane.b32.xlu0 %v3023_v49, %s2330_s3  ;;  %v1435_v45 = vrot.slane %v1434_v52, 2 }
0x153b   :  { %v1436_v46 = vadd.f32 %v1435_v45, %v1434_v52  ;;  %v1713_v45 = vld [vmem:[#allocation14 + $0x340] sm:$0xff] }
0x153d   :  { %v2080_v54 = vpop.eup %2079  ;;  %v1437_v0 = vrot.slane %v1436_v46, 1 }
0x153e   :  { %v1492_v51 = vmul.f32 %v2080_v54, %v1456_v18  ;;  %vm1498_vm2 = vweird.f32 %v2080_v54  ;;  %v1714_v18 = vld [vmem:[#allocation14 + $0x348] sm:$0xff] }
0x153f   :  { %v1438_v27 = vadd.f32 %v1437_v0, %v1436_v46  ;;  %vm1499_vm6 = vmor %vm1497_vm5, %vm1498_vm2 }
0x1540   :  { %v1493_v28 = vmul.f32 %v2080_v54, %v1492_v51  ;;  %v1583_v51 = vperm.slane %v2980_v16, 6 }
0x1541   :  { %v1451_v31 = vmul.f32 0.25, %v1438_v27 }
0x1542   :  { %v1494_v34 = vmul.f32 0.5, %v1493_v28  ;;  %v1708_v28 = vld [vmem:[#allocation14 + $0x318] sm:$0xff] }
0x1543   :  { %v1459_v38 = vadd.f32 1e-05, %v1451_v31 }
0x1544   :  { %v1495_v39 = vsub.f32 1.5, %v1494_v34 }
0x1545   :  { %2081 = vrsqrt.f32 %v1459_v38  ;;  %vm1527_vm8 = vweird.f32 %v1459_v38 }
0x1546   :  { %v1496_v43 = vmul.f32 %v2080_v54, %v1495_v39  ;;  %2083 = vtanh.f32 %v1595_v11  ;;  %v1724_v11 = vld [vmem:[#allocation14 + $0x398] sm:$0xff] }
0x1548   :  { %v1500_v57 = vsel %vm1499_vm6, %v2080_v54, %v1496_v43  ;;  %v1712_v54 = vld [vmem:[#allocation14 + $0x338] sm:$0xff] }
0x1549   :  { %v1544_v2 = vmul.f32 %v1500_v57, %v3030_v42  ;;  %v1718_v42 = vld [vmem:[#allocation14 + $0x368] sm:$0xff] }
0x154b   :  { %v2082_v58 = vpop.eup %2081  ;;  %v1570_v7 = vmul.f32 %v1554_v3, %v1544_v2  ;;  %v1735_v2 = vld [vmem:[#allocation14 + $0x3f0] sm:$0xff]  ;;  %v1734_v3 = vld [vmem:[#allocation14 + $0x3e8] sm:$0xff] }
0x154c   :  { %v1522_v4 = vmul.f32 %v2082_v58, %v1459_v38  ;;  %v2084_v60 = vpop.eup %2083  ;;  %vm1528_vm7 = vweird.f32 %v2082_v58 }
0x154d   :  { %v1596_v21 = vadd.f32 %v1580_v8, %v1570_v7  ;;  %v1727_v7 = vld [vmem:[#allocation14 + $0x3b0] sm:$0xff]  ;;  %v1726_v8 = vld [vmem:[#allocation14 + $0x3a8] sm:$0xff] }
0x154e   :  { %v1523_v9 = vmul.f32 %v2082_v58, %v1522_v4  ;;  %v1733_v4 = vld [vmem:[#allocation14 + $0x3e0] sm:$0xff] }
0x154f   :  { %2085 = vtanh.f32 %v1596_v21  ;;  %v1723_v21 = vld [vmem:[#allocation14 + $0x390] sm:$0xff] }
0x1550   :  { %v1524_v13 = vmul.f32 0.5, %v1523_v9  ;;  %v1725_v9 = vld [vmem:[#allocation14 + $0x3a0] sm:$0xff] }
0x1552   :  { %v1525_v63 = vsub.f32 1.5, %v1524_v13  ;;  %v285_v31 = vpop.permute.xlu1 %284  ;;  %v1722_v13 = vld [vmem:[#allocation14 + $0x388] sm:$0xff] }
0x1553   :  { %v287_v34 = vmul.f32 %v285_v31, %v2535_v20  ;;  %v288_v55 = vmul.f32 %v285_v31, %v2547_v32  ;;  %v1732_v32 = vld [vmem:[#allocation14 + $0x3d8] sm:$0xff] }
0x1554   :  { %v1526_v19 = vmul.f32 %v2082_v58, %v1525_v63  ;;  %v1721_v63 = vld [vmem:[#allocation14 + $0x380] sm:$0xff] }
0x1555   :  { %v2086_v22 = vpop.eup %2085  ;;  %v289_v35 = vadd.f32 %v287_v34, %v2540_v24  ;;  %v290_v59 = vadd.f32 %v288_v55, %v2551_v36  ;;  %v1729_v36 = vld [vmem:[#allocation14 + $0x3c0] sm:$0xff] }
0x1556   :  { %v2000_v55 = vld [vmem:[%s3079_s8] ss:$0 sm:$0xff] }
0x15ab   :  { %v1234_v15 = vpop.permute.xlu0 %1233 }
0x15ac   :  { %1236 = vst.msk [vmem:[#allocation2 + $0x38] sm:$0xff] %vm296_vm0, %v1234_v15  ;;  %1950 = vmatmul.msk.f32.vlgmr.msrb.gmra.mxu2 %vm296_vm0, %v1234_v15  ;;  %1951 = vmatmul.msk.f32.vlgmr.msrb.gmra.mxu3 %vm296_vm0, %v1234_v15  ;;  %vm1529_vm0 = vmor %vm1527_vm8, %vm1528_vm7 }
0x15ad   :  { %1861 = vmatpush.msrb.mxu2 %v1720_v12  ;;  %v1530_v52 = vsel %vm1529_vm0, %v2082_v58, %v1526_v19 }
0x15ae   :  { %v1547_v46 = vmul.f32 %v1530_v52, %v3036_v61  ;;  %v1706_v61 = vld [vmem:[#allocation14 + $0x308] sm:$0xff] }
0x15af   :  { %1862 = vmatpush.msrb.mxu2 %v1719_v41 }
0x15b0   :  { %v1573_v0 = vmul.f32 %v1557_v47, %v1547_v46 }
0x15b1   :  { %1863 = vmatpush.msrb.mxu2 %v1718_v42 }
0x15b2   :  { %v1599_v27 = vadd.f32 %v1583_v51, %v1573_v0 }
0x15b3   :  { %1864 = vmatpush.msrb.mxu2 %v1717_v17 }
0x15b4   :  { %1797 = vmatmul.f32.vlgmr.msra.gmra.mxu2 %v2084_v60  ;;  %1817 = vmatmul.f32.vlgmr.msra.gmra.mxu3 %v2086_v22  ;;  %2087 = vtanh.f32 %v1599_v27 }
0x15b5   :  { %1865 = vmatpush.msrb.mxu2 %v1716_v62 }
0x15b7   :  { %1866 = vmatpush.msrb.mxu2 %v1715_v44 }
0x15b9   :  { %1867 = vmatpush.msrb.mxu2 %v1714_v18 }
0x15ba   :  { %v2088_v30 = vpop.eup %2087 }
0x15bb   :  { %1868 = vmatpush.msrb.mxu2 %v1713_v45 }
0x15bd   :  { %1869 = vmatpush.msrb.mxu2 %v1712_v54 }
0x15bf   :  { %1870 = vmatpush.msrb.mxu2 %v1711_v50 }
0x15c1   :  { %1871 = vmatpush.msrb.mxu2 %v1710_v23 }
0x15c3   :  { %1872 = vmatpush.msrb.mxu2 %v1709_v25 }
0x15c5   :  { %1873 = vmatpush.msrb.mxu2 %v1708_v28 }
0x15c7   :  { %1874 = vmatpush.msrb.mxu2 %v1707_v29 }
0x15c9   :  { %1875 = vmatpush.msrb.mxu2 %v1706_v61 }
0x15cb   :  { %1876 = vmatpush.msrb.mxu2 %v1705_v48 }
0x15cc   :  { %1877 = vmatmul.f32.vlgmr.msrb.gmra.mxu2 %v2088_v30 }
0x162f   :  { %v1256_v37 = vpop.f32.mrf.mxu2  ;;  %v1276_v53 = vpop.f32.mrf.mxu3 }
0x1630   :  { %v1257_v38 = vadd.f32 %v1256_v37, %v2543_v26  ;;  %v1277_v58 = vadd.f32 %v1276_v53, %v2549_v33  ;;  %v1736_v26 = vld [vmem:[#allocation14 + $0x3f8] sm:$0xff]  ;;  %v1730_v33 = vld [vmem:[#allocation14 + $0x3c8] sm:$0xff] }
0x1631   :  { %1881 = vmatpush.msrb.mxu3 %v1736_v26 }
0x1632   :  { %v1279_v39 = vadd.f32 %v1257_v38, %v289_v35 }
0x1633   :  { %1882 = vmatpush.msrb.mxu3 %v1735_v2 }
0x1634   :  { %v1280_v40 = vmul.f32 0.5, %v1279_v39  ;;  %v1584_v39 = vperm.slane %v2980_v16, 7 }
0x1635   :  { %1883 = vmatpush.msrb.mxu3 %v1734_v3 }
0x1636   :  { %2089 = vtanh.f32 %v1280_v40 }
0x1637   :  { %1884 = vmatpush.msrb.mxu3 %v1733_v4 }
0x1639   :  { %1885 = vmatpush.msrb.mxu3 %v1732_v32 }
0x163b   :  { %1886 = vmatpush.msrb.mxu3 %v1731_v5 }
0x163c   :  { %v2090_v43 = vpop.eup %2089 }
0x163d   :  { %v1282_v56 = vadd.f32 1.0, %v2090_v43  ;;  %1887 = vmatpush.msrb.mxu3 %v1730_v33 }
0x163f   :  { %v1283_v57 = vmul.f32 0.5, %v1282_v56  ;;  %1888 = vmatpush.msrb.mxu3 %v1729_v36  ;;  %v1758_v56 = vpop.f32.mrf.mxu0 }
0x1641   :  { %v1284_v1 = vmul.f32 %v1283_v57, %v1277_v58  ;;  %1889 = vmatpush.msrb.mxu3 %v1728_v6  ;;  %v1287_v12 = vsub.f32 1.0, %v1283_v57  ;;  %v1293_v41 = vmul.f32 %v1283_v57, %v3023_v49  ;;  %v1759_v57 = vadd.f32 %v2000_v55, %v1758_v56  ;;  %v1778_v58 = vpop.f32.mrf.mxu1 }
0x1643   :  { %v1285_v20 = vadd.f32 %v1284_v1, %v290_v59  ;;  %1890 = vmatpush.msrb.mxu3 %v1727_v7  ;;  %v1798_v59 = vpop.f32.mrf.mxu2  ;;  %v1779_v1 = vadd.f32 %v1778_v58, %v1759_v57 }
0x1645   :  { %2091 = vtanh.f32 %v1285_v20  ;;  %1891 = vmatpush.msrb.mxu3 %v1726_v8  ;;  %v1799_v20 = vadd.f32 %v1798_v59, %v1779_v1 }
0x1647   :  { %1892 = vmatpush.msrb.mxu3 %v1725_v9  ;;  %v1838_v26 = vpop.f32.mrf.mxu0 }
0x1649   :  { %1893 = vmatpush.msrb.mxu3 %v1724_v11  ;;  %v1858_v16 = vpop.f32.mrf.mxu1 }
0x164b   :  { %v2092_v24 = vpop.eup %2091  ;;  %1894 = vmatpush.msrb.mxu3 %v1723_v21 }
0x164c   :  { %1289 = vrot.lane.b32.xlu2 %v2092_v24, %s2330_s3 }
0x164d   :  { %1895 = vmatpush.msrb.mxu3 %v1722_v13 }
0x164f   :  { %1896 = vmatpush.msrb.mxu3 %v1721_v63  ;;  %v1878_v3 = vpop.f32.mrf.mxu2 }
0x16a6   :  { %v1290_v15 = vpop.permute.xlu2 %1289 }
0x16a7   :  { %v1292_v42 = vmul.f32 %v1290_v15, %v1287_v12 }
0x16a9   :  { %v1294_v17 = vadd.f32 %v1293_v41, %v1292_v42 }
0x16ab   :  { %1295 = vst.msk [vmem:[#allocation2 + $0x38] sm:$0xff] %vm419_vm1, %v1294_v17 }
0x16b2   :  { %v1303_v60 = vld [vmem:[#allocation2 + $0x38] sm:$0xff] }
0x16b3   :  { %v1316_v62 = vmul.f32 %v2934_v14, %v1303_v60 }
0x16b5   :  { %v1359_v19 = vrot.slane %v1316_v62, 4 }
0x16b7   :  { %v1360_v22 = vadd.f32 %v1359_v19, %v1316_v62 }
0x16b9   :  { %v1361_v44 = vrot.slane %v1360_v22, 2 }
0x16bb   :  { %v1362_v18 = vadd.f32 %v1361_v44, %v1360_v22 }
0x16bd   :  { %v1363_v52 = vrot.slane %v1362_v18, 1 }
0x16bf   :  { %v1364_v45 = vadd.f32 %v1363_v52, %v1362_v18 }
0x16c1   :  { %v1372_v46 = vmul.f32 0.25, %v1364_v45 }
0x16c3   :  { %v1380_v47 = vsub.f32 %v1303_v60, %v1372_v46 }
0x16c5   :  { %v1388_v49 = vmul.f32 %v2934_v14, %v1380_v47  ;;  %v1558_v14 = vperm.slane %v2972_v10, 7  ;;  %v1818_v10 = vpop.f32.mrf.mxu3 }
0x16c6   :  { %v1819_v24 = vadd.f32 %v1818_v10, %v1799_v20 }
0x16c7   :  { %v1396_v54 = vmul.f32 %v1388_v49, %v1388_v49 }
0x16c8   :  { %v1839_v2 = vadd.f32 %v1838_v26, %v1819_v24 }
0x16c9   :  { %v1439_v50 = vrot.slane %v1396_v54, 4 }
0x16ca   :  { %v1859_v4 = vadd.f32 %v1858_v16, %v1839_v2 }
0x16cb   :  { %v1440_v0 = vadd.f32 %v1439_v50, %v1396_v54 }
0x16cc   :  { %v1879_v32 = vadd.f32 %v1878_v3, %v1859_v4 }
0x16cd   :  { %v1441_v51 = vrot.slane %v1440_v0, 2 }
0x16cf   :  { %v1442_v23 = vadd.f32 %v1441_v51, %v1440_v0 }
0x16d1   :  { %v1443_v25 = vrot.slane %v1442_v23, 1 }
0x16d3   :  { %v1444_v27 = vadd.f32 %v1443_v25, %v1442_v23 }
0x16d5   :  { %v1452_v28 = vmul.f32 0.25, %v1444_v27 }
0x16d7   :  { %v1460_v29 = vadd.f32 1e-05, %v1452_v28 }
0x16d9   :  { %2093 = vrsqrt.f32 %v1460_v29  ;;  %vm1537_vm9 = vweird.f32 %v1460_v29 }
0x16df   :  { %v2094_v61 = vpop.eup %2093 }
0x16e0   :  { %v1532_v48 = vmul.f32 %v2094_v61, %v1460_v29  ;;  %vm1538_vm1 = vweird.f32 %v2094_v61 }
0x16e1   :  { %vm1539_vm10 = vmor %vm1537_vm9, %vm1538_vm1 }
0x16e2   :  { %v1533_v30 = vmul.f32 %v2094_v61, %v1532_v48 }
0x16e4   :  { %v1534_v31 = vmul.f32 0.5, %v1533_v30 }
0x16e6   :  { %v1535_v34 = vsub.f32 1.5, %v1534_v31 }
0x16e8   :  { %v1536_v35 = vmul.f32 %v2094_v61, %v1535_v34 }
0x16ea   :  { %v1540_v37 = vsel %vm1539_vm10, %v2094_v61, %v1536_v35 }
0x16eb   :  { %v1548_v38 = vmul.f32 %v1540_v37, %v1380_v47 }
0x16ed   :  { %v1574_v40 = vmul.f32 %v1558_v14, %v1548_v38 }
0x16ef   :  { %v1600_v43 = vadd.f32 %v1584_v39, %v1574_v40 }
0x16f1   :  { %2095 = vtanh.f32 %v1600_v43 }
0x16f7   :  { %v2096_v53 = vpop.eup %2095 }
0x16f8   :  { %1897 = vmatmul.f32.vlgmr.msrb.gmra.mxu3 %v2096_v53 }
0x177b   :  { %v1898_v5 = vpop.f32.mrf.mxu3 }
0x177c   :  { %v1899_v33 = vadd.f32 %v1898_v5, %v1879_v32 }
0x177e   :  { %1901 = vst [vmem:[#allocation15] sm:$0xff] %v1899_v33 }
0x177f   :  { %1912 = dma.vmem_to_hbm [thread:$0]  %s1908_s24, 128, %s1910_s26, [#allocation5]  }
0x1780   :  { %2315 = dma.done.wait [#allocation5], 128  }
0x1781   :  { %2316 = vsyncadd [#allocation5], 4294967168 }
0x1782   :  { %1917 = vsyncpa [#allocation4], 1 }
0x1783   :  { %1918 = vsyncpa [#allocation7], 1 }
0x1784   :  { %1919 = vsyncpa [#allocation10], 1 }
0x1785   :  { %1920 = vsyncpa [#allocation13], 1 }
0x1786   :  { %1921 = vsyncpa [#allocation5], 1 }

</bundles_post_ra>
